<compile_context>
chip_gen: v7x
topology: tpu7x:2x2x1
jax: 0.10.0
libtpu: 0.0.40
codegen_flags: <defaults>
</compile_context>

<pallas_src>
import numpy as np

import jax
import jax.numpy as jnp
from jax.experimental import pallas as pl
from jax.experimental.pallas import tpu as pltpu


_BLOCK_N = 128  # samples per grid step (good default for v5e/v6e/v7x)


def _round_up(a, m):
    return (a + m - 1) // m * m


# ---------------------------------------------------------------------------
# Fused forward kernel: one batch tile (bn samples) per grid step.
#
# Kernel-side layouts (row index always = group * bn + sample):
#   x     : (28, bn, 28) bf16   xk[r, b, w] = x[b, 0, r, w]
#   conv1 : acc (24*bn, 256)    lanes [0,128) = conv col 2*pw, [128,256) = 2*pw+1
#   a1    : (12*bn, 128) bf16   lane pw*10 + co (120..127 zero-padded)
#   y2    : (10*bn, 256) bf16   lane ow*20 + d  (200..255 zero-padded)
#   h1    : (bn, 512)    bf16   lanes 500..511 zero-padded
#   out   : (bn, 10)     f32    log-probabilities
# ---------------------------------------------------------------------------
def _make_kernel(bn):
    f32 = jnp.float32
    bf16 = jnp.bfloat16

    def kernel(x_ref, w1_ref, b1_ref, v2_ref, b2_ref,
               f1_ref, fb1_ref, f2_ref, fb2_ref, o_ref):
        # --- conv1 (5x5, 1->10) + ReLU + 2x2/2 max-pool, batched ------------
        xall = x_ref[...].reshape(28 * bn, 28)                 # row r*bn + b
        acc = jnp.dot(xall[0:24 * bn], w1_ref[0], preferred_element_type=f32)
        for i in range(1, 5):
            acc = acc + jnp.dot(xall[i * bn:(i + 24) * bn], w1_ref[i],
                                preferred_element_type=f32)    # (24*bn, 256)
        # Row group r = conv row r; lane halves = even/odd conv column.
        acc4 = acc.reshape(12, 2, bn, 256)
        pooled = jnp.maximum(
            jnp.maximum(acc4[:, 0, :, 0:128], acc4[:, 0, :, 128:256]),
            jnp.maximum(acc4[:, 1, :, 0:128], acc4[:, 1, :, 128:256]),
        ).reshape(12 * bn, 128)
        # bias-add and ReLU commute exactly with the max over pool taps.
        a1 = jnp.maximum(pooled + b1_ref[...], 0.0).astype(bf16)   # (12*bn,128)

        # --- conv2 (3x3, 10->20) + ReLU --------------------------------------
        acc2 = jnp.dot(a1[0:10 * bn], v2_ref[0], preferred_element_type=f32)
        for i in range(1, 3):
            acc2 = acc2 + jnp.dot(a1[i * bn:(i + 10) * bn], v2_ref[i],
                                  preferred_element_type=f32)   # (10*bn, 256)
        y2 = jnp.maximum(acc2 + b2_ref[...], 0.0).astype(bf16)     # (10*bn,256)

        # --- fc1 (2000->500, packed as 10 x (256,512)) + ReLU ----------------
        h1 = jnp.dot(y2[0:bn], f1_ref[0], preferred_element_type=f32)
        for h in range(1, 10):
            h1 = h1 + jnp.dot(y2[h * bn:(h + 1) * bn], f1_ref[h],
                              preferred_element_type=f32)        # (bn, 512)
        h1 = jnp.maximum(h1 + fb1_ref[...], 0.0).astype(bf16)

        # --- fc2 (500->10) + log_softmax -------------------------------------
        logits = jnp.dot(h1, f2_ref[...],
                         preferred_element_type=f32) + fb2_ref[...]   # (bn, 10)
        m = jnp.max(logits, axis=-1, keepdims=True)
        s = logits - m
        lse = jnp.log(jnp.sum(jnp.exp(s), axis=-1, keepdims=True))
        o_ref[...] = (s - lse).astype(o_ref.dtype)

    return kernel


def _resident_spec(shape):
    """Whole-array VMEM block whose index never changes (fetched once)."""
    zero = (0,) * len(shape)
    return pl.BlockSpec(shape, lambda b, _z=zero: _z)


@jax.jit
def convnet_forward(x, prep):
    """x: (N, 1, 28, 28) float32 -> (N, 10) log-probabilities."""
    n = x.shape[0]
    bn = min(_BLOCK_N, _round_up(n, 16))
    n_pad = _round_up(n, bn)

    # Single fused glue op: bf16 cast + transpose so the batch dim becomes the
    # matmul M dimension with no in-kernel relayout.  xk[r, b, w] = x[b, 0, r, w]
    xk = jnp.transpose(x.reshape(n, 28, 28), (1, 0, 2)).astype(jnp.bfloat16)
    if n_pad != n:
        xk = jnp.pad(xk, ((0, 0), (0, n_pad - n), (0, 0)))

    weights = (prep["w1"], prep["b1"], prep["v2"], prep["b2"],
               prep["f1"], prep["fb1"], prep["f2"], prep["fb2"])

    in_specs = [pl.BlockSpec((28, bn, 28), lambda b: (0, b, 0))]  # x tile
    in_specs += [_resident_spec(w.shape) for w in weights]

    out = pl.pallas_call(
        _make_kernel(bn),
        out_shape=jax.ShapeDtypeStruct((n_pad, 10), jnp.float32),
        grid_spec=pltpu.PrefetchScalarGridSpec(
            num_scalar_prefetch=0,
            grid=(n_pad // bn,),
            in_specs=in_specs,
            out_specs=pl.BlockSpec((bn, 10), lambda b: (b, 0)),
        ),
        compiler_params=pltpu.CompilerParams(
            dimension_semantics=("parallel",),
            vmem_limit_bytes=48 * 1024 * 1024,
        ),
    )(xk, *weights)
    return out[:n]


# ---------------------------------------------------------------------------
# Parameters: PyTorch-layout init + one-time host-side packing of the fused
# (Toeplitz / permuted / lane-padded / bf16) weights used by the kernel.
# ---------------------------------------------------------------------------
def init_params(key):
    def uni(k, shape, fan_in):
        bound = 1.0 / (fan_in ** 0.5)
        return jax.random.uniform(k, shape, jnp.float32, -bound, bound)

    ks = jax.random.split(key, 8)
    return {
        "conv1_w": uni(ks[0], (10, 1, 5, 5), 1 * 5 * 5),
        "conv1_b": uni(ks[1], (10,), 1 * 5 * 5),
        "conv2_w": uni(ks[2], (20, 10, 3, 3), 10 * 3 * 3),
        "conv2_b": uni(ks[3], (20,), 10 * 3 * 3),
        "fc1_w": uni(ks[4], (500, 20 * 10 * 10), 20 * 10 * 10),  # (out, in)
        "fc1_b": uni(ks[5], (500,), 20 * 10 * 10),
        "fc2_w": uni(ks[6], (10, 500), 500),
        "fc2_b": uni(ks[7], (10,), 500),
    }


def prepare_params(params):
    """One-time host-side weight packing (no per-forward transposes)."""
    wc1 = np.asarray(params["conv1_w"], np.float32)   # (10, 1, 5, 5)
    bc1 = np.asarray(params["conv1_b"], np.float32)   # (10,)
    wc2 = np.asarray(params["conv2_w"], np.float32)   # (20, 10, 3, 3)
    bc2 = np.asarray(params["conv2_b"], np.float32)   # (20,)
    wf1 = np.asarray(params["fc1_w"], np.float32)     # (500, 2000)
    bf1 = np.asarray(params["fc1_b"], np.float32)     # (500,)
    wf2 = np.asarray(params["fc2_w"], np.float32)     # (10, 500)
    bf2 = np.asarray(params["fc2_b"], np.float32)     # (10,)

    # conv1 Toeplitz with both pool-column taps packed in 256 lanes:
    #   lanes [0,128):   w1[i, 2*pw + j,       pw*10 + co] = wc1[co, 0, i, j]
    #   lanes [128,256): w1[i, 2*pw + 1 + j, 128 + pw*10 + co] = wc1[co, 0, i, j]
    # (lanes 120..127 / 248..255 stay zero -> lane padding of the 10 channels)
    w1 = np.zeros((5, 28, 256), np.float32)
    for i in range(5):
        for pw in range(12):
            for j in range(5):
                w1[i, 2 * pw + j, pw * 10:pw * 10 + 10] = wc1[:, 0, i, j]
                w1[i, 2 * pw + 1 + j, 128 + pw * 10:128 + pw * 10 + 10] = \
                    wc1[:, 0, i, j]

    b1 = np.zeros((1, 128), np.float32)
    b1[0, :120] = np.tile(bc1, 12)       # lane pw*10 + co -> bc1[co]

    # conv2 Toeplitz over the (pw, c) lane layout of a1 (K padded to 128,
    # N padded to 256):  v2[i, (ow+j)*10 + c, ow*20 + d] = wc2[d, c, i, j]
    v2 = np.zeros((3, 128, 256), np.float32)
    for i in range(3):
        for ow in range(10):
            for j in range(3):
                v2[i, (ow + j) * 10:(ow + j + 1) * 10,
                   ow * 20:(ow + 1) * 20] = wc2[:, :, i, j].T

    b2 = np.zeros((1, 256), np.float32)
    b2[0, :200] = np.tile(bc2, 10)       # lane ow*20 + d -> bc2[d]

    # fc1: fold PyTorch's NCHW flatten (feat = d*100 + h*10 + ow) into a
    # per-row weight stack:  f1[h, ow*20 + d, m] = wf1[m, d*100 + h*10 + ow]
    # with K padded 200 -> 256 and M padded 500 -> 512 (zeros).
    f1 = np.zeros((10, 256, 512), np.float32)
    w4 = wf1.reshape(500, 20, 10, 10)                       # [m, d, h, ow]
    f1[:, :200, :500] = w4.transpose(2, 3, 1, 0).reshape(10, 200, 500)
    fb1 = np.zeros((1, 512), np.float32)
    fb1[0, :500] = bf1

    # fc2: K padded 500 -> 512 (zero rows so padded h1 lanes contribute 0).
    f2 = np.zeros((512, 10), np.float32)
    f2[:500, :] = wf2.T
    fb2 = bf2[None, :]

    bf16 = jnp.bfloat16
    return {
        "w1": jnp.asarray(w1, bf16),
        "b1": jnp.asarray(b1, jnp.float32),
        "v2": jnp.asarray(v2, bf16),
        "b2": jnp.asarray(b2, jnp.float32),
        "f1": jnp.asarray(f1, bf16),
        "fb1": jnp.asarray(fb1, jnp.float32),
        "f2": jnp.asarray(f2, bf16),
        "fb2": jnp.asarray(fb2, jnp.float32),
    }


# ---------------------------------------------------------------------------
# Pure-JAX (XLA) reference of the PyTorch forward, for correctness checking.
# ---------------------------------------------------------------------------
@jax.jit
def reference_forward(x, params):
    y = jax.lax.conv_general_dilated(
        x, params["conv1_w"], (1, 1), "VALID",
        dimension_numbers=("NCHW", "OIHW", "NCHW"))
    y = y + params["conv1_b"][None, :, None, None]
    y = jnp.maximum(y, 0.0)
    y = jax.lax.reduce_window(y, -jnp.inf, jax.lax.max,
                              (1, 1, 2, 2), (1, 1, 2, 2), "VALID")
    y = jax.lax.conv_general_dilated(
        y, params["conv2_w"], (1, 1), "VALID",
        dimension_numbers=("NCHW", "OIHW", "NCHW"))
    y = y + params["conv2_b"][None, :, None, None]
    y = jnp.maximum(y, 0.0)
    y = y.reshape(x.shape[0], -1)
    y = jnp.maximum(y @ params["fc1_w"].T + params["fc1_b"], 0.0)
    y = y @ params["fc2_w"].T + params["fc2_b"]
    return jax.nn.log_softmax(y, axis=1)


if __name__ == "__main__":
    key = jax.random.PRNGKey(0)
    pkey, xkey = jax.random.split(key)
    params = init_params(pkey)
    prep = prepare_params(params)   # one-time host-side packing

    # MNIST-shaped input implied by fc1 = Linear(20*10*10, 500): (N, 1, 28, 28)
    x = jax.random.normal(xkey, (2, 1, 28, 28), dtype=jnp.float32)

    out = convnet_forward(x, prep)
    out = jax.block_until_ready(out)

    assert out.shape == (2, 10)
    # log_softmax rows must (approximately) sum to 1 in probability space
    assert bool(jnp.all(jnp.abs(jnp.sum(jnp.exp(out), axis=1) - 1.0) < 1e-3))
    # cross-check against the pure-JAX reference (bf16 MXU operands => loose tol)
    ref = jax.block_until_ready(reference_forward(x, params))
    assert bool(jnp.all(jnp.abs(out - ref) < 5e-2)), "mismatch vs reference"
    print("KERNEL_OK")
</pallas_src>

<mosaic_0001>
module attributes {stable_mosaic.version = 11 : i64} {
  func.func @kernel(%arg0: i32, %arg1: memref<28x16x28xbf16, #tpu.memory_space<vmem>>, %arg2: memref<5x28x256xbf16, #tpu.memory_space<vmem>>, %arg3: memref<1x128xf32, #tpu.memory_space<vmem>>, %arg4: memref<3x128x256xbf16, #tpu.memory_space<vmem>>, %arg5: memref<1x256xf32, #tpu.memory_space<vmem>>, %arg6: memref<10x256x512xbf16, #tpu.memory_space<vmem>>, %arg7: memref<1x512xf32, #tpu.memory_space<vmem>>, %arg8: memref<512x10xbf16, #tpu.memory_space<vmem>>, %arg9: memref<1x10xf32, #tpu.memory_space<vmem>>, %arg10: memref<16x10xf32, #tpu.memory_space<vmem>>) attributes {dimension_semantics = [#tpu.dimension_semantics<parallel>], iteration_bounds = array<i64: 1>, scalar_prefetch = 0 : i64, scratch_operands = 0 : i64, tpu.core_type = #tpu.core_type<tc>, window_params = [{transform_indices = @transform_0, window_bounds = array<i64: 28, 16, 28>}, {pipeline_mode = #tpu.pipeline_mode<synchronous>, transform_indices = @transform_1, window_bounds = array<i64: 5, 28, 256>}, {pipeline_mode = #tpu.pipeline_mode<synchronous>, transform_indices = @transform_2, window_bounds = array<i64: 1, 128>}, {pipeline_mode = #tpu.pipeline_mode<synchronous>, transform_indices = @transform_3, window_bounds = array<i64: 3, 128, 256>}, {pipeline_mode = #tpu.pipeline_mode<synchronous>, transform_indices = @transform_4, window_bounds = array<i64: 1, 256>}, {pipeline_mode = #tpu.pipeline_mode<synchronous>, transform_indices = @transform_5, window_bounds = array<i64: 10, 256, 512>}, {pipeline_mode = #tpu.pipeline_mode<synchronous>, transform_indices = @transform_6, window_bounds = array<i64: 1, 512>}, {pipeline_mode = #tpu.pipeline_mode<synchronous>, transform_indices = @transform_7, window_bounds = array<i64: 512, 10>}, {pipeline_mode = #tpu.pipeline_mode<synchronous>, transform_indices = @transform_8, window_bounds = array<i64: 1, 10>}, {transform_indices = @transform_9, window_bounds = array<i64: 16, 10>}]} {
    %c0 = arith.constant 0 : index
    %c0_0 = arith.constant 0 : index
    %c0_1 = arith.constant 0 : index
    %0 = vector.load %arg1[%c0, %c0_0, %c0_1] : memref<28x16x28xbf16, #tpu.memory_space<vmem>>, vector<28x16x28xbf16>
    %1 = vector.shape_cast %0 : vector<28x16x28xbf16> to vector<448x28xbf16>
    %2 = vector.extract_strided_slice %1 {offsets = [0, 0], sizes = [384, 28], strides = [1, 1]} : vector<448x28xbf16> to vector<384x28xbf16>
    %c0_2 = arith.constant 0 : index
    %c0_3 = arith.constant 0 : index
    %c0_4 = arith.constant 0 : index
    %3 = vector.load %arg2[%c0_2, %c0_3, %c0_4] : memref<5x28x256xbf16, #tpu.memory_space<vmem>>, vector<1x28x256xbf16>
    %4 = vector.shape_cast %3 : vector<1x28x256xbf16> to vector<28x256xbf16>
    %cst = arith.constant dense<0.000000e+00> : vector<384x256xf32>
    %5 = tpu.matmul %2, %4, %cst {dimension_numbers = #tpu.dot_dimension_numbers<[1], [0], [0], [1], [0, 0, 1, 1], [], []>} : vector<384x28xbf16>, vector<28x256xbf16>, vector<384x256xf32> -> vector<384x256xf32>
    %6 = vector.extract_strided_slice %1 {offsets = [16, 0], sizes = [384, 28], strides = [1, 1]} : vector<448x28xbf16> to vector<384x28xbf16>
    %c1 = arith.constant 1 : index
    %c0_5 = arith.constant 0 : index
    %c0_6 = arith.constant 0 : index
    %7 = vector.load %arg2[%c1, %c0_5, %c0_6] : memref<5x28x256xbf16, #tpu.memory_space<vmem>>, vector<1x28x256xbf16>
    %8 = vector.shape_cast %7 : vector<1x28x256xbf16> to vector<28x256xbf16>
    %cst_7 = arith.constant dense<0.000000e+00> : vector<384x256xf32>
    %9 = tpu.matmul %6, %8, %cst_7 {dimension_numbers = #tpu.dot_dimension_numbers<[1], [0], [0], [1], [0, 0, 1, 1], [], []>} : vector<384x28xbf16>, vector<28x256xbf16>, vector<384x256xf32> -> vector<384x256xf32>
    %10 = arith.addf %5, %9 : vector<384x256xf32>
    %11 = vector.extract_strided_slice %1 {offsets = [32, 0], sizes = [384, 28], strides = [1, 1]} : vector<448x28xbf16> to vector<384x28xbf16>
    %c2 = arith.constant 2 : index
    %c0_8 = arith.constant 0 : index
    %c0_9 = arith.constant 0 : index
    %12 = vector.load %arg2[%c2, %c0_8, %c0_9] : memref<5x28x256xbf16, #tpu.memory_space<vmem>>, vector<1x28x256xbf16>
    %13 = vector.shape_cast %12 : vector<1x28x256xbf16> to vector<28x256xbf16>
    %cst_10 = arith.constant dense<0.000000e+00> : vector<384x256xf32>
    %14 = tpu.matmul %11, %13, %cst_10 {dimension_numbers = #tpu.dot_dimension_numbers<[1], [0], [0], [1], [0, 0, 1, 1], [], []>} : vector<384x28xbf16>, vector<28x256xbf16>, vector<384x256xf32> -> vector<384x256xf32>
    %15 = arith.addf %10, %14 : vector<384x256xf32>
    %16 = vector.extract_strided_slice %1 {offsets = [48, 0], sizes = [384, 28], strides = [1, 1]} : vector<448x28xbf16> to vector<384x28xbf16>
    %c3 = arith.constant 3 : index
    %c0_11 = arith.constant 0 : index
    %c0_12 = arith.constant 0 : index
    %17 = vector.load %arg2[%c3, %c0_11, %c0_12] : memref<5x28x256xbf16, #tpu.memory_space<vmem>>, vector<1x28x256xbf16>
    %18 = vector.shape_cast %17 : vector<1x28x256xbf16> to vector<28x256xbf16>
    %cst_13 = arith.constant dense<0.000000e+00> : vector<384x256xf32>
    %19 = tpu.matmul %16, %18, %cst_13 {dimension_numbers = #tpu.dot_dimension_numbers<[1], [0], [0], [1], [0, 0, 1, 1], [], []>} : vector<384x28xbf16>, vector<28x256xbf16>, vector<384x256xf32> -> vector<384x256xf32>
    %20 = arith.addf %15, %19 : vector<384x256xf32>
    %21 = vector.extract_strided_slice %1 {offsets = [64, 0], sizes = [384, 28], strides = [1, 1]} : vector<448x28xbf16> to vector<384x28xbf16>
    %c4 = arith.constant 4 : index
    %c0_14 = arith.constant 0 : index
    %c0_15 = arith.constant 0 : index
    %22 = vector.load %arg2[%c4, %c0_14, %c0_15] : memref<5x28x256xbf16, #tpu.memory_space<vmem>>, vector<1x28x256xbf16>
    %23 = vector.shape_cast %22 : vector<1x28x256xbf16> to vector<28x256xbf16>
    %cst_16 = arith.constant dense<0.000000e+00> : vector<384x256xf32>
    %24 = tpu.matmul %21, %23, %cst_16 {dimension_numbers = #tpu.dot_dimension_numbers<[1], [0], [0], [1], [0, 0, 1, 1], [], []>} : vector<384x28xbf16>, vector<28x256xbf16>, vector<384x256xf32> -> vector<384x256xf32>
    %25 = arith.addf %20, %24 : vector<384x256xf32>
    %26 = vector.shape_cast %25 : vector<384x256xf32> to vector<12x2x16x256xf32>
    %27 = vector.extract_strided_slice %26 {offsets = [0, 0, 0, 0], sizes = [12, 1, 16, 128], strides = [1, 1, 1, 1]} : vector<12x2x16x256xf32> to vector<12x1x16x128xf32>
    %28 = vector.shape_cast %27 : vector<12x1x16x128xf32> to vector<12x16x128xf32>
    %29 = vector.extract_strided_slice %26 {offsets = [0, 0, 0, 128], sizes = [12, 1, 16, 128], strides = [1, 1, 1, 1]} : vector<12x2x16x256xf32> to vector<12x1x16x128xf32>
    %30 = vector.shape_cast %29 : vector<12x1x16x128xf32> to vector<12x16x128xf32>
    %31 = arith.maximumf %28, %30 : vector<12x16x128xf32>
    %32 = vector.extract_strided_slice %26 {offsets = [0, 1, 0, 0], sizes = [12, 1, 16, 128], strides = [1, 1, 1, 1]} : vector<12x2x16x256xf32> to vector<12x1x16x128xf32>
    %33 = vector.shape_cast %32 : vector<12x1x16x128xf32> to vector<12x16x128xf32>
    %34 = vector.extract_strided_slice %26 {offsets = [0, 1, 0, 128], sizes = [12, 1, 16, 128], strides = [1, 1, 1, 1]} : vector<12x2x16x256xf32> to vector<12x1x16x128xf32>
    %35 = vector.shape_cast %34 : vector<12x1x16x128xf32> to vector<12x16x128xf32>
    %36 = arith.maximumf %33, %35 : vector<12x16x128xf32>
    %37 = arith.maximumf %31, %36 : vector<12x16x128xf32>
    %38 = vector.shape_cast %37 : vector<12x16x128xf32> to vector<192x128xf32>
    %c0_17 = arith.constant 0 : index
    %c0_18 = arith.constant 0 : index
    %39 = vector.load %arg3[%c0_17, %c0_18] : memref<1x128xf32, #tpu.memory_space<vmem>>, vector<1x128xf32>
    %40 = vector.broadcast %39 : vector<1x128xf32> to vector<192x128xf32>
    %41 = arith.addf %38, %40 : vector<192x128xf32>
    %cst_19 = arith.constant 0.000000e+00 : f32
    %42 = vector.broadcast %cst_19 : f32 to vector<192x128xf32>
    %43 = arith.maximumf %41, %42 : vector<192x128xf32>
    %44 = arith.truncf %43 : vector<192x128xf32> to vector<192x128xbf16>
    %45 = vector.extract_strided_slice %44 {offsets = [0, 0], sizes = [160, 128], strides = [1, 1]} : vector<192x128xbf16> to vector<160x128xbf16>
    %c0_20 = arith.constant 0 : index
    %c0_21 = arith.constant 0 : index
    %c0_22 = arith.constant 0 : index
    %46 = vector.load %arg4[%c0_20, %c0_21, %c0_22] : memref<3x128x256xbf16, #tpu.memory_space<vmem>>, vector<1x128x256xbf16>
    %47 = vector.shape_cast %46 : vector<1x128x256xbf16> to vector<128x256xbf16>
    %cst_23 = arith.constant dense<0.000000e+00> : vector<160x256xf32>
    %48 = tpu.matmul %45, %47, %cst_23 {dimension_numbers = #tpu.dot_dimension_numbers<[1], [0], [0], [1], [0, 0, 1, 1], [], []>} : vector<160x128xbf16>, vector<128x256xbf16>, vector<160x256xf32> -> vector<160x256xf32>
    %49 = vector.extract_strided_slice %44 {offsets = [16, 0], sizes = [160, 128], strides = [1, 1]} : vector<192x128xbf16> to vector<160x128xbf16>
    %c1_24 = arith.constant 1 : index
    %c0_25 = arith.constant 0 : index
    %c0_26 = arith.constant 0 : index
    %50 = vector.load %arg4[%c1_24, %c0_25, %c0_26] : memref<3x128x256xbf16, #tpu.memory_space<vmem>>, vector<1x128x256xbf16>
    %51 = vector.shape_cast %50 : vector<1x128x256xbf16> to vector<128x256xbf16>
    %cst_27 = arith.constant dense<0.000000e+00> : vector<160x256xf32>
    %52 = tpu.matmul %49, %51, %cst_27 {dimension_numbers = #tpu.dot_dimension_numbers<[1], [0], [0], [1], [0, 0, 1, 1], [], []>} : vector<160x128xbf16>, vector<128x256xbf16>, vector<160x256xf32> -> vector<160x256xf32>
    %53 = arith.addf %48, %52 : vector<160x256xf32>
    %54 = vector.extract_strided_slice %44 {offsets = [32, 0], sizes = [160, 128], strides = [1, 1]} : vector<192x128xbf16> to vector<160x128xbf16>
    %c2_28 = arith.constant 2 : index
    %c0_29 = arith.constant 0 : index
    %c0_30 = arith.constant 0 : index
    %55 = vector.load %arg4[%c2_28, %c0_29, %c0_30] : memref<3x128x256xbf16, #tpu.memory_space<vmem>>, vector<1x128x256xbf16>
    %56 = vector.shape_cast %55 : vector<1x128x256xbf16> to vector<128x256xbf16>
    %cst_31 = arith.constant dense<0.000000e+00> : vector<160x256xf32>
    %57 = tpu.matmul %54, %56, %cst_31 {dimension_numbers = #tpu.dot_dimension_numbers<[1], [0], [0], [1], [0, 0, 1, 1], [], []>} : vector<160x128xbf16>, vector<128x256xbf16>, vector<160x256xf32> -> vector<160x256xf32>
    %58 = arith.addf %53, %57 : vector<160x256xf32>
    %c0_32 = arith.constant 0 : index
    %c0_33 = arith.constant 0 : index
    %59 = vector.load %arg5[%c0_32, %c0_33] : memref<1x256xf32, #tpu.memory_space<vmem>>, vector<1x256xf32>
    %60 = vector.broadcast %59 : vector<1x256xf32> to vector<160x256xf32>
    %61 = arith.addf %58, %60 : vector<160x256xf32>
    %cst_34 = arith.constant 0.000000e+00 : f32
    %62 = vector.broadcast %cst_34 : f32 to vector<160x256xf32>
    %63 = arith.maximumf %61, %62 : vector<160x256xf32>
    %64 = arith.truncf %63 : vector<160x256xf32> to vector<160x256xbf16>
    %65 = vector.extract_strided_slice %64 {offsets = [0, 0], sizes = [16, 256], strides = [1, 1]} : vector<160x256xbf16> to vector<16x256xbf16>
    %c0_35 = arith.constant 0 : index
    %c0_36 = arith.constant 0 : index
    %c0_37 = arith.constant 0 : index
    %66 = vector.load %arg6[%c0_35, %c0_36, %c0_37] : memref<10x256x512xbf16, #tpu.memory_space<vmem>>, vector<1x256x512xbf16>
    %67 = vector.shape_cast %66 : vector<1x256x512xbf16> to vector<256x512xbf16>
    %cst_38 = arith.constant dense<0.000000e+00> : vector<16x512xf32>
    %68 = tpu.matmul %65, %67, %cst_38 {dimension_numbers = #tpu.dot_dimension_numbers<[1], [0], [0], [1], [0, 0, 1, 1], [], []>} : vector<16x256xbf16>, vector<256x512xbf16>, vector<16x512xf32> -> vector<16x512xf32>
    %69 = vector.extract_strided_slice %64 {offsets = [16, 0], sizes = [16, 256], strides = [1, 1]} : vector<160x256xbf16> to vector<16x256xbf16>
    %c1_39 = arith.constant 1 : index
    %c0_40 = arith.constant 0 : index
    %c0_41 = arith.constant 0 : index
    %70 = vector.load %arg6[%c1_39, %c0_40, %c0_41] : memref<10x256x512xbf16, #tpu.memory_space<vmem>>, vector<1x256x512xbf16>
    %71 = vector.shape_cast %70 : vector<1x256x512xbf16> to vector<256x512xbf16>
    %cst_42 = arith.constant dense<0.000000e+00> : vector<16x512xf32>
    %72 = tpu.matmul %69, %71, %cst_42 {dimension_numbers = #tpu.dot_dimension_numbers<[1], [0], [0], [1], [0, 0, 1, 1], [], []>} : vector<16x256xbf16>, vector<256x512xbf16>, vector<16x512xf32> -> vector<16x512xf32>
    %73 = arith.addf %68, %72 : vector<16x512xf32>
    %74 = vector.extract_strided_slice %64 {offsets = [32, 0], sizes = [16, 256], strides = [1, 1]} : vector<160x256xbf16> to vector<16x256xbf16>
    %c2_43 = arith.constant 2 : index
    %c0_44 = arith.constant 0 : index
    %c0_45 = arith.constant 0 : index
    %75 = vector.load %arg6[%c2_43, %c0_44, %c0_45] : memref<10x256x512xbf16, #tpu.memory_space<vmem>>, vector<1x256x512xbf16>
    %76 = vector.shape_cast %75 : vector<1x256x512xbf16> to vector<256x512xbf16>
    %cst_46 = arith.constant dense<0.000000e+00> : vector<16x512xf32>
    %77 = tpu.matmul %74, %76, %cst_46 {dimension_numbers = #tpu.dot_dimension_numbers<[1], [0], [0], [1], [0, 0, 1, 1], [], []>} : vector<16x256xbf16>, vector<256x512xbf16>, vector<16x512xf32> -> vector<16x512xf32>
    %78 = arith.addf %73, %77 : vector<16x512xf32>
    %79 = vector.extract_strided_slice %64 {offsets = [48, 0], sizes = [16, 256], strides = [1, 1]} : vector<160x256xbf16> to vector<16x256xbf16>
    %c3_47 = arith.constant 3 : index
    %c0_48 = arith.constant 0 : index
    %c0_49 = arith.constant 0 : index
    %80 = vector.load %arg6[%c3_47, %c0_48, %c0_49] : memref<10x256x512xbf16, #tpu.memory_space<vmem>>, vector<1x256x512xbf16>
    %81 = vector.shape_cast %80 : vector<1x256x512xbf16> to vector<256x512xbf16>
    %cst_50 = arith.constant dense<0.000000e+00> : vector<16x512xf32>
    %82 = tpu.matmul %79, %81, %cst_50 {dimension_numbers = #tpu.dot_dimension_numbers<[1], [0], [0], [1], [0, 0, 1, 1], [], []>} : vector<16x256xbf16>, vector<256x512xbf16>, vector<16x512xf32> -> vector<16x512xf32>
    %83 = arith.addf %78, %82 : vector<16x512xf32>
    %84 = vector.extract_strided_slice %64 {offsets = [64, 0], sizes = [16, 256], strides = [1, 1]} : vector<160x256xbf16> to vector<16x256xbf16>
    %c4_51 = arith.constant 4 : index
    %c0_52 = arith.constant 0 : index
    %c0_53 = arith.constant 0 : index
    %85 = vector.load %arg6[%c4_51, %c0_52, %c0_53] : memref<10x256x512xbf16, #tpu.memory_space<vmem>>, vector<1x256x512xbf16>
    %86 = vector.shape_cast %85 : vector<1x256x512xbf16> to vector<256x512xbf16>
    %cst_54 = arith.constant dense<0.000000e+00> : vector<16x512xf32>
    %87 = tpu.matmul %84, %86, %cst_54 {dimension_numbers = #tpu.dot_dimension_numbers<[1], [0], [0], [1], [0, 0, 1, 1], [], []>} : vector<16x256xbf16>, vector<256x512xbf16>, vector<16x512xf32> -> vector<16x512xf32>
    %88 = arith.addf %83, %87 : vector<16x512xf32>
    %89 = vector.extract_strided_slice %64 {offsets = [80, 0], sizes = [16, 256], strides = [1, 1]} : vector<160x256xbf16> to vector<16x256xbf16>
    %c5 = arith.constant 5 : index
    %c0_55 = arith.constant 0 : index
    %c0_56 = arith.constant 0 : index
    %90 = vector.load %arg6[%c5, %c0_55, %c0_56] : memref<10x256x512xbf16, #tpu.memory_space<vmem>>, vector<1x256x512xbf16>
    %91 = vector.shape_cast %90 : vector<1x256x512xbf16> to vector<256x512xbf16>
    %cst_57 = arith.constant dense<0.000000e+00> : vector<16x512xf32>
    %92 = tpu.matmul %89, %91, %cst_57 {dimension_numbers = #tpu.dot_dimension_numbers<[1], [0], [0], [1], [0, 0, 1, 1], [], []>} : vector<16x256xbf16>, vector<256x512xbf16>, vector<16x512xf32> -> vector<16x512xf32>
    %93 = arith.addf %88, %92 : vector<16x512xf32>
    %94 = vector.extract_strided_slice %64 {offsets = [96, 0], sizes = [16, 256], strides = [1, 1]} : vector<160x256xbf16> to vector<16x256xbf16>
    %c6 = arith.constant 6 : index
    %c0_58 = arith.constant 0 : index
    %c0_59 = arith.constant 0 : index
    %95 = vector.load %arg6[%c6, %c0_58, %c0_59] : memref<10x256x512xbf16, #tpu.memory_space<vmem>>, vector<1x256x512xbf16>
    %96 = vector.shape_cast %95 : vector<1x256x512xbf16> to vector<256x512xbf16>
    %cst_60 = arith.constant dense<0.000000e+00> : vector<16x512xf32>
    %97 = tpu.matmul %94, %96, %cst_60 {dimension_numbers = #tpu.dot_dimension_numbers<[1], [0], [0], [1], [0, 0, 1, 1], [], []>} : vector<16x256xbf16>, vector<256x512xbf16>, vector<16x512xf32> -> vector<16x512xf32>
    %98 = arith.addf %93, %97 : vector<16x512xf32>
    %99 = vector.extract_strided_slice %64 {offsets = [112, 0], sizes = [16, 256], strides = [1, 1]} : vector<160x256xbf16> to vector<16x256xbf16>
    %c7 = arith.constant 7 : index
    %c0_61 = arith.constant 0 : index
    %c0_62 = arith.constant 0 : index
    %100 = vector.load %arg6[%c7, %c0_61, %c0_62] : memref<10x256x512xbf16, #tpu.memory_space<vmem>>, vector<1x256x512xbf16>
    %101 = vector.shape_cast %100 : vector<1x256x512xbf16> to vector<256x512xbf16>
    %cst_63 = arith.constant dense<0.000000e+00> : vector<16x512xf32>
    %102 = tpu.matmul %99, %101, %cst_63 {dimension_numbers = #tpu.dot_dimension_numbers<[1], [0], [0], [1], [0, 0, 1, 1], [], []>} : vector<16x256xbf16>, vector<256x512xbf16>, vector<16x512xf32> -> vector<16x512xf32>
    %103 = arith.addf %98, %102 : vector<16x512xf32>
    %104 = vector.extract_strided_slice %64 {offsets = [128, 0], sizes = [16, 256], strides = [1, 1]} : vector<160x256xbf16> to vector<16x256xbf16>
    %c8 = arith.constant 8 : index
    %c0_64 = arith.constant 0 : index
    %c0_65 = arith.constant 0 : index
    %105 = vector.load %arg6[%c8, %c0_64, %c0_65] : memref<10x256x512xbf16, #tpu.memory_space<vmem>>, vector<1x256x512xbf16>
    %106 = vector.shape_cast %105 : vector<1x256x512xbf16> to vector<256x512xbf16>
    %cst_66 = arith.constant dense<0.000000e+00> : vector<16x512xf32>
    %107 = tpu.matmul %104, %106, %cst_66 {dimension_numbers = #tpu.dot_dimension_numbers<[1], [0], [0], [1], [0, 0, 1, 1], [], []>} : vector<16x256xbf16>, vector<256x512xbf16>, vector<16x512xf32> -> vector<16x512xf32>
    %108 = arith.addf %103, %107 : vector<16x512xf32>
    %109 = vector.extract_strided_slice %64 {offsets = [144, 0], sizes = [16, 256], strides = [1, 1]} : vector<160x256xbf16> to vector<16x256xbf16>
    %c9 = arith.constant 9 : index
    %c0_67 = arith.constant 0 : index
    %c0_68 = arith.constant 0 : index
    %110 = vector.load %arg6[%c9, %c0_67, %c0_68] : memref<10x256x512xbf16, #tpu.memory_space<vmem>>, vector<1x256x512xbf16>
    %111 = vector.shape_cast %110 : vector<1x256x512xbf16> to vector<256x512xbf16>
    %cst_69 = arith.constant dense<0.000000e+00> : vector<16x512xf32>
    %112 = tpu.matmul %109, %111, %cst_69 {dimension_numbers = #tpu.dot_dimension_numbers<[1], [0], [0], [1], [0, 0, 1, 1], [], []>} : vector<16x256xbf16>, vector<256x512xbf16>, vector<16x512xf32> -> vector<16x512xf32>
    %113 = arith.addf %108, %112 : vector<16x512xf32>
    %c0_70 = arith.constant 0 : index
    %c0_71 = arith.constant 0 : index
    %114 = vector.load %arg7[%c0_70, %c0_71] : memref<1x512xf32, #tpu.memory_space<vmem>>, vector<1x512xf32>
    %115 = vector.broadcast %114 : vector<1x512xf32> to vector<16x512xf32>
    %116 = arith.addf %113, %115 : vector<16x512xf32>
    %cst_72 = arith.constant 0.000000e+00 : f32
    %117 = vector.broadcast %cst_72 : f32 to vector<16x512xf32>
    %118 = arith.maximumf %116, %117 : vector<16x512xf32>
    %119 = arith.truncf %118 : vector<16x512xf32> to vector<16x512xbf16>
    %c0_73 = arith.constant 0 : index
    %c0_74 = arith.constant 0 : index
    %120 = vector.load %arg8[%c0_73, %c0_74] : memref<512x10xbf16, #tpu.memory_space<vmem>>, vector<512x10xbf16>
    %cst_75 = arith.constant dense<0.000000e+00> : vector<16x10xf32>
    %121 = tpu.matmul %119, %120, %cst_75 {dimension_numbers = #tpu.dot_dimension_numbers<[1], [0], [0], [1], [0, 0, 1, 1], [], []>} : vector<16x512xbf16>, vector<512x10xbf16>, vector<16x10xf32> -> vector<16x10xf32>
    %c0_76 = arith.constant 0 : index
    %c0_77 = arith.constant 0 : index
    %122 = vector.load %arg9[%c0_76, %c0_77] : memref<1x10xf32, #tpu.memory_space<vmem>>, vector<1x10xf32>
    %123 = vector.broadcast %122 : vector<1x10xf32> to vector<16x10xf32>
    %124 = arith.addf %121, %123 : vector<16x10xf32>
    %cst_78 = arith.constant dense<0xFF800000> : vector<16xf32>
    %125 = vector.multi_reduction <maximumf>, %124, %cst_78 [1] : vector<16x10xf32> to vector<16xf32>
    %126 = vector.shape_cast %125 : vector<16xf32> to vector<16x1xf32>
    %127 = vector.broadcast %126 : vector<16x1xf32> to vector<16x10xf32>
    %128 = arith.subf %124, %127 : vector<16x10xf32>
    %129 = math.exp %128 : vector<16x10xf32>
    %cst_79 = arith.constant dense<0.000000e+00> : vector<16xf32>
    %130 = vector.multi_reduction <add>, %129, %cst_79 [1] : vector<16x10xf32> to vector<16xf32>
    %131 = vector.shape_cast %130 : vector<16xf32> to vector<16x1xf32>
    %132 = math.log %131 : vector<16x1xf32>
    %133 = vector.broadcast %132 : vector<16x1xf32> to vector<16x10xf32>
    %134 = arith.subf %128, %133 : vector<16x10xf32>
    %c0_80 = arith.constant 0 : index
    %c0_81 = arith.constant 0 : index
    %135 = vector.load %arg10[%c0_80, %c0_81] : memref<16x10xf32, #tpu.memory_space<vmem>>, vector<16x10xf32>
    tpu.vector_store %arg10[%c0_80, %c0_81], %134 {strides = array<i32>} : memref<16x10xf32, #tpu.memory_space<vmem>>, vector<16x10xf32>,
    return
  }
  func.func @transform_0(%arg0: i32) -> (i32, i32, i32) {
    %c0_i32 = arith.constant 0 : i32
    %c0_i32_0 = arith.constant 0 : i32
    %c0_i32_1 = arith.constant 0 : i32
    return %c0_i32, %arg0, %c0_i32_0 : i32, i32, i32
  }
  func.func @transform_1(%arg0: i32) -> (i32, i32, i32) {
    %c0_i32 = arith.constant 0 : i32
    %c0_i32_0 = arith.constant 0 : i32
    %c0_i32_1 = arith.constant 0 : i32
    %c0_i32_2 = arith.constant 0 : i32
    return %c0_i32, %c0_i32_0, %c0_i32_1 : i32, i32, i32
  }
  func.func @transform_2(%arg0: i32) -> (i32, i32) {
    %c0_i32 = arith.constant 0 : i32
    %c0_i32_0 = arith.constant 0 : i32
    %c0_i32_1 = arith.constant 0 : i32
    return %c0_i32, %c0_i32_0 : i32, i32
  }
  func.func @transform_3(%arg0: i32) -> (i32, i32, i32) {
    %c0_i32 = arith.constant 0 : i32
    %c0_i32_0 = arith.constant 0 : i32
    %c0_i32_1 = arith.constant 0 : i32
    %c0_i32_2 = arith.constant 0 : i32
    return %c0_i32, %c0_i32_0, %c0_i32_1 : i32, i32, i32
  }
  func.func @transform_4(%arg0: i32) -> (i32, i32) {
    %c0_i32 = arith.constant 0 : i32
    %c0_i32_0 = arith.constant 0 : i32
    %c0_i32_1 = arith.constant 0 : i32
    return %c0_i32, %c0_i32_0 : i32, i32
  }
  func.func @transform_5(%arg0: i32) -> (i32, i32, i32) {
    %c0_i32 = arith.constant 0 : i32
    %c0_i32_0 = arith.constant 0 : i32
    %c0_i32_1 = arith.constant 0 : i32
    %c0_i32_2 = arith.constant 0 : i32
    return %c0_i32, %c0_i32_0, %c0_i32_1 : i32, i32, i32
  }
  func.func @transform_6(%arg0: i32) -> (i32, i32) {
    %c0_i32 = arith.constant 0 : i32
    %c0_i32_0 = arith.constant 0 : i32
    %c0_i32_1 = arith.constant 0 : i32
    return %c0_i32, %c0_i32_0 : i32, i32
  }
  func.func @transform_7(%arg0: i32) -> (i32, i32) {
    %c0_i32 = arith.constant 0 : i32
    %c0_i32_0 = arith.constant 0 : i32
    %c0_i32_1 = arith.constant 0 : i32
    return %c0_i32, %c0_i32_0 : i32, i32
  }
  func.func @transform_8(%arg0: i32) -> (i32, i32) {
    %c0_i32 = arith.constant 0 : i32
    %c0_i32_0 = arith.constant 0 : i32
    %c0_i32_1 = arith.constant 0 : i32
    return %c0_i32, %c0_i32_0 : i32, i32
  }
  func.func @transform_9(%arg0: i32) -> (i32, i32) {
    %c0_i32 = arith.constant 0 : i32
    %c0_i32_0 = arith.constant 0 : i32
    return %arg0, %c0_i32 : i32, i32
  }
}

</mosaic_0001>

<bundles_post_ra>
// kernel: convnet_forward.1
= control target key start
LH: loop header
LB: loop body
LE: loop exit
PB: predicated region body
PF: predicated region fallthrough
CT: control target
= control target key end

     0   :  { %14 = vsyncpa [#allocation3], 0  ;;  %s12427_s0 = inlined_call_operand.vmem [shape: bf16[28,16,28], index: 0, kind: input, shape index: {}]   ;;  %s12428_s1 = inlined_call_operand.hbm [shape: bf16[5,28,256], index: 1, kind: input, shape index: {}]   ;;  %s12429_s2 = inlined_call_operand.hbm [shape: f32[1,128], index: 2, kind: input, shape index: {}]   ;;  %s12430_s3 = inlined_call_operand.hbm [shape: bf16[3,128,256], index: 3, kind: input, shape index: {}]   ;;  %s12431_s4 = inlined_call_operand.hbm [shape: f32[1,256], index: 4, kind: input, shape index: {}]   ;;  %s12432_s5 = inlined_call_operand.hbm [shape: bf16[10,256,512], index: 5, kind: input, shape index: {}]   ;;  %s12433_s6 = inlined_call_operand.hbm [shape: f32[1,512], index: 6, kind: input, shape index: {}]   ;;  %s12434_s7 = inlined_call_operand.vmem [shape: bf16[512,10], index: 7, kind: input, shape index: {}]   ;;  %s12435_s8 = inlined_call_operand.hbm [shape: f32[1,10], index: 8, kind: input, shape index: {}]   ;;  %s12436_s9 = inlined_call_operand.vmem [shape: f32[16,10], index: 9, kind: output, shape index: {}]  }
   0x1   :  { %15 = vsyncpa [#allocation5], 0 }
   0x2   :  { %16 = vsyncpa [#allocation8], 0 }
   0x3   :  { %17 = vsyncpa [#allocation11], 0  ;;  %s11193_s30 = smov [#allocation4]   ;;  %s11194_s11 = smov [#allocation7]  }
   0x4   :  { %s38_s10 = sshll.u32 %s11193_s30, 4  ;;  %s60_s12 = sshll.u32 %s11194_s11, 4  ;;  %s39_s10 = int_to_ptr.vmem [resolvable:$true] %s38_s10  ;;  %s61_s12 = int_to_ptr.vmem [resolvable:$true] %s60_s12 }
   0x5   :  { %s11031_s15 = scalar_lea.hbm %s12429_s2, 16 }
   0x6   :  { %p11032_p0 = scmp.ne.s32.totalorder %s12429_s2, %s11031_s15  ;;  %p11035_p1 = scmp.lt.u32.totalorder %s11031_s15, %s12429_s2 }
   0x8   :  { %p11037_p2 = pnand %p11035_p1, %p11032_p0 }
   0xa   :  { %11040 = shalt.err (!%p11037_p2)
}
   0xb   :  { %s11041_s20 = scalar_lea.vmem %s39_s10, 16  ;;  %s11045_s21 = scalar_lea.vmem %s39_s10, 32 }
   0xc   :  { %p11042_p3 = scmp.ne.s32.totalorder %s39_s10, %s11041_s20  ;;  %p11046_p4 = scmp.lt.s32.totalorder %s39_s10, %s39_s10 }
   0xd   :  { %p11047_p5 = scmp.lt.s32.totalorder %s11045_s21, %s11041_s20 }
   0xf   :  { %p11048_p6 = por %p11047_p5, %p11046_p4 }
  0x11   :  { %p11049_p7 = pnand %p11048_p6, %p11042_p3 }
  0x13   :  { %11052 = shalt.err (!%p11049_p7)
}
  0x14   :  { %41 = dma.hbm_to_vmem [thread:$0]  %s12429_s2, 16, %s39_s10, [#allocation5]  }
  0x15   :  { %s11053_s26 = scalar_lea.hbm %s12431_s4, 32 }
  0x16   :  { %p11054_p8 = scmp.ne.s32.totalorder %s12431_s4, %s11053_s26  ;;  %p11057_p9 = scmp.lt.u32.totalorder %s11053_s26, %s12431_s4 }
  0x18   :  { %p11059_p10 = pnand %p11057_p9, %p11054_p8 }
  0x1a   :  { %11062 = shalt.err (!%p11059_p10)
}
  0x1b   :  { %s11063_s11 = scalar_lea.vmem %s61_s12, 32  ;;  %p11068_p12 = scmp.lt.s32.totalorder %s61_s12, %s61_s12 }
  0x1c   :  { %p11064_p11 = scmp.ne.s32.totalorder %s61_s12, %s11063_s11  ;;  %p11069_p13 = scmp.lt.s32.totalorder %s11063_s11, %s11063_s11 }
  0x1e   :  { %p11070_p0 = por %p11069_p13, %p11068_p12 }
  0x20   :  { %p11071_p1 = pnand %p11070_p0, %p11064_p11 }
  0x22   :  { %11074 = shalt.err (!%p11071_p1)
}
  0x23   :  { %63 = dma.hbm_to_vmem [thread:$0]  %s12431_s4, 32, %s61_s12, [#allocation8]  }
  0x24   :  { %s11195_s13 = smov [#allocation10]   ;;  %s11196_s15 = smov [#allocation2]  }
  0x25   :  { %s82_s14 = sshll.u32 %s11195_s13, 4  ;;  %s25_s16 = sshll.u32 %s11196_s15, 4  ;;  %s83_s14 = int_to_ptr.vmem [resolvable:$true] %s82_s14  ;;  %s11279_s16 = int_to_ptr.vmem [resolvable:$true] %s25_s16 }
  0x26   :  { %s11075_s19 = scalar_lea.hbm %s12433_s6, 64 }
  0x27   :  { %p11076_p2 = scmp.ne.s32.totalorder %s12433_s6, %s11075_s19  ;;  %p11079_p3 = scmp.lt.u32.totalorder %s11075_s19, %s12433_s6 }
  0x29   :  { %p11081_p4 = pnand %p11079_p3, %p11076_p2 }
  0x2b   :  { %11084 = shalt.err (!%p11081_p4)
}
  0x2c   :  { %s11085_s4 = scalar_lea.vmem %s83_s14, 64  ;;  %p11090_p6 = scmp.lt.s32.totalorder %s83_s14, %s83_s14 }
  0x2d   :  { %p11086_p5 = scmp.ne.s32.totalorder %s83_s14, %s11085_s4  ;;  %p11091_p7 = scmp.lt.s32.totalorder %s11085_s4, %s11085_s4 }
  0x2f   :  { %p11092_p8 = por %p11091_p7, %p11090_p6 }
  0x31   :  { %p11093_p9 = pnand %p11092_p8, %p11086_p5 }
  0x33   :  { %11096 = shalt.err (!%p11093_p9)
}
  0x34   :  { %85 = dma.hbm_to_vmem [thread:$0]  %s12433_s6, 64, %s83_s14, [#allocation11]  }
  0x35   :  { %s11097_s27 = scalar_lea.hbm %s12428_s1, 2560 }
  0x36   :  { %p11098_p10 = scmp.ne.s32.totalorder %s12428_s1, %s11097_s27  ;;  %p11101_p11 = scmp.lt.u32.totalorder %s11097_s27, %s12428_s1 }
  0x38   :  { %p11103_p12 = pnand %p11101_p11, %p11098_p10 }
  0x3a   :  { %11106 = shalt.err (!%p11103_p12)
}
  0x3b   :  { %s11107_s2 = scalar_lea.vmem %s11279_s16, 2560  ;;  %p11112_p0 = scmp.lt.s32.totalorder %s11279_s16, %s11279_s16 }
  0x3c   :  { %p11108_p13 = scmp.ne.s32.totalorder %s11279_s16, %s11107_s2  ;;  %p11113_p1 = scmp.lt.s32.totalorder %s11107_s2, %s11107_s2 }
  0x3e   :  { %p11114_p2 = por %p11113_p1, %p11112_p0 }
  0x40   :  { %p11115_p3 = pnand %p11114_p2, %p11108_p13 }
  0x42   :  { %11118 = shalt.err (!%p11115_p3)
}
  0x43   :  { %s11197_s6 = smov 128   ;;  %s11198_s10 = smov 8  }
  0x44   :  { %31 = dma.hbm_to_vmem [thread:$0]  %s12428_s1, 2560, %s11279_s16, [#allocation3], %s11197_s6, %s11197_s6, %s11198_s10  }
  0x45   :  { %s11199_s15 = smov [#allocation6]   ;;  %s11200_s18 = smov [#allocation9]  }
  0x46   :  { %s47_s17 = sshll.u32 %s11199_s15, 4  ;;  %s69_s19 = sshll.u32 %s11200_s18, 4  ;;  %s48_s17 = int_to_ptr.vmem [resolvable:$true] %s47_s17  ;;  %s11310_s19 = int_to_ptr.vmem [resolvable:$true] %s69_s19 }
  0x47   :  { %s11119_s22 = scalar_lea.hbm %s12430_s3, 6144 }
  0x48   :  { %p11120_p4 = scmp.ne.s32.totalorder %s12430_s3, %s11119_s22  ;;  %p11123_p5 = scmp.lt.u32.totalorder %s11119_s22, %s12430_s3 }
  0x4a   :  { %p11125_p6 = pnand %p11123_p5, %p11120_p4 }
  0x4c   :  { %11128 = shalt.err (!%p11125_p6)
}
  0x4d   :  { %s11129_s1 = scalar_lea.vmem %s48_s17, 6144  ;;  %p11134_p8 = scmp.lt.s32.totalorder %s48_s17, %s48_s17 }
  0x4e   :  { %p11130_p7 = scmp.ne.s32.totalorder %s48_s17, %s11129_s1  ;;  %p11135_p9 = scmp.lt.s32.totalorder %s11129_s1, %s11129_s1 }
  0x50   :  { %p11136_p10 = por %p11135_p9, %p11134_p8 }
  0x52   :  { %p11137_p11 = pnand %p11136_p10, %p11130_p7 }
  0x54   :  { %11140 = shalt.err (!%p11137_p11)
}
  0x55   :  { %53 = dma.hbm_to_vmem [thread:$0]  %s12430_s3, 6144, %s48_s17, [#allocation5], %s11197_s6, %s11197_s6, %s11198_s10  }
  0x56   :  { %s11141_s28 = scalar_lea.hbm %s12432_s5, 81920 }
  0x57   :  { %p11142_p12 = scmp.ne.s32.totalorder %s12432_s5, %s11141_s28  ;;  %p11145_p13 = scmp.lt.u32.totalorder %s11141_s28, %s12432_s5 }
  0x59   :  { %p11147_p0 = pnand %p11145_p13, %p11142_p12 }
  0x5b   :  { %11150 = shalt.err (!%p11147_p0)
}
  0x5c   :  { %s11151_s13 = scalar_lea.vmem %s11310_s19, 81920  ;;  %p11156_p2 = scmp.lt.s32.totalorder %s11310_s19, %s11310_s19 }
  0x5d   :  { %p11152_p1 = scmp.ne.s32.totalorder %s11310_s19, %s11151_s13  ;;  %p11157_p3 = scmp.lt.s32.totalorder %s11151_s13, %s11151_s13 }
  0x5f   :  { %p11158_p4 = por %p11157_p3, %p11156_p2 }
  0x61   :  { %p11159_p5 = pnand %p11158_p4, %p11152_p1 }
  0x63   :  { %11162 = shalt.err (!%p11159_p5)
}
  0x64   :  { %s11201_s3 = smov 256   ;;  %s11202_s6 = smov 16  }
  0x65   :  { %75 = dma.hbm_to_vmem [thread:$0]  %s12432_s5, 81920, %s11310_s19, [#allocation8], %s11201_s3, %s11201_s3, %s11202_s6  }
  0x66   :  { %s11203_s15 = smov [#allocation12]   ;;  %s11163_s21 = scalar_lea.hbm %s12435_s8, 16 }
  0x67   :  { %s94_s17 = sshll.u32 %s11203_s15, 4  ;;  %p11164_p6 = scmp.ne.s32.totalorder %s12435_s8, %s11163_s21  ;;  %s95_s17 = int_to_ptr.vmem [resolvable:$true] %s94_s17 }
  0x68   :  { %p11167_p7 = scmp.lt.u32.totalorder %s11163_s21, %s12435_s8 }
  0x6a   :  { %p11169_p8 = pnand %p11167_p7, %p11164_p6 }
  0x6c   :  { %11172 = shalt.err (!%p11169_p8)
}
  0x6d   :  { %s11173_s24 = scalar_lea.vmem %s95_s17, 16  ;;  %s11177_s5 = scalar_lea.vmem %s95_s17, 32 }
  0x6e   :  { %p11174_p9 = scmp.ne.s32.totalorder %s95_s17, %s11173_s24  ;;  %p11178_p10 = scmp.lt.s32.totalorder %s95_s17, %s95_s17 }
  0x6f   :  { %p11179_p11 = scmp.lt.s32.totalorder %s11177_s5, %s11173_s24 }
  0x71   :  { %p11180_p12 = por %p11179_p11, %p11178_p10 }
  0x73   :  { %p11181_p13 = pnand %p11180_p12, %p11174_p9 }
  0x75   :  { %11184 = shalt.err (!%p11181_p13)
}
  0x76   :  { %97 = dma.hbm_to_vmem [thread:$0]  %s12435_s8, 16, %s95_s17, [#allocation11]  }
  0x77   :  { %11185 = dma.done.wait [#allocation3], 2560  }
  0x78   :  { %11186 = vsyncadd [#allocation3], 4294964736 }
  0x79   :  { %11187 = dma.done.wait [#allocation5], 6160  }
  0x7a   :  { %11188 = vsyncadd [#allocation5], 4294961136 }
  0x7b   :  { %11189 = dma.done.wait [#allocation8], 81952  }
  0x7c   :  { %11190 = vsyncadd [#allocation8], 4294885344 }
  0x7d   :  { %11191 = dma.done.wait [#allocation11], 80  }
  0x7e   :  { %11192 = vsyncadd [#allocation11], 4294967216  ;;  %v11204_v0 = vmov 0   ;;  %v9877_v1 = vld [vmem:[#allocation2 + $0x24] ss:$8 sps:$4 sm:$0xff]   ;;  %vm396_vm0 = vcmask 1045504  }
  0x7f   :  { %435 = vmatprep.mubr.bf16.mxu0 %v11204_v0  ;;  %2946 = vmatprep.mubr.bf16.mxu1 %v11204_v0  ;;  %v9879_v2 = vld [vmem:[#allocation2 + $0x20] ss:$8 sps:$4 sm:$0xff]   ;;  %v9880_v3 = vld [vmem:[#allocation2 + $0x34] ss:$8 sps:$4 sm:$0x3f]   ;;  %vm323_vm1 = vcmask 228352  }
  0x80   :  { %403 = vmatprep.subr.bf16.mxu0 %v9877_v1  ;;  %v9882_v4 = vld [vmem:[#allocation2 + $0x30] ss:$8 sps:$4 sm:$0x3f]   ;;  %v9886_v6 = vld [vmem:[#allocation2 + $0x4] ss:$8 sps:$4 sm:$0xff]   ;;  %vm8339_vm2 = vcmask 80896  }
  0x81   :  { %404 = vmatpush1.bf16.msra.mxu0 %v9879_v2  ;;  %v398_v5 = vsel %vm396_vm0, %v9882_v4, 0  ;;  %v9883_v7 = vld [vmem:[%s12427_s0 + $0x8] sm:$0xff]   ;;  %v9887_v9 = vld [vmem:[%s12427_s0 + $0x10] sm:$0xff]   ;;  %v9888_v13 = vld [vmem:[%s12427_s0 + $0x18] sm:$0xff]  }
  0x82   :  { %8402 = vmatprep.subr.msk.bf16.mxu0 %vm396_vm0, %v9880_v3  ;;  %v9884_v8 = vld [vmem:[#allocation2] ss:$8 sps:$4 sm:$0xff]   ;;  %v9899_v10 = vld [vmem:[#allocation2 + $0x14] ss:$8 sps:$4 sm:$0x3f]  }
  0x83   :  { %v9901_v11 = vld [vmem:[#allocation2 + $0x10] ss:$8 sps:$4 sm:$0x3f]   ;;  %v9889_v14 = vld [vmem:[%s12427_s0 + $0x20] sm:$0xff]   ;;  %v9890_v15 = vld [vmem:[%s12427_s0 + $0x28] sm:$0xff]  }
  0x84   :  { %v703_v12 = vsel %vm396_vm0, %v9901_v11, 0  ;;  %v9891_v16 = vld [vmem:[%s12427_s0 + $0x30] sm:$0xff]   ;;  %v9892_v17 = vld [vmem:[%s12427_s0 + $0x38] sm:$0xff]   ;;  %v9893_v18 = vld [vmem:[%s12427_s0 + $0x40] sm:$0xff]  }
  0x85   :  { %406 = vmatpush1.bf16.msra.mxu0 %v398_v5  ;;  %v9894_v19 = vld [vmem:[%s12427_s0 + $0x48] sm:$0xff]   ;;  %v9895_v21 = vld [vmem:[%s12427_s0 + $0x50] sm:$0xff]   ;;  %v9896_v22 = vld [vmem:[%s12427_s0 + $0x58] sm:$0xff]  }
  0x86   :  { %708 = vmatprep.subr.bf16.mxu0 %v9886_v6  ;;  %v9916_v20 = vld [vmem:[#allocation2 + $0x44] ss:$8 sps:$4 sm:$0xff]   ;;  %v9902_v25 = vld [vmem:[%s12427_s0 + $0x70] sm:$0xff]   ;;  %v9903_v26 = vld [vmem:[%s12427_s0 + $0x78] sm:$0xff]  }
  0x87   :  { %v9897_v23 = vld [vmem:[%s12427_s0 + $0x60] sm:$0xff]   ;;  %v9898_v24 = vld [vmem:[%s12427_s0 + $0x68] sm:$0xff]   ;;  %v9906_v29 = vld [vmem:[%s12427_s0 + $0x90] sm:$0xff]  }
  0x88   :  { %8403 = vmatmul.mubr.msk.bf16.vlgmr.msra.gmra.mrb[0].mxu0 %vm323_vm1, %v9883_v7  ;;  %v9904_v27 = vld [vmem:[%s12427_s0 + $0x80] sm:$0xff]   ;;  %v9905_v28 = vld [vmem:[%s12427_s0 + $0x88] sm:$0xff]   ;;  %v11452_v30 = vld [vmem:[%s12427_s0 + $0x98] sm:$0xff]  }
  0x89   :  { %709 = vmatpush1.bf16.msra.mxu0 %v9884_v8  ;;  %445 = vmatprep.mubr.bf16.mxu0 %v11204_v0  ;;  %v11460_v31 = vld [vmem:[%s12427_s0 + $0xa0] sm:$0xff]   ;;  %v11468_v32 = vld [vmem:[%s12427_s0 + $0xa8] sm:$0xff]   ;;  %v11476_v33 = vld [vmem:[%s12427_s0 + $0xb0] sm:$0xff]  }
  0x8a   :  { %8432 = vmatprep.subr.msk.bf16.mxu0 %vm396_vm0, %v9899_v10  ;;  %v11484_v34 = vld [vmem:[%s12427_s0 + $0xb8] sm:$0xff]   ;;  %v11492_v35 = vld [vmem:[%s12427_s0 + $0xc0] sm:$0xff]   ;;  %v11007_v41 = vld [vmem:[%s12427_s0 + $0x8] sm:$0xff]  }
  0x8b   :  { %v9913_v36 = vld [vmem:[%s12427_s0] sm:$0xff]   ;;  %v9917_v38 = vld [vmem:[#allocation2 + $0x54] ss:$8 sps:$4 sm:$0x3f]   ;;  %v11536_v45 = vld [vmem:[%s12427_s0 + $0x28] sm:$0xff]  }
  0x8c   :  { %v9914_v37 = vld [vmem:[#allocation2 + $0x40] ss:$8 sps:$4 sm:$0xff]   ;;  %v9919_v39 = vld [vmem:[#allocation2 + $0x50] ss:$8 sps:$4 sm:$0x3f]  }
  0x8d   :  { %711 = vmatpush1.bf16.msra.mxu0 %v703_v12  ;;  %v1013_v40 = vsel %vm396_vm0, %v9919_v39, 0  ;;  %v11512_v42 = vld [vmem:[%s12427_s0 + $0x10] sm:$0xff]   ;;  %v11520_v43 = vld [vmem:[%s12427_s0 + $0x18] sm:$0xff]   ;;  %v11528_v44 = vld [vmem:[%s12427_s0 + $0x20] sm:$0xff]  }
  0x8e   :  { %1018 = vmatprep.subr.bf16.mxu0 %v9916_v20  ;;  %v11544_v46 = vld [vmem:[%s12427_s0 + $0x30] sm:$0xff]   ;;  %v11552_v47 = vld [vmem:[%s12427_s0 + $0x38] sm:$0xff]   ;;  %v11560_v48 = vld [vmem:[%s12427_s0 + $0x40] sm:$0xff]  }
  0x8f   :  { %v9922_v49 = vld [vmem:[#allocation2 + $0x64] ss:$8 sps:$4 sm:$0xff]   ;;  %v11576_v51 = vld [vmem:[%s12427_s0 + $0x50] sm:$0xff]   ;;  %v11584_v52 = vld [vmem:[%s12427_s0 + $0x58] sm:$0xff]  }
  0x90   :  { %8404 = vmatmul.mubr.msk.bf16.gmra.mrb[4].mxu0 %vm323_vm1, %v9887_v9  ;;  %v11568_v50 = vld [vmem:[%s12427_s0 + $0x48] sm:$0xff]   ;;  %v11592_v53 = vld [vmem:[%s12427_s0 + $0x60] sm:$0xff]   ;;  %v11608_v55 = vld [vmem:[%s12427_s0 + $0x70] sm:$0xff]  }
  0x91   :  { %455 = vmatprep.mubr.bf16.mxu0 %v11204_v0  ;;  %v11600_v54 = vld [vmem:[%s12427_s0 + $0x68] sm:$0xff]   ;;  %v11616_v56 = vld [vmem:[%s12427_s0 + $0x78] sm:$0xff]   ;;  %v11624_v57 = vld [vmem:[%s12427_s0 + $0x80] sm:$0xff]  }
  0x92   :  { %v11632_v58 = vld [vmem:[%s12427_s0 + $0x88] sm:$0xff]   ;;  %v11640_v59 = vld [vmem:[%s12427_s0 + $0x90] sm:$0xff]   ;;  %v11716_v2 = vld [vmem:[%s12427_s0 + $0x98] sm:$0xff]  }
  0x93   :  { %v9920_v60 = vld [vmem:[#allocation2 + $0x60] ss:$8 sps:$4 sm:$0xff]   ;;  %v9923_v61 = vld [vmem:[#allocation2 + $0x74] ss:$8 sps:$4 sm:$0x3f]  }
  0x94   :  { %v9925_v62 = vld [vmem:[#allocation2 + $0x70] ss:$8 sps:$4 sm:$0x3f]   ;;  %v9929_v1 = vld [vmem:[#allocation2 + $0x84] ss:$8 sps:$4 sm:$0xff]  }
  0x95   :  { %v1419_v63 = vsel %vm396_vm0, %v9925_v62, 0  ;;  %v11724_v3 = vld [vmem:[%s12427_s0 + $0xa0] sm:$0xff]   ;;  %v11744_v4 = vld [vmem:[%s12427_s0 + $0xc8] sm:$0xff]   ;;  %v9930_v6 = vld [vmem:[#allocation2 + $0x94] ss:$8 sps:$4 sm:$0x3f]  }
  0x96   :  { %v9927_v5 = vld [vmem:[#allocation2 + $0x80] ss:$8 sps:$4 sm:$0xff]   ;;  %v9932_v7 = vld [vmem:[#allocation2 + $0x90] ss:$8 sps:$4 sm:$0x3f]  }
  0x97   :  { %v1825_v8 = vsel %vm396_vm0, %v9932_v7, 0  ;;  %v11808_v9 = vld [vmem:[%s12427_s0 + $0xa8] sm:$0xff]   ;;  %v11816_v10 = vld [vmem:[%s12427_s0 + $0xb0] sm:$0xff]  }
  0x98   :  { %8405 = vmatmul.mubr.msk.bf16.gmra.mrb[8].mxu0 %vm323_vm1, %v9888_v13  ;;  %v11833_v11 = vld [vmem:[%s12427_s0 + $0xd0] sm:$0xff]   ;;  %v9934_v12 = vld [vmem:[#allocation6 + $0x80] ss:$8 sps:$4 sm:$0xff]  }
  0x99   :  { %465 = vmatprep.mubr.bf16.mxu0 %v11204_v0  ;;  %v9936_v13 = vld [vmem:[#allocation6 + $0x84] ss:$8 sps:$4 sm:$0xff]   ;;  %v9947_v20 = vld [vmem:[#allocation6 + $0xc0] ss:$8 sps:$4 sm:$0xff]   ;;  %v11930_v39 = vld [vmem:[#allocation6 + $0x154] ss:$8 sps:$4 sm:$0xff]  }
  0xa0   :  { %8406 = vmatmul.mubr.msk.bf16.gmra.mrb[12].mxu0 %vm323_vm1, %v9889_v14  ;;  %v9937_v14 = vld [vmem:[#allocation6 + $0x90] ss:$8 sps:$4 sm:$0xff]  }
  0xa1   :  { %475 = vmatprep.mubr.bf16.mxu0 %v11204_v0 }
  0xa8   :  { %8407 = vmatmul.mubr.msk.bf16.gmra.mrb[16].mxu0 %vm323_vm1, %v9890_v15  ;;  %v9939_v15 = vld [vmem:[#allocation6 + $0x94] ss:$8 sps:$4 sm:$0xff]  }
  0xa9   :  { %485 = vmatprep.mubr.bf16.mxu0 %v11204_v0 }
  0xb0   :  { %8408 = vmatmul.mubr.msk.bf16.gmra.mrb[20].mxu0 %vm323_vm1, %v9891_v16  ;;  %v9940_v16 = vld [vmem:[#allocation6 + $0xa0] ss:$8 sps:$4 sm:$0xff]  }
  0xb1   :  { %495 = vmatprep.mubr.bf16.mxu0 %v11204_v0 }
  0xb8   :  { %8409 = vmatmul.mubr.msk.bf16.gmra.mrb[24].mxu0 %vm323_vm1, %v9892_v17  ;;  %v9942_v17 = vld [vmem:[#allocation6 + $0xa4] ss:$8 sps:$4 sm:$0xff]  }
  0xb9   :  { %505 = vmatprep.mubr.bf16.mxu0 %v11204_v0 }
  0xc0   :  { %8410 = vmatmul.mubr.msk.bf16.gmra.mrb[28].mxu0 %vm323_vm1, %v9893_v18  ;;  %v9944_v18 = vld [vmem:[#allocation6 + $0xb0] ss:$8 sps:$4 sm:$0xff]  }
  0xc1   :  { %515 = vmatprep.mubr.bf16.mxu0 %v11204_v0 }
  0xc8   :  { %8411 = vmatmul.mubr.msk.bf16.gmra.mrb[32].mxu0 %vm323_vm1, %v9894_v19  ;;  %v9946_v19 = vld [vmem:[#allocation6 + $0xb4] ss:$8 sps:$4 sm:$0xff]  }
  0xc9   :  { %525 = vmatprep.mubr.bf16.mxu0 %v11204_v0 }
  0xd0   :  { %8412 = vmatmul.mubr.msk.bf16.gmra.mrb[36].mxu0 %vm323_vm1, %v9895_v21  ;;  %v9949_v21 = vld [vmem:[#allocation6 + $0xc4] ss:$8 sps:$4 sm:$0xff]  }
  0xd1   :  { %535 = vmatprep.mubr.bf16.mxu0 %v11204_v0 }
  0xd8   :  { %8413 = vmatmul.mubr.msk.bf16.gmra.mrb[40].mxu0 %vm323_vm1, %v9896_v22  ;;  %v9952_v22 = vld [vmem:[#allocation6 + $0xd4] ss:$8 sps:$4 sm:$0xff]  }
  0xd9   :  { %545 = vmatprep.mubr.bf16.mxu0 %v11204_v0 }
  0xe0   :  { %8414 = vmatmul.mubr.msk.bf16.gmra.mrb[44].mxu0 %vm323_vm1, %v9897_v23  ;;  %v9950_v23 = vld [vmem:[#allocation6 + $0xd0] ss:$8 sps:$4 sm:$0xff]  }
  0xe1   :  { %555 = vmatprep.mubr.bf16.mxu0 %v11204_v0 }
  0xe8   :  { %8415 = vmatmul.mubr.msk.bf16.gmra.mrb[48].mxu0 %vm323_vm1, %v9898_v24  ;;  %v9955_v24 = vld [vmem:[#allocation6 + $0xe4] ss:$8 sps:$4 sm:$0xff]  }
  0xe9   :  { %565 = vmatprep.mubr.bf16.mxu0 %v11204_v0 }
  0xf0   :  { %8416 = vmatmul.mubr.msk.bf16.gmra.mrb[52].mxu0 %vm323_vm1, %v9902_v25  ;;  %v9953_v25 = vld [vmem:[#allocation6 + $0xe0] ss:$8 sps:$4 sm:$0xff]  }
  0xf1   :  { %575 = vmatprep.mubr.bf16.mxu0 %v11204_v0 }
  0xf8   :  { %8417 = vmatmul.mubr.msk.bf16.gmra.mrb[56].mxu0 %vm323_vm1, %v9903_v26  ;;  %v9958_v26 = vld [vmem:[#allocation6 + $0xf4] ss:$8 sps:$4 sm:$0xff]  }
  0xf9   :  { %585 = vmatprep.mubr.bf16.mxu0 %v11204_v0 }
 0x100   :  { %8418 = vmatmul.mubr.msk.bf16.gmra.mrb[60].mxu0 %vm323_vm1, %v9904_v27  ;;  %v9956_v27 = vld [vmem:[#allocation6 + $0xf0] ss:$8 sps:$4 sm:$0xff]  }
 0x101   :  { %595 = vmatprep.mubr.bf16.mxu0 %v11204_v0 }
 0x108   :  { %8419 = vmatmul.mubr.msk.bf16.gmra.mrb[64].mxu0 %vm323_vm1, %v9905_v28  ;;  %v11889_v28 = vld [vmem:[#allocation6 + $0x104] ss:$8 sps:$4 sm:$0xff]  }
 0x109   :  { %605 = vmatprep.mubr.bf16.mxu0 %v11204_v0  ;;  %9313 = vmatprep.subr.bf16.mxu1 %v11889_v28 }
 0x110   :  { %8420 = vmatmul.mubr.msk.bf16.gmra.mrb[68].mxu0 %vm323_vm1, %v9906_v29  ;;  %v11893_v29 = vld [vmem:[#allocation6 + $0x100] ss:$8 sps:$4 sm:$0xff]  }
 0x111   :  { %615 = vmatprep.mubr.bf16.mxu0 %v11204_v0  ;;  %9321 = vmatpush1.bf16.msra.mxu1 %v11893_v29 }
 0x118   :  { %8421 = vmatmul.mubr.msk.bf16.gmra.mrb[72].mxu0 %vm323_vm1, %v11452_v30 }
 0x119   :  { %625 = vmatprep.mubr.bf16.mxu0 %v11204_v0 }
 0x120   :  { %8422 = vmatmul.mubr.msk.bf16.gmra.mrb[76].mxu0 %vm323_vm1, %v11460_v31 }
 0x121   :  { %635 = vmatprep.mubr.bf16.mxu0 %v11204_v0 }
 0x128   :  { %8423 = vmatmul.mubr.msk.bf16.gmra.mrb[80].mxu0 %vm323_vm1, %v11468_v32 }
 0x129   :  { %645 = vmatprep.mubr.bf16.mxu0 %v11204_v0 }
 0x130   :  { %8424 = vmatmul.mubr.msk.bf16.gmra.mrb[84].mxu0 %vm323_vm1, %v11476_v33 }
 0x131   :  { %655 = vmatprep.mubr.bf16.mxu0 %v11204_v0 }
 0x138   :  { %8425 = vmatmul.mubr.msk.bf16.gmra.mrb[88].mxu0 %vm323_vm1, %v11484_v34 }
 0x139   :  { %665 = vmatprep.mubr.bf16.mxu0 %v11204_v0 }
 0x140   :  { %8426 = vmatmul.mubr.msk.bf16.gmra.mrb[92].mxu0 %vm323_vm1, %v11492_v35 }
 0x141   :  { %740 = vmatprep.mubr.bf16.mxu0 %v11204_v0 }
 0x148   :  { %8433 = vmatmul.mubr.msk.bf16.vlgmr.msra.gmra.mrb[0].mxu0 %vm323_vm1, %v9913_v36  ;;  %v11919_v36 = vld [vmem:[#allocation6 + $0x144] ss:$8 sps:$4 sm:$0xff]  }
 0x149   :  { %1019 = vmatpush1.bf16.msra.mxu0 %v9914_v37  ;;  %750 = vmatprep.mubr.bf16.mxu0 %v11204_v0  ;;  %v11029_v37 = vld [vmem:[%s12427_s0 + $0xb8] sm:$0xff]  }
 0x14a   :  { %8462 = vmatprep.subr.msk.bf16.mxu0 %vm396_vm0, %v9917_v38  ;;  %v11925_v38 = vld [vmem:[#allocation6 + $0x140] ss:$8 sps:$4 sm:$0xff]  }
 0x14d   :  { %1021 = vmatpush1.bf16.msra.mxu0 %v1013_v40  ;;  %v11932_v40 = vld [vmem:[#allocation6 + $0x150] ss:$8 sps:$4 sm:$0xff]  }
 0x14e   :  { %1424 = vmatprep.subr.bf16.mxu0 %v9922_v49 }
 0x150   :  { %8434 = vmatmul.mubr.msk.bf16.gmra.mrb[4].mxu0 %vm323_vm1, %v11007_v41  ;;  %v11936_v41 = vld [vmem:[#allocation6 + $0x164] ss:$8 sps:$4 sm:$0xff]  }
 0x151   :  { %760 = vmatprep.mubr.bf16.mxu0 %v11204_v0 }
 0x158   :  { %8435 = vmatmul.mubr.msk.bf16.gmra.mrb[8].mxu0 %vm323_vm1, %v11512_v42 }
 0x159   :  { %770 = vmatprep.mubr.bf16.mxu0 %v11204_v0 }
 0x160   :  { %8436 = vmatmul.mubr.msk.bf16.gmra.mrb[12].mxu0 %vm323_vm1, %v11520_v43 }
 0x161   :  { %780 = vmatprep.mubr.bf16.mxu0 %v11204_v0 }
 0x168   :  { %8437 = vmatmul.mubr.msk.bf16.gmra.mrb[16].mxu0 %vm323_vm1, %v11528_v44 }
 0x169   :  { %790 = vmatprep.mubr.bf16.mxu0 %v11204_v0 }
 0x170   :  { %8438 = vmatmul.mubr.msk.bf16.gmra.mrb[20].mxu0 %vm323_vm1, %v11536_v45 }
 0x171   :  { %800 = vmatprep.mubr.bf16.mxu0 %v11204_v0 }
 0x178   :  { %8439 = vmatmul.mubr.msk.bf16.gmra.mrb[24].mxu0 %vm323_vm1, %v11544_v46 }
 0x179   :  { %810 = vmatprep.mubr.bf16.mxu0 %v11204_v0 }
 0x180   :  { %8440 = vmatmul.mubr.msk.bf16.gmra.mrb[28].mxu0 %vm323_vm1, %v11552_v47 }
 0x181   :  { %820 = vmatprep.mubr.bf16.mxu0 %v11204_v0 }
 0x188   :  { %8441 = vmatmul.mubr.msk.bf16.gmra.mrb[32].mxu0 %vm323_vm1, %v11560_v48 }
 0x189   :  { %830 = vmatprep.mubr.bf16.mxu0 %v11204_v0 }
 0x190   :  { %8442 = vmatmul.mubr.msk.bf16.gmra.mrb[36].mxu0 %vm323_vm1, %v11568_v50 }
 0x191   :  { %840 = vmatprep.mubr.bf16.mxu0 %v11204_v0 }
 0x198   :  { %8443 = vmatmul.mubr.msk.bf16.gmra.mrb[40].mxu0 %vm323_vm1, %v11576_v51 }
 0x199   :  { %850 = vmatprep.mubr.bf16.mxu0 %v11204_v0 }
 0x1a0   :  { %8444 = vmatmul.mubr.msk.bf16.gmra.mrb[44].mxu0 %vm323_vm1, %v11584_v52 }
 0x1a1   :  { %860 = vmatprep.mubr.bf16.mxu0 %v11204_v0 }
 0x1a8   :  { %8445 = vmatmul.mubr.msk.bf16.gmra.mrb[48].mxu0 %vm323_vm1, %v11592_v53 }
 0x1a9   :  { %870 = vmatprep.mubr.bf16.mxu0 %v11204_v0 }
 0x1b0   :  { %8446 = vmatmul.mubr.msk.bf16.gmra.mrb[52].mxu0 %vm323_vm1, %v11600_v54 }
 0x1b1   :  { %880 = vmatprep.mubr.bf16.mxu0 %v11204_v0 }
 0x1b8   :  { %8447 = vmatmul.mubr.msk.bf16.gmra.mrb[56].mxu0 %vm323_vm1, %v11608_v55 }
 0x1b9   :  { %890 = vmatprep.mubr.bf16.mxu0 %v11204_v0 }
 0x1c0   :  { %8448 = vmatmul.mubr.msk.bf16.gmra.mrb[60].mxu0 %vm323_vm1, %v11616_v56 }
 0x1c1   :  { %900 = vmatprep.mubr.bf16.mxu0 %v11204_v0 }
 0x1c8   :  { %8449 = vmatmul.mubr.msk.bf16.gmra.mrb[64].mxu0 %vm323_vm1, %v11624_v57 }
 0x1c9   :  { %910 = vmatprep.mubr.bf16.mxu0 %v11204_v0 }
 0x1d0   :  { %8450 = vmatmul.mubr.msk.bf16.gmra.mrb[68].mxu0 %vm323_vm1, %v11632_v58 }
 0x1d1   :  { %920 = vmatprep.mubr.bf16.mxu0 %v11204_v0 }
 0x1d8   :  { %8451 = vmatmul.mubr.msk.bf16.gmra.mrb[72].mxu0 %vm323_vm1, %v11640_v59 }
 0x1d9   :  { %930 = vmatprep.mubr.bf16.mxu0 %v11204_v0 }
 0x1e0   :  { %8452 = vmatmul.mubr.msk.bf16.gmra.mrb[76].mxu0 %vm323_vm1, %v11452_v30  ;;  %v11898_v30 = vld [vmem:[#allocation6 + $0x114] ss:$8 sps:$4 sm:$0xff]  }
 0x1e1   :  { %940 = vmatprep.mubr.bf16.mxu0 %v11204_v0  ;;  %9314 = vmatprep.subr.bf16.mxu1 %v11898_v30 }
 0x1e8   :  { %8453 = vmatmul.mubr.msk.bf16.gmra.mrb[80].mxu0 %vm323_vm1, %v11460_v31  ;;  %v11900_v31 = vld [vmem:[#allocation6 + $0x110] ss:$8 sps:$4 sm:$0xff]  }
 0x1e9   :  { %950 = vmatprep.mubr.bf16.mxu0 %v11204_v0  ;;  %9322 = vmatpush1.bf16.msra.mxu1 %v11900_v31 }
 0x1f0   :  { %8454 = vmatmul.mubr.msk.bf16.gmra.mrb[84].mxu0 %vm323_vm1, %v11468_v32 }
 0x1f1   :  { %960 = vmatprep.mubr.bf16.mxu0 %v11204_v0 }
 0x1f8   :  { %8455 = vmatmul.mubr.msk.bf16.gmra.mrb[88].mxu0 %vm323_vm1, %v11476_v33 }
 0x1f9   :  { %970 = vmatprep.mubr.bf16.mxu0 %v11204_v0 }
 0x200   :  { %8456 = vmatmul.mubr.msk.bf16.gmra.mrb[92].mxu0 %vm323_vm1, %v11484_v34 }
 0x201   :  { %1050 = vmatprep.mubr.bf16.mxu0 %v11204_v0 }
 0x208   :  { %8463 = vmatmul.mubr.msk.bf16.vlgmr.msra.gmra.mrb[0].mxu0 %vm323_vm1, %v11512_v42  ;;  %v11030_v42 = vld [vmem:[%s12427_s0 + $0xc0] sm:$0xff]  }
 0x209   :  { %1425 = vmatpush1.bf16.msra.mxu0 %v9920_v60  ;;  %1060 = vmatprep.mubr.bf16.mxu0 %v11204_v0 }
 0x20a   :  { %8492 = vmatprep.subr.msk.bf16.mxu0 %vm396_vm0, %v9923_v61 }
 0x20d   :  { %1427 = vmatpush1.bf16.msra.mxu0 %v1419_v63 }
 0x20e   :  { %1830 = vmatprep.subr.bf16.mxu0 %v9929_v1 }
 0x210   :  { %8464 = vmatmul.mubr.msk.bf16.gmra.mrb[4].mxu0 %vm323_vm1, %v11520_v43 }
 0x211   :  { %1070 = vmatprep.mubr.bf16.mxu0 %v11204_v0 }
 0x218   :  { %8465 = vmatmul.mubr.msk.bf16.gmra.mrb[8].mxu0 %vm323_vm1, %v11528_v44 }
 0x219   :  { %1080 = vmatprep.mubr.bf16.mxu0 %v11204_v0 }
 0x220   :  { %8466 = vmatmul.mubr.msk.bf16.gmra.mrb[12].mxu0 %vm323_vm1, %v11536_v45 }
 0x221   :  { %1090 = vmatprep.mubr.bf16.mxu0 %v11204_v0 }
 0x228   :  { %8467 = vmatmul.mubr.msk.bf16.gmra.mrb[16].mxu0 %vm323_vm1, %v11544_v46 }
 0x229   :  { %1100 = vmatprep.mubr.bf16.mxu0 %v11204_v0 }
 0x230   :  { %8468 = vmatmul.mubr.msk.bf16.gmra.mrb[20].mxu0 %vm323_vm1, %v11552_v47 }
 0x231   :  { %1110 = vmatprep.mubr.bf16.mxu0 %v11204_v0 }
 0x238   :  { %8469 = vmatmul.mubr.msk.bf16.gmra.mrb[24].mxu0 %vm323_vm1, %v11560_v48 }
 0x239   :  { %1120 = vmatprep.mubr.bf16.mxu0 %v11204_v0 }
 0x240   :  { %8470 = vmatmul.mubr.msk.bf16.gmra.mrb[28].mxu0 %vm323_vm1, %v11568_v50 }
 0x241   :  { %1130 = vmatprep.mubr.bf16.mxu0 %v11204_v0 }
 0x248   :  { %8471 = vmatmul.mubr.msk.bf16.gmra.mrb[32].mxu0 %vm323_vm1, %v11576_v51 }
 0x249   :  { %1140 = vmatprep.mubr.bf16.mxu0 %v11204_v0 }
 0x250   :  { %8472 = vmatmul.mubr.msk.bf16.gmra.mrb[36].mxu0 %vm323_vm1, %v11584_v52 }
 0x251   :  { %1150 = vmatprep.mubr.bf16.mxu0 %v11204_v0 }
 0x258   :  { %8473 = vmatmul.mubr.msk.bf16.gmra.mrb[40].mxu0 %vm323_vm1, %v11592_v53 }
 0x259   :  { %1160 = vmatprep.mubr.bf16.mxu0 %v11204_v0 }
 0x260   :  { %8474 = vmatmul.mubr.msk.bf16.gmra.mrb[44].mxu0 %vm323_vm1, %v11600_v54 }
 0x261   :  { %1170 = vmatprep.mubr.bf16.mxu0 %v11204_v0 }
 0x268   :  { %8475 = vmatmul.mubr.msk.bf16.gmra.mrb[48].mxu0 %vm323_vm1, %v11608_v55 }
 0x269   :  { %1180 = vmatprep.mubr.bf16.mxu0 %v11204_v0 }
 0x270   :  { %8476 = vmatmul.mubr.msk.bf16.gmra.mrb[52].mxu0 %vm323_vm1, %v11616_v56 }
 0x271   :  { %1190 = vmatprep.mubr.bf16.mxu0 %v11204_v0 }
 0x278   :  { %8477 = vmatmul.mubr.msk.bf16.gmra.mrb[56].mxu0 %vm323_vm1, %v11624_v57 }
 0x279   :  { %1200 = vmatprep.mubr.bf16.mxu0 %v11204_v0 }
 0x280   :  { %8478 = vmatmul.mubr.msk.bf16.gmra.mrb[60].mxu0 %vm323_vm1, %v11632_v58 }
 0x281   :  { %1210 = vmatprep.mubr.bf16.mxu0 %v11204_v0 }
 0x288   :  { %8479 = vmatmul.mubr.msk.bf16.gmra.mrb[64].mxu0 %vm323_vm1, %v11640_v59 }
 0x289   :  { %1220 = vmatprep.mubr.bf16.mxu0 %v11204_v0 }
 0x290   :  { %8480 = vmatmul.mubr.msk.bf16.gmra.mrb[68].mxu0 %vm323_vm1, %v11716_v2 }
 0x291   :  { %1230 = vmatprep.mubr.bf16.mxu0 %v11204_v0 }
 0x298   :  { %8481 = vmatmul.mubr.msk.bf16.gmra.mrb[72].mxu0 %vm323_vm1, %v11724_v3 }
 0x299   :  { %1240 = vmatprep.mubr.bf16.mxu0 %v11204_v0 }
 0x2a0   :  { %8482 = vmatmul.mubr.msk.bf16.gmra.mrb[76].mxu0 %vm323_vm1, %v11468_v32  ;;  %v11904_v32 = vld [vmem:[#allocation6 + $0x124] ss:$8 sps:$4 sm:$0xff]  }
 0x2a1   :  { %1250 = vmatprep.mubr.bf16.mxu0 %v11204_v0  ;;  %9315 = vmatprep.subr.bf16.mxu1 %v11904_v32 }
 0x2a8   :  { %8483 = vmatmul.mubr.msk.bf16.gmra.mrb[80].mxu0 %vm323_vm1, %v11476_v33  ;;  %v11908_v33 = vld [vmem:[#allocation6 + $0x120] ss:$8 sps:$4 sm:$0xff]  }
 0x2a9   :  { %1260 = vmatprep.mubr.bf16.mxu0 %v11204_v0  ;;  %9323 = vmatpush1.bf16.msra.mxu1 %v11908_v33 }
 0x2b0   :  { %8484 = vmatmul.mubr.msk.bf16.gmra.mrb[84].mxu0 %vm323_vm1, %v11484_v34 }
 0x2b1   :  { %1270 = vmatprep.mubr.bf16.mxu0 %v11204_v0 }
 0x2b8   :  { %8485 = vmatmul.mubr.msk.bf16.gmra.mrb[88].mxu0 %vm323_vm1, %v11492_v35 }
 0x2b9   :  { %1280 = vmatprep.mubr.bf16.mxu0 %v11204_v0 }
 0x2c0   :  { %8486 = vmatmul.mubr.msk.bf16.gmra.mrb[92].mxu0 %vm323_vm1, %v11744_v4 }
 0x2c1   :  { %1456 = vmatprep.mubr.bf16.mxu0 %v11204_v0 }
 0x2c8   :  { %8493 = vmatmul.mubr.msk.bf16.vlgmr.msra.gmra.mrb[0].mxu0 %vm323_vm1, %v11520_v43  ;;  %v11942_v43 = vld [vmem:[#allocation6 + $0x160] ss:$8 sps:$4 sm:$0xff]  }
 0x2c9   :  { %1831 = vmatpush1.bf16.msra.mxu0 %v9927_v5  ;;  %1466 = vmatprep.mubr.bf16.mxu0 %v11204_v0 }
 0x2ca   :  { %8522 = vmatprep.subr.msk.bf16.mxu0 %vm396_vm0, %v9930_v6 }
 0x2cd   :  { %1833 = vmatpush1.bf16.msra.mxu0 %v1825_v8 }
 0x2ce   :  { %2451 = vmatprep.subr.bf16.mxu0 %v9936_v13 }
 0x2d0   :  { %8494 = vmatmul.mubr.msk.bf16.gmra.mrb[4].mxu0 %vm323_vm1, %v11528_v44 }
 0x2d1   :  { %1476 = vmatprep.mubr.bf16.mxu0 %v11204_v0 }
 0x2d8   :  { %8495 = vmatmul.mubr.msk.bf16.gmra.mrb[8].mxu0 %vm323_vm1, %v11536_v45 }
 0x2d9   :  { %1486 = vmatprep.mubr.bf16.mxu0 %v11204_v0 }
 0x2e0   :  { %8496 = vmatmul.mubr.msk.bf16.gmra.mrb[12].mxu0 %vm323_vm1, %v11544_v46 }
 0x2e1   :  { %1496 = vmatprep.mubr.bf16.mxu0 %v11204_v0 }
 0x2e8   :  { %8497 = vmatmul.mubr.msk.bf16.gmra.mrb[16].mxu0 %vm323_vm1, %v11552_v47 }
 0x2e9   :  { %1506 = vmatprep.mubr.bf16.mxu0 %v11204_v0 }
 0x2f0   :  { %8498 = vmatmul.mubr.msk.bf16.gmra.mrb[20].mxu0 %vm323_vm1, %v11560_v48 }
 0x2f1   :  { %1516 = vmatprep.mubr.bf16.mxu0 %v11204_v0 }
 0x2f8   :  { %8499 = vmatmul.mubr.msk.bf16.gmra.mrb[24].mxu0 %vm323_vm1, %v11568_v50 }
 0x2f9   :  { %1526 = vmatprep.mubr.bf16.mxu0 %v11204_v0 }
 0x300   :  { %8500 = vmatmul.mubr.msk.bf16.gmra.mrb[28].mxu0 %vm323_vm1, %v11576_v51 }
 0x301   :  { %1536 = vmatprep.mubr.bf16.mxu0 %v11204_v0 }
 0x308   :  { %8501 = vmatmul.mubr.msk.bf16.gmra.mrb[32].mxu0 %vm323_vm1, %v11584_v52 }
 0x309   :  { %1546 = vmatprep.mubr.bf16.mxu0 %v11204_v0 }
 0x310   :  { %8502 = vmatmul.mubr.msk.bf16.gmra.mrb[36].mxu0 %vm323_vm1, %v11592_v53 }
 0x311   :  { %1556 = vmatprep.mubr.bf16.mxu0 %v11204_v0 }
 0x318   :  { %8503 = vmatmul.mubr.msk.bf16.gmra.mrb[40].mxu0 %vm323_vm1, %v11600_v54 }
 0x319   :  { %1566 = vmatprep.mubr.bf16.mxu0 %v11204_v0 }
 0x320   :  { %8504 = vmatmul.mubr.msk.bf16.gmra.mrb[44].mxu0 %vm323_vm1, %v11608_v55 }
 0x321   :  { %1576 = vmatprep.mubr.bf16.mxu0 %v11204_v0 }
 0x328   :  { %8505 = vmatmul.mubr.msk.bf16.gmra.mrb[48].mxu0 %vm323_vm1, %v11616_v56 }
 0x329   :  { %1586 = vmatprep.mubr.bf16.mxu0 %v11204_v0 }
 0x330   :  { %8506 = vmatmul.mubr.msk.bf16.gmra.mrb[52].mxu0 %vm323_vm1, %v11624_v57 }
 0x331   :  { %1596 = vmatprep.mubr.bf16.mxu0 %v11204_v0 }
 0x338   :  { %8507 = vmatmul.mubr.msk.bf16.gmra.mrb[56].mxu0 %vm323_vm1, %v11632_v58 }
 0x339   :  { %1606 = vmatprep.mubr.bf16.mxu0 %v11204_v0 }
 0x340   :  { %8508 = vmatmul.mubr.msk.bf16.gmra.mrb[60].mxu0 %vm323_vm1, %v11640_v59 }
 0x341   :  { %1616 = vmatprep.mubr.bf16.mxu0 %v11204_v0 }
 0x348   :  { %8509 = vmatmul.mubr.msk.bf16.gmra.mrb[64].mxu0 %vm323_vm1, %v11716_v2 }
 0x349   :  { %1626 = vmatprep.mubr.bf16.mxu0 %v11204_v0 }
 0x350   :  { %8510 = vmatmul.mubr.msk.bf16.gmra.mrb[68].mxu0 %vm323_vm1, %v11724_v3 }
 0x351   :  { %1636 = vmatprep.mubr.bf16.mxu0 %v11204_v0 }
 0x358   :  { %8511 = vmatmul.mubr.msk.bf16.gmra.mrb[72].mxu0 %vm323_vm1, %v11808_v9 }
 0x359   :  { %1646 = vmatprep.mubr.bf16.mxu0 %v11204_v0 }
 0x360   :  { %8512 = vmatmul.mubr.msk.bf16.gmra.mrb[76].mxu0 %vm323_vm1, %v11816_v10 }
 0x361   :  { %1656 = vmatprep.mubr.bf16.mxu0 %v11204_v0 }
 0x368   :  { %8513 = vmatmul.mubr.msk.bf16.gmra.mrb[80].mxu0 %vm323_vm1, %v11484_v34  ;;  %v11913_v34 = vld [vmem:[#allocation6 + $0x134] ss:$8 sps:$4 sm:$0xff]  }
 0x369   :  { %1666 = vmatprep.mubr.bf16.mxu0 %v11204_v0  ;;  %9316 = vmatprep.subr.bf16.mxu1 %v11913_v34 }
 0x370   :  { %8514 = vmatmul.mubr.msk.bf16.gmra.mrb[84].mxu0 %vm323_vm1, %v11492_v35  ;;  %v11915_v35 = vld [vmem:[#allocation6 + $0x130] ss:$8 sps:$4 sm:$0xff]  }
 0x371   :  { %1676 = vmatprep.mubr.bf16.mxu0 %v11204_v0  ;;  %9324 = vmatpush1.bf16.msra.mxu1 %v11915_v35 }
 0x372   :  { %9317 = vmatprep.subr.bf16.mxu1 %v11919_v36 }
 0x375   :  { %9325 = vmatpush1.bf16.msra.mxu1 %v11925_v38 }
 0x376   :  { %9318 = vmatprep.subr.bf16.mxu1 %v11930_v39 }
 0x378   :  { %8515 = vmatmul.mubr.msk.bf16.gmra.mrb[88].mxu0 %vm323_vm1, %v11744_v4 }
 0x379   :  { %1686 = vmatprep.mubr.bf16.mxu0 %v11204_v0  ;;  %9326 = vmatpush1.bf16.msra.mxu1 %v11932_v40 }
 0x37a   :  { %9319 = vmatprep.subr.bf16.mxu1 %v11936_v41 }
 0x37d   :  { %9327 = vmatpush1.bf16.msra.mxu1 %v11942_v43 }
 0x380   :  { %8516 = vmatmul.mubr.msk.bf16.gmra.mrb[92].mxu0 %vm323_vm1, %v11833_v11 }
 0x381   :  { %1862 = vmatprep.mubr.bf16.mxu0 %v11204_v0 }
 0x388   :  { %8523 = vmatmul.mubr.msk.bf16.vlgmr.msra.gmra.mrb[0].mxu0 %vm323_vm1, %v11528_v44  ;;  %v11947_v44 = vld [vmem:[#allocation6 + $0x174] ss:$8 sps:$4 sm:$0xff]  }
 0x389   :  { %1872 = vmatprep.mubr.bf16.mxu0 %v11204_v0  ;;  %2452 = vmatpush1.bf16.msra.mxu0 %v9934_v12 }
 0x38a   :  { %2453 = vmatprep.subr.bf16.mxu0 %v9939_v15  ;;  %9320 = vmatprep.subr.bf16.mxu1 %v11947_v44 }
 0x38d   :  { %2454 = vmatpush1.bf16.msra.mxu0 %v9937_v14 }
 0x38e   :  { %2455 = vmatprep.subr.bf16.mxu0 %v9942_v17 }
 0x390   :  { %8524 = vmatmul.mubr.msk.bf16.gmra.mrb[4].mxu0 %vm323_vm1, %v11536_v45  ;;  %v11949_v45 = vld [vmem:[#allocation6 + $0x170] ss:$8 sps:$4 sm:$0xff]  }
 0x391   :  { %1882 = vmatprep.mubr.bf16.mxu0 %v11204_v0  ;;  %2456 = vmatpush1.bf16.msra.mxu0 %v9940_v16 }
 0x392   :  { %2457 = vmatprep.subr.bf16.mxu0 %v9946_v19  ;;  %9328 = vmatpush1.bf16.msra.mxu1 %v11949_v45 }
 0x395   :  { %2458 = vmatpush1.bf16.msra.mxu0 %v9944_v18 }
 0x396   :  { %2459 = vmatprep.subr.bf16.mxu0 %v9949_v21 }
 0x398   :  { %8525 = vmatmul.mubr.msk.bf16.gmra.mrb[8].mxu0 %vm323_vm1, %v11544_v46  ;;  %v9943_v46 = vld [vmem:[%s12427_s0 + $0xd8] sm:$0xff]  }
 0x399   :  { %1892 = vmatprep.mubr.bf16.mxu0 %v11204_v0  ;;  %2460 = vmatpush1.bf16.msra.mxu0 %v9947_v20 }
 0x39a   :  { %2461 = vmatprep.subr.bf16.mxu0 %v9952_v22 }
 0x39d   :  { %2462 = vmatpush1.bf16.msra.mxu0 %v9950_v23 }
 0x39e   :  { %2463 = vmatprep.subr.bf16.mxu0 %v9955_v24 }
 0x3a0   :  { %8526 = vmatmul.mubr.msk.bf16.gmra.mrb[12].mxu0 %vm323_vm1, %v11552_v47  ;;  %v9985_v47 = vld [vmem:[#allocation6 + $0x4] ss:$8 sps:$4 sm:$0xff]  }
 0x3a1   :  { %1902 = vmatprep.mubr.bf16.mxu0 %v11204_v0  ;;  %2464 = vmatpush1.bf16.msra.mxu0 %v9953_v25 }
 0x3a2   :  { %2465 = vmatprep.subr.bf16.mxu0 %v9958_v26 }
 0x3a5   :  { %2466 = vmatpush1.bf16.msra.mxu0 %v9956_v27 }
 0x3a6   :  { %2664 = vmatprep.subr.bf16.mxu0 %v9985_v47  ;;  %v9988_v47 = vld [vmem:[#allocation6 + $0x14] ss:$8 sps:$4 sm:$0xff]  }
 0x3a8   :  { %8527 = vmatmul.mubr.msk.bf16.gmra.mrb[16].mxu0 %vm323_vm1, %v11560_v48 }
 0x3a9   :  { %1912 = vmatprep.mubr.bf16.mxu0 %v11204_v0 }
 0x3b0   :  { %8528 = vmatmul.mubr.msk.bf16.gmra.mrb[20].mxu0 %vm323_vm1, %v11568_v50 }
 0x3b1   :  { %1922 = vmatprep.mubr.bf16.mxu0 %v11204_v0 }
 0x3b8   :  { %8529 = vmatmul.mubr.msk.bf16.gmra.mrb[24].mxu0 %vm323_vm1, %v11576_v51 }
 0x3b9   :  { %1932 = vmatprep.mubr.bf16.mxu0 %v11204_v0 }
 0x3c0   :  { %8530 = vmatmul.mubr.msk.bf16.gmra.mrb[28].mxu0 %vm323_vm1, %v11584_v52 }
 0x3c1   :  { %1942 = vmatprep.mubr.bf16.mxu0 %v11204_v0 }
 0x3c8   :  { %8531 = vmatmul.mubr.msk.bf16.gmra.mrb[32].mxu0 %vm323_vm1, %v11592_v53 }
 0x3c9   :  { %1952 = vmatprep.mubr.bf16.mxu0 %v11204_v0 }
 0x3d0   :  { %8532 = vmatmul.mubr.msk.bf16.gmra.mrb[36].mxu0 %vm323_vm1, %v11600_v54 }
 0x3d1   :  { %1962 = vmatprep.mubr.bf16.mxu0 %v11204_v0 }
 0x3d8   :  { %8533 = vmatmul.mubr.msk.bf16.gmra.mrb[40].mxu0 %vm323_vm1, %v11608_v55 }
 0x3d9   :  { %1972 = vmatprep.mubr.bf16.mxu0 %v11204_v0 }
 0x3e0   :  { %8534 = vmatmul.mubr.msk.bf16.gmra.mrb[44].mxu0 %vm323_vm1, %v11616_v56 }
 0x3e1   :  { %1982 = vmatprep.mubr.bf16.mxu0 %v11204_v0 }
 0x3e8   :  { %8535 = vmatmul.mubr.msk.bf16.gmra.mrb[48].mxu0 %vm323_vm1, %v11624_v57 }
 0x3e9   :  { %1992 = vmatprep.mubr.bf16.mxu0 %v11204_v0 }
 0x3f0   :  { %8536 = vmatmul.mubr.msk.bf16.gmra.mrb[52].mxu0 %vm323_vm1, %v11632_v58  ;;  %v11964_v58 = vld [vmem:[#allocation4] ss:$0 sm:$0xff] }
 0x3f1   :  { %2002 = vmatprep.mubr.bf16.mxu0 %v11204_v0 }
 0x3f8   :  { %8537 = vmatmul.mubr.msk.bf16.gmra.mrb[56].mxu0 %vm323_vm1, %v11640_v59 }
 0x3f9   :  { %2012 = vmatprep.mubr.bf16.mxu0 %v11204_v0 }
 0x400   :  { %8538 = vmatmul.mubr.msk.bf16.gmra.mrb[60].mxu0 %vm323_vm1, %v11716_v2 }
 0x401   :  { %2022 = vmatprep.mubr.bf16.mxu0 %v11204_v0 }
 0x408   :  { %8539 = vmatmul.mubr.msk.bf16.gmra.mrb[64].mxu0 %vm323_vm1, %v11724_v3 }
 0x409   :  { %2032 = vmatprep.mubr.bf16.mxu0 %v11204_v0 }
 0x410   :  { %8540 = vmatmul.mubr.msk.bf16.gmra.mrb[68].mxu0 %vm323_vm1, %v11808_v9 }
 0x411   :  { %2042 = vmatprep.mubr.bf16.mxu0 %v11204_v0 }
 0x418   :  { %8541 = vmatmul.mubr.msk.bf16.gmra.mrb[72].mxu0 %vm323_vm1, %v11816_v10 }
 0x419   :  { %2052 = vmatprep.mubr.bf16.mxu0 %v11204_v0 }
 0x420   :  { %8542 = vmatmul.mubr.msk.bf16.gmra.mrb[76].mxu0 %vm323_vm1, %v11029_v37  ;;  %v9983_v37 = vld [vmem:[#allocation6] ss:$8 sps:$4 sm:$0xff]  }
 0x421   :  { %2062 = vmatprep.mubr.bf16.mxu0 %v11204_v0 }
 0x428   :  { %8543 = vmatmul.mubr.msk.bf16.gmra.mrb[80].mxu0 %vm323_vm1, %v11030_v42 }
 0x429   :  { %2072 = vmatprep.mubr.bf16.mxu0 %v11204_v0 }
 0x430   :  { %8544 = vmatmul.mubr.msk.bf16.gmra.mrb[84].mxu0 %vm323_vm1, %v11744_v4 }
 0x431   :  { %2082 = vmatprep.mubr.bf16.mxu0 %v11204_v0 }
 0x438   :  { %8545 = vmatmul.mubr.msk.bf16.gmra.mrb[88].mxu0 %vm323_vm1, %v11833_v11 }
 0x439   :  { %2092 = vmatprep.mubr.bf16.mxu0 %v11204_v0 }
 0x440   :  { %8546 = vmatmul.mubr.msk.bf16.gmra.mrb[92].mxu0 %vm323_vm1, %v9943_v46 }
 0x441   :  { %2483 = vmatprep.mubr.bf16.mxu0 %v11204_v0 }
 0x45b   :  { %v1864_v48 = vpop.f32.mrb[0].mxu0 }
 0x45c   :  { %v1866_v49 = vpop.f32.mrb[1].mxu0 }
 0x45d   :  { %v2199_v50 = vmax.f32 %v1864_v48, %v1866_v49  ;;  %v1868_v51 = vpop.f32.mrb[2].mxu0  ;;  %v9986_v48 = vld [vmem:[#allocation6 + $0x10] ss:$8 sps:$4 sm:$0xff]  }
 0x45e   :  { %v1870_v52 = vpop.f32.mrb[3].mxu0 }
 0x45f   :  { %v2200_v53 = vmax.f32 %v1868_v51, %v1870_v52 }
 0x463   :  { %v1874_v54 = vpop.f32.mrb[4].mxu0 }
 0x464   :  { %v1876_v55 = vpop.f32.mrb[5].mxu0 }
 0x465   :  { %v2223_v56 = vmax.f32 %v1874_v54, %v1876_v55  ;;  %v1878_v57 = vpop.f32.mrb[6].mxu0  ;;  %v9989_v55 = vld [vmem:[#allocation6 + $0x20] ss:$8 sps:$4 sm:$0xff]  }
 0x466   :  { %v1880_v59 = vpop.f32.mrb[7].mxu0 }
 0x467   :  { %v2247_v60 = vmax.f32 %v2199_v50, %v2223_v56  ;;  %v2224_v61 = vmax.f32 %v1878_v57, %v1880_v59  ;;  %v9991_v50 = vld [vmem:[#allocation6 + $0x24] ss:$8 sps:$4 sm:$0xff]   ;;  %v9994_v59 = vld [vmem:[#allocation6 + $0x34] ss:$8 sps:$4 sm:$0xff]  }
 0x469   :  { %v2278_v62 = vadd.f32 %v11964_v58, %v2247_v60  ;;  %v2248_v63 = vmax.f32 %v2200_v53, %v2224_v61 }
 0x46b   :  { %v2279_v1 = vadd.f32 %v11964_v58, %v2248_v63  ;;  %v1884_v2 = vpop.f32.mrb[8].mxu0  ;;  %v2302_v4 = vmax.f32 %v2278_v62, 0.0  ;;  %v9992_v62 = vld [vmem:[#allocation6 + $0x30] ss:$8 sps:$4 sm:$0xff]  }
 0x46c   :  { %v1886_v3 = vpop.f32.mrb[9].mxu0 }
 0x46d   :  { %v2303_v5 = vmax.f32 %v2279_v1, 0.0  ;;  %v2201_v6 = vmax.f32 %v1884_v2, %v1886_v3  ;;  %v1888_v7 = vpop.f32.mrb[10].mxu0  ;;  %v9997_v2 = vld [vmem:[#allocation6 + $0x44] ss:$8 sps:$4 sm:$0xff]  }
 0x46e   :  { %v1890_v8 = vpop.f32.mrb[11].mxu0 }
 0x46f   :  { %v11968_v9 = vpack.c.bf16 %v2303_v5, %v2302_v4  ;;  %v2202_v10 = vmax.f32 %v1888_v7, %v1890_v8 }
 0x473   :  { %v1894_v11 = vpop.f32.mrb[12].mxu0 }
 0x474   :  { %v1896_v12 = vpop.f32.mrb[13].mxu0 }
 0x475   :  { %v2225_v13 = vmax.f32 %v1894_v11, %v1896_v12  ;;  %v1898_v14 = vpop.f32.mrb[14].mxu0 }
 0x476   :  { %v1900_v15 = vpop.f32.mrb[15].mxu0 }
 0x477   :  { %v2249_v16 = vmax.f32 %v2201_v6, %v2225_v13  ;;  %v2226_v17 = vmax.f32 %v1898_v14, %v1900_v15  ;;  %v10000_v13 = vld [vmem:[#allocation6 + $0x54] ss:$8 sps:$4 sm:$0xff]   ;;  %v9998_v14 = vld [vmem:[#allocation6 + $0x50] ss:$8 sps:$4 sm:$0xff]  }
 0x479   :  { %v2280_v18 = vadd.f32 %v11964_v58, %v2249_v16  ;;  %v2250_v19 = vmax.f32 %v2202_v10, %v2226_v17  ;;  %v9995_v10 = vld [vmem:[#allocation6 + $0x40] ss:$8 sps:$4 sm:$0xff]   ;;  %v10003_v16 = vld [vmem:[#allocation6 + $0x64] ss:$8 sps:$4 sm:$0xff]  }
 0x47b   :  { %v2281_v20 = vadd.f32 %v11964_v58, %v2250_v19  ;;  %v1904_v21 = vpop.f32.mrb[16].mxu0  ;;  %v2304_v23 = vmax.f32 %v2280_v18, 0.0 }
 0x47c   :  { %v1906_v22 = vpop.f32.mrb[17].mxu0 }
 0x47d   :  { %v2305_v24 = vmax.f32 %v2281_v20, 0.0  ;;  %v2203_v25 = vmax.f32 %v1904_v21, %v1906_v22  ;;  %v1908_v26 = vpop.f32.mrb[18].mxu0  ;;  %v10001_v21 = vld [vmem:[#allocation6 + $0x60] ss:$8 sps:$4 sm:$0xff]  }
 0x47e   :  { %v1910_v27 = vpop.f32.mrb[19].mxu0 }
 0x47f   :  { %v11972_v42 = vpack.c.bf16 %v2305_v24, %v2304_v23  ;;  %v2204_v46 = vmax.f32 %v1908_v26, %v1910_v27  ;;  %v10006_v24 = vld [vmem:[#allocation6 + $0x74] ss:$8 sps:$4 sm:$0xff]   ;;  %v10004_v27 = vld [vmem:[#allocation6 + $0x70] ss:$8 sps:$4 sm:$0xff]  }
 0x481   :  { %2484 = vmatmul.mubr.bf16.vlgmr.msra.gmra.mrb[96].mxu0 %v11972_v42 }
 0x482   :  { %2493 = vmatprep.mubr.bf16.mxu0 %v11204_v0  ;;  %2665 = vmatpush1.bf16.msra.mxu0 %v9983_v37 }
 0x483   :  { %v1914_v49 = vpop.f32.mrb[20].mxu0  ;;  %2666 = vmatprep.subr.bf16.mxu0 %v9988_v47 }
 0x484   :  { %v1916_v51 = vpop.f32.mrb[21].mxu0 }
 0x485   :  { %v2227_v52 = vmax.f32 %v1914_v49, %v1916_v51  ;;  %v1918_v53 = vpop.f32.mrb[22].mxu0 }
 0x486   :  { %v1920_v54 = vpop.f32.mrb[23].mxu0  ;;  %2667 = vmatpush1.bf16.msra.mxu0 %v9986_v48 }
 0x487   :  { %v2251_v56 = vmax.f32 %v2203_v25, %v2227_v52  ;;  %v2228_v57 = vmax.f32 %v1918_v53, %v1920_v54  ;;  %2668 = vmatprep.subr.bf16.mxu0 %v9991_v50 }
 0x489   :  { %v2282_v60 = vadd.f32 %v11964_v58, %v2251_v56  ;;  %v2252_v61 = vmax.f32 %v2204_v46, %v2228_v57 }
 0x48a   :  { %2669 = vmatpush1.bf16.msra.mxu0 %v9989_v55 }
 0x48b   :  { %v2283_v63 = vadd.f32 %v11964_v58, %v2252_v61  ;;  %v1924_v1 = vpop.f32.mrb[24].mxu0  ;;  %2670 = vmatprep.subr.bf16.mxu0 %v9994_v59  ;;  %v2306_v4 = vmax.f32 %v2282_v60, 0.0 }
 0x48c   :  { %v1926_v3 = vpop.f32.mrb[25].mxu0 }
 0x48d   :  { %v2307_v5 = vmax.f32 %v2283_v63, 0.0  ;;  %v2205_v6 = vmax.f32 %v1924_v1, %v1926_v3  ;;  %v1928_v7 = vpop.f32.mrb[26].mxu0 }
 0x48e   :  { %v1930_v8 = vpop.f32.mrb[27].mxu0  ;;  %2671 = vmatpush1.bf16.msra.mxu0 %v9992_v62 }
 0x48f   :  { %v2206_v11 = vmax.f32 %v1928_v7, %v1930_v8  ;;  %v11978_v12 = vpack.c.bf16 %v2307_v5, %v2306_v4  ;;  %2672 = vmatprep.subr.bf16.mxu0 %v9997_v2 }
 0x491   :  { %2494 = vmatmul.mubr.bf16.gmra.mrb[100].mxu0 %v11978_v12 }
 0x492   :  { %2503 = vmatprep.mubr.bf16.mxu0 %v11204_v0  ;;  %2673 = vmatpush1.bf16.msra.mxu0 %v9995_v10 }
 0x493   :  { %v1934_v15 = vpop.f32.mrb[28].mxu0  ;;  %2674 = vmatprep.subr.bf16.mxu0 %v10000_v13 }
 0x494   :  { %v1936_v17 = vpop.f32.mrb[29].mxu0 }
 0x495   :  { %v2229_v18 = vmax.f32 %v1934_v15, %v1936_v17  ;;  %v1938_v19 = vpop.f32.mrb[30].mxu0 }
 0x496   :  { %v1940_v20 = vpop.f32.mrb[31].mxu0  ;;  %2675 = vmatpush1.bf16.msra.mxu0 %v9998_v14 }
 0x497   :  { %v2253_v22 = vmax.f32 %v2205_v6, %v2229_v18  ;;  %v2230_v23 = vmax.f32 %v1938_v19, %v1940_v20  ;;  %2676 = vmatprep.subr.bf16.mxu0 %v10003_v16 }
 0x499   :  { %v2284_v25 = vadd.f32 %v11964_v58, %v2253_v22  ;;  %v2254_v26 = vmax.f32 %v2206_v11, %v2230_v23 }
 0x49a   :  { %2677 = vmatpush1.bf16.msra.mxu0 %v10001_v21 }
 0x49b   :  { %v2285_v37 = vadd.f32 %v11964_v58, %v2254_v26  ;;  %v1944_v46 = vpop.f32.mrb[32].mxu0  ;;  %2678 = vmatprep.subr.bf16.mxu0 %v10006_v24  ;;  %v2308_v48 = vmax.f32 %v2284_v25, 0.0 }
 0x49c   :  { %v1946_v47 = vpop.f32.mrb[33].mxu0 }
 0x49d   :  { %v2309_v49 = vmax.f32 %v2285_v37, 0.0  ;;  %v2207_v50 = vmax.f32 %v1944_v46, %v1946_v47  ;;  %v1948_v51 = vpop.f32.mrb[34].mxu0 }
 0x49e   :  { %v1950_v52 = vpop.f32.mrb[35].mxu0  ;;  %2679 = vmatpush1.bf16.msra.mxu0 %v10004_v27 }
 0x49f   :  { %v2208_v53 = vmax.f32 %v1948_v51, %v1950_v52  ;;  %v11984_v54 = vpack.c.bf16 %v2309_v49, %v2308_v48  ;;  %2894 = vmatprep.subr.bf16.mxu0 %v11889_v28 }
 0x4a1   :  { %2504 = vmatmul.mubr.bf16.gmra.mrb[104].mxu0 %v11984_v54 }
 0x4a2   :  { %2513 = vmatprep.mubr.bf16.mxu0 %v11204_v0 }
 0x4a3   :  { %v1954_v55 = vpop.f32.mrb[36].mxu0 }
 0x4a4   :  { %v1956_v56 = vpop.f32.mrb[37].mxu0 }
 0x4a5   :  { %v2231_v57 = vmax.f32 %v1954_v55, %v1956_v56  ;;  %v1958_v59 = vpop.f32.mrb[38].mxu0 }
 0x4a6   :  { %v1960_v60 = vpop.f32.mrb[39].mxu0 }
 0x4a7   :  { %v2255_v61 = vmax.f32 %v2207_v50, %v2231_v57  ;;  %v2232_v62 = vmax.f32 %v1958_v59, %v1960_v60 }
 0x4a9   :  { %v2286_v63 = vadd.f32 %v11964_v58, %v2255_v61  ;;  %v2256_v1 = vmax.f32 %v2208_v53, %v2232_v62 }
 0x4ab   :  { %v2287_v2 = vadd.f32 %v11964_v58, %v2256_v1  ;;  %v1964_v3 = vpop.f32.mrb[40].mxu0  ;;  %v2310_v5 = vmax.f32 %v2286_v63, 0.0 }
 0x4ac   :  { %v1966_v4 = vpop.f32.mrb[41].mxu0 }
 0x4ad   :  { %v2311_v28 = vmax.f32 %v2287_v2, 0.0  ;;  %v2209_v6 = vmax.f32 %v1964_v3, %v1966_v4  ;;  %v1968_v7 = vpop.f32.mrb[42].mxu0 }
 0x4ae   :  { %v1970_v8 = vpop.f32.mrb[43].mxu0 }
 0x4af   :  { %v2210_v10 = vmax.f32 %v1968_v7, %v1970_v8  ;;  %v11991_v11 = vpack.c.bf16 %v2311_v28, %v2310_v5 }
 0x4b1   :  { %2514 = vmatmul.mubr.bf16.gmra.mrb[108].mxu0 %v11991_v11  ;;  %2947 = vmatmul.mubr.bf16.vlgmr.msra.gmra.mrb[0].mxu1 %v11991_v11 }
 0x4b2   :  { %2523 = vmatprep.mubr.bf16.mxu0 %v11204_v0  ;;  %2956 = vmatprep.mubr.bf16.mxu1 %v11204_v0 }
 0x4b3   :  { %v1974_v13 = vpop.f32.mrb[44].mxu0 }
 0x4b4   :  { %v1976_v14 = vpop.f32.mrb[45].mxu0 }
 0x4b5   :  { %v2233_v15 = vmax.f32 %v1974_v13, %v1976_v14  ;;  %v1978_v16 = vpop.f32.mrb[46].mxu0 }
 0x4b6   :  { %v1980_v17 = vpop.f32.mrb[47].mxu0 }
 0x4b7   :  { %v2257_v18 = vmax.f32 %v2209_v6, %v2233_v15  ;;  %v2234_v19 = vmax.f32 %v1978_v16, %v1980_v17 }
 0x4b9   :  { %v2288_v20 = vadd.f32 %v11964_v58, %v2257_v18  ;;  %v2258_v21 = vmax.f32 %v2210_v10, %v2234_v19 }
 0x4bb   :  { %v2289_v22 = vadd.f32 %v11964_v58, %v2258_v21  ;;  %v1984_v23 = vpop.f32.mrb[48].mxu0  ;;  %v2312_v25 = vmax.f32 %v2288_v20, 0.0 }
 0x4bc   :  { %v1986_v24 = vpop.f32.mrb[49].mxu0 }
 0x4bd   :  { %v2313_v26 = vmax.f32 %v2289_v22, 0.0  ;;  %v2211_v27 = vmax.f32 %v1984_v23, %v1986_v24  ;;  %v1988_v37 = vpop.f32.mrb[50].mxu0 }
 0x4be   :  { %v1990_v46 = vpop.f32.mrb[51].mxu0 }
 0x4bf   :  { %v2212_v47 = vmax.f32 %v1988_v37, %v1990_v46  ;;  %v11999_v48 = vpack.c.bf16 %v2313_v26, %v2312_v25 }
 0x4c1   :  { %2524 = vmatmul.mubr.bf16.gmra.mrb[112].mxu0 %v11999_v48  ;;  %2957 = vmatmul.mubr.bf16.gmra.mrb[4].mxu1 %v11999_v48 }
 0x4c2   :  { %2533 = vmatprep.mubr.bf16.mxu0 %v11204_v0  ;;  %2966 = vmatprep.mubr.bf16.mxu1 %v11204_v0 }
 0x4c3   :  { %v1994_v49 = vpop.f32.mrb[52].mxu0 }
 0x4c4   :  { %v1996_v50 = vpop.f32.mrb[53].mxu0 }
 0x4c5   :  { %v2235_v51 = vmax.f32 %v1994_v49, %v1996_v50  ;;  %v1998_v52 = vpop.f32.mrb[54].mxu0 }
 0x4c6   :  { %v2000_v53 = vpop.f32.mrb[55].mxu0 }
 0x4c7   :  { %v2259_v55 = vmax.f32 %v2211_v27, %v2235_v51  ;;  %v2236_v56 = vmax.f32 %v1998_v52, %v2000_v53 }
 0x4c9   :  { %v2290_v57 = vadd.f32 %v11964_v58, %v2259_v55  ;;  %v2260_v59 = vmax.f32 %v2212_v47, %v2236_v56 }
 0x4cb   :  { %v2291_v60 = vadd.f32 %v11964_v58, %v2260_v59  ;;  %v2004_v61 = vpop.f32.mrb[56].mxu0  ;;  %v2314_v63 = vmax.f32 %v2290_v57, 0.0 }
 0x4cc   :  { %v2006_v62 = vpop.f32.mrb[57].mxu0 }
 0x4cd   :  { %v2315_v1 = vmax.f32 %v2291_v60, 0.0  ;;  %v2213_v2 = vmax.f32 %v2004_v61, %v2006_v62  ;;  %v2008_v3 = vpop.f32.mrb[58].mxu0 }
 0x4ce   :  { %v2010_v4 = vpop.f32.mrb[59].mxu0 }
 0x4cf   :  { %v2214_v5 = vmax.f32 %v2008_v3, %v2010_v4  ;;  %v12007_v28 = vpack.c.bf16 %v2315_v1, %v2314_v63 }
 0x4d1   :  { %2534 = vmatmul.mubr.bf16.gmra.mrb[116].mxu0 %v12007_v28  ;;  %2967 = vmatmul.mubr.bf16.gmra.mrb[8].mxu1 %v12007_v28 }
 0x4d2   :  { %2543 = vmatprep.mubr.bf16.mxu0 %v11204_v0  ;;  %2976 = vmatprep.mubr.bf16.mxu1 %v11204_v0 }
 0x4d3   :  { %v2014_v6 = vpop.f32.mrb[60].mxu0 }
 0x4d4   :  { %v2016_v7 = vpop.f32.mrb[61].mxu0 }
 0x4d5   :  { %v2237_v8 = vmax.f32 %v2014_v6, %v2016_v7  ;;  %v2018_v10 = vpop.f32.mrb[62].mxu0 }
 0x4d6   :  { %v2020_v13 = vpop.f32.mrb[63].mxu0 }
 0x4d7   :  { %v2261_v14 = vmax.f32 %v2213_v2, %v2237_v8  ;;  %v2238_v15 = vmax.f32 %v2018_v10, %v2020_v13 }
 0x4d9   :  { %v2292_v16 = vadd.f32 %v11964_v58, %v2261_v14  ;;  %v2262_v17 = vmax.f32 %v2214_v5, %v2238_v15 }
 0x4db   :  { %v2293_v18 = vadd.f32 %v11964_v58, %v2262_v17  ;;  %v2024_v19 = vpop.f32.mrb[64].mxu0  ;;  %v2316_v21 = vmax.f32 %v2292_v16, 0.0 }
 0x4dc   :  { %v2026_v20 = vpop.f32.mrb[65].mxu0 }
 0x4dd   :  { %v2317_v22 = vmax.f32 %v2293_v18, 0.0  ;;  %v2215_v23 = vmax.f32 %v2024_v19, %v2026_v20  ;;  %v2028_v24 = vpop.f32.mrb[66].mxu0 }
 0x4de   :  { %v2030_v25 = vpop.f32.mrb[67].mxu0 }
 0x4df   :  { %v2216_v26 = vmax.f32 %v2028_v24, %v2030_v25  ;;  %v12015_v27 = vpack.c.bf16 %v2317_v22, %v2316_v21 }
 0x4e1   :  { %2544 = vmatmul.mubr.bf16.gmra.mrb[120].mxu0 %v12015_v27  ;;  %2977 = vmatmul.mubr.bf16.gmra.mrb[12].mxu1 %v12015_v27 }
 0x4e2   :  { %2553 = vmatprep.mubr.bf16.mxu0 %v11204_v0  ;;  %2986 = vmatprep.mubr.bf16.mxu1 %v11204_v0 }
 0x4e3   :  { %v2034_v37 = vpop.f32.mrb[68].mxu0 }
 0x4e4   :  { %v2036_v46 = vpop.f32.mrb[69].mxu0 }
 0x4e5   :  { %v2239_v47 = vmax.f32 %v2034_v37, %v2036_v46  ;;  %v2038_v49 = vpop.f32.mrb[70].mxu0 }
 0x4e6   :  { %v2040_v50 = vpop.f32.mrb[71].mxu0 }
 0x4e7   :  { %v2263_v51 = vmax.f32 %v2215_v23, %v2239_v47  ;;  %v2240_v52 = vmax.f32 %v2038_v49, %v2040_v50 }
 0x4e9   :  { %v2294_v53 = vadd.f32 %v11964_v58, %v2263_v51  ;;  %v2264_v55 = vmax.f32 %v2216_v26, %v2240_v52 }
 0x4eb   :  { %v2295_v56 = vadd.f32 %v11964_v58, %v2264_v55  ;;  %v2044_v57 = vpop.f32.mrb[72].mxu0  ;;  %v2318_v60 = vmax.f32 %v2294_v53, 0.0 }
 0x4ec   :  { %v2046_v59 = vpop.f32.mrb[73].mxu0 }
 0x4ed   :  { %v2319_v61 = vmax.f32 %v2295_v56, 0.0  ;;  %v2217_v62 = vmax.f32 %v2044_v57, %v2046_v59  ;;  %v2048_v63 = vpop.f32.mrb[74].mxu0 }
 0x4ee   :  { %v2050_v1 = vpop.f32.mrb[75].mxu0 }
 0x4ef   :  { %v2218_v2 = vmax.f32 %v2048_v63, %v2050_v1  ;;  %v12023_v3 = vpack.c.bf16 %v2319_v61, %v2318_v60 }
 0x4f1   :  { %2554 = vmatmul.mubr.bf16.gmra.mrb[124].mxu0 %v12023_v3  ;;  %2987 = vmatmul.mubr.bf16.gmra.mrb[16].mxu1 %v12023_v3 }
 0x4f2   :  { %2563 = vmatprep.mubr.bf16.mxu0 %v11204_v0  ;;  %2996 = vmatprep.mubr.bf16.mxu1 %v11204_v0 }
 0x4f3   :  { %v2054_v4 = vpop.f32.mrb[76].mxu0 }
 0x4f4   :  { %v2056_v5 = vpop.f32.mrb[77].mxu0 }
 0x4f5   :  { %v2241_v6 = vmax.f32 %v2054_v4, %v2056_v5  ;;  %v2058_v7 = vpop.f32.mrb[78].mxu0 }
 0x4f6   :  { %v2060_v8 = vpop.f32.mrb[79].mxu0 }
 0x4f7   :  { %v2265_v10 = vmax.f32 %v2217_v62, %v2241_v6  ;;  %v2242_v13 = vmax.f32 %v2058_v7, %v2060_v8 }
 0x4f9   :  { %v2296_v14 = vadd.f32 %v11964_v58, %v2265_v10  ;;  %v2266_v15 = vmax.f32 %v2218_v2, %v2242_v13 }
 0x4fb   :  { %v2297_v16 = vadd.f32 %v11964_v58, %v2266_v15  ;;  %v2064_v17 = vpop.f32.mrb[80].mxu0  ;;  %v2320_v19 = vmax.f32 %v2296_v14, 0.0 }
 0x4fc   :  { %v2066_v18 = vpop.f32.mrb[81].mxu0 }
 0x4fd   :  { %v2321_v20 = vmax.f32 %v2297_v16, 0.0  ;;  %v2219_v21 = vmax.f32 %v2064_v17, %v2066_v18  ;;  %v2068_v22 = vpop.f32.mrb[82].mxu0 }
 0x4fe   :  { %v2070_v23 = vpop.f32.mrb[83].mxu0 }
 0x4ff   :  { %v2220_v24 = vmax.f32 %v2068_v22, %v2070_v23  ;;  %v12031_v25 = vpack.c.bf16 %v2321_v20, %v2320_v19  ;;  %v10036_v20 = vld [vmem:[#allocation9 + $0x284] ss:$16 sps:$4 sm:$0xff]   ;;  %v10039_v22 = vld [vmem:[#allocation9 + $0x2ac] ss:$16 sps:$4 sm:$0xff]   ;;  %v10037_v23 = vld [vmem:[#allocation9 + $0x2a8] ss:$16 sps:$4 sm:$0xff]  }
 0x501   :  { %2564 = vmatmul.mubr.bf16.gmra.mrb[128].mxu0 %v12031_v25  ;;  %2997 = vmatmul.mubr.bf16.gmra.mrb[20].mxu1 %v12031_v25 }
 0x502   :  { %2573 = vmatprep.mubr.bf16.mxu0 %v11204_v0  ;;  %3006 = vmatprep.mubr.bf16.mxu1 %v11204_v0 }
 0x503   :  { %v2074_v26 = vpop.f32.mrb[84].mxu0 }
 0x504   :  { %v2076_v37 = vpop.f32.mrb[85].mxu0 }
 0x505   :  { %v2243_v46 = vmax.f32 %v2074_v26, %v2076_v37  ;;  %v2078_v47 = vpop.f32.mrb[86].mxu0  ;;  %v10045_v37 = vld [vmem:[#allocation9 + $0x2cc] ss:$16 sps:$4 sm:$0xff]  }
 0x506   :  { %v2080_v49 = vpop.f32.mrb[87].mxu0 }
 0x507   :  { %v2267_v50 = vmax.f32 %v2219_v21, %v2243_v46  ;;  %v2244_v51 = vmax.f32 %v2078_v47, %v2080_v49  ;;  %v10034_v21 = vld [vmem:[#allocation9 + $0x280] ss:$16 sps:$4 sm:$0xff]   ;;  %v10043_v47 = vld [vmem:[#allocation9 + $0x2c8] ss:$16 sps:$4 sm:$0xff]   ;;  %v10048_v49 = vld [vmem:[#allocation9 + $0x2c4] ss:$16 sps:$4 sm:$0xff]  }
 0x509   :  { %v2298_v52 = vadd.f32 %v11964_v58, %v2267_v50  ;;  %v2268_v53 = vmax.f32 %v2220_v24, %v2244_v51  ;;  %v10042_v24 = vld [vmem:[#allocation9 + $0x2a4] ss:$16 sps:$4 sm:$0xff]   ;;  %v10046_v51 = vld [vmem:[#allocation9 + $0x2c0] ss:$16 sps:$4 sm:$0xff]  }
 0x50b   :  { %v2299_v55 = vadd.f32 %v11964_v58, %v2268_v53  ;;  %v2084_v56 = vpop.f32.mrb[88].mxu0  ;;  %v2322_v59 = vmax.f32 %v2298_v52, 0.0  ;;  %v10051_v53 = vld [vmem:[#allocation9 + $0x2ec] ss:$16 sps:$4 sm:$0xff]  }
 0x50c   :  { %v2086_v57 = vpop.f32.mrb[89].mxu0 }
 0x50d   :  { %v2323_v60 = vmax.f32 %v2299_v55, 0.0  ;;  %v2221_v61 = vmax.f32 %v2084_v56, %v2086_v57  ;;  %v2088_v62 = vpop.f32.mrb[90].mxu0  ;;  %v10049_v55 = vld [vmem:[#allocation9 + $0x2e8] ss:$16 sps:$4 sm:$0xff]   ;;  %v10054_v56 = vld [vmem:[#allocation9 + $0x2e4] ss:$16 sps:$4 sm:$0xff]  }
 0x50e   :  { %v2090_v63 = vpop.f32.mrb[91].mxu0  ;;  %v10052_v57 = vld [vmem:[#allocation9 + $0x2e0] ss:$16 sps:$4 sm:$0xff]  }
 0x50f   :  { %v2222_v1 = vmax.f32 %v2088_v62, %v2090_v63  ;;  %v2336_v2 = vpack.c.bf16 %v2323_v60, %v2322_v59  ;;  %v10057_v59 = vld [vmem:[#allocation9 + $0x30c] ss:$16 sps:$4 sm:$0xff]   ;;  %v10055_v60 = vld [vmem:[#allocation9 + $0x308] ss:$16 sps:$4 sm:$0xff]   ;;  %v10058_v62 = vld [vmem:[#allocation9 + $0x300] ss:$16 sps:$4 sm:$0xff]  }
 0x510   :  { %v10063_v63 = vld [vmem:[#allocation9 + $0x32c] ss:$16 sps:$4 sm:$0xff]  }
 0x511   :  { %2574 = vmatmul.mubr.bf16.gmra.mrb[132].mxu0 %v2336_v2  ;;  %3007 = vmatmul.mubr.bf16.gmra.mrb[24].mxu1 %v2336_v2  ;;  %v10066_v2 = vld [vmem:[#allocation9 + $0x324] ss:$16 sps:$4 sm:$0xff]  }
 0x512   :  { %2696 = vmatprep.mubr.bf16.mxu0 %v11204_v0  ;;  %3016 = vmatprep.mubr.bf16.mxu1 %v11204_v0 }
 0x513   :  { %v2094_v4 = vpop.f32.mrb[92].mxu0 }
 0x514   :  { %v2096_v5 = vpop.f32.mrb[93].mxu0 }
 0x515   :  { %v2245_v6 = vmax.f32 %v2094_v4, %v2096_v5  ;;  %v2098_v7 = vpop.f32.mrb[94].mxu0  ;;  %v10064_v4 = vld [vmem:[#allocation9 + $0x320] ss:$16 sps:$4 sm:$0xff]  }
 0x516   :  { %v2100_v8 = vpop.f32.mrb[95].mxu0 }
 0x517   :  { %v2269_v10 = vmax.f32 %v2221_v61, %v2245_v6  ;;  %v2246_v13 = vmax.f32 %v2098_v7, %v2100_v8  ;;  %v10060_v61 = vld [vmem:[#allocation9 + $0x304] ss:$16 sps:$4 sm:$0xff]   ;;  %v10069_v6 = vld [vmem:[#allocation9 + $0x34c] ss:$16 sps:$4 sm:$0xff]   ;;  %v10067_v8 = vld [vmem:[#allocation9 + $0x348] ss:$16 sps:$4 sm:$0xff]  }
 0x519   :  { %v2300_v14 = vadd.f32 %v11964_v58, %v2269_v10  ;;  %v2270_v15 = vmax.f32 %v2222_v1, %v2246_v13  ;;  %2697 = vmatmul.mubr.bf16.vlgmr.msra.gmra.mrb[96].mxu0 %v11968_v9  ;;  %v10061_v1 = vld [vmem:[#allocation9 + $0x328] ss:$16 sps:$4 sm:$0xff]   ;;  %v10072_v10 = vld [vmem:[#allocation9 + $0x344] ss:$16 sps:$4 sm:$0xff]  }
 0x51a   :  { %2895 = vmatpush1.bf16.msra.mxu0 %v11893_v29  ;;  %2706 = vmatprep.mubr.bf16.mxu0 %v11204_v0 }
 0x51b   :  { %v2301_v16 = vadd.f32 %v11964_v58, %v2270_v15  ;;  %2896 = vmatprep.subr.bf16.mxu0 %v11898_v30  ;;  %v2324_v17 = vmax.f32 %v2300_v14, 0.0  ;;  %v10024_v58 = vld [vmem:[#allocation9 + $0x244] ss:$16 sps:$4 sm:$0xff]   ;;  %v10070_v14 = vld [vmem:[#allocation9 + $0x340] ss:$16 sps:$4 sm:$0xff]  }
 0x51d   :  { %v2325_v18 = vmax.f32 %v2301_v16, 0.0  ;;  %v10075_v16 = vld [vmem:[#allocation9 + $0x36c] ss:$16 sps:$4 sm:$0xff]  }
 0x51e   :  { %2897 = vmatpush1.bf16.msra.mxu0 %v11900_v31 }
 0x51f   :  { %v2337_v19 = vpack.c.bf16 %v2325_v18, %v2324_v17  ;;  %2898 = vmatprep.subr.bf16.mxu0 %v11904_v32  ;;  %v10073_v17 = vld [vmem:[#allocation9 + $0x368] ss:$16 sps:$4 sm:$0xff]   ;;  %v10078_v18 = vld [vmem:[#allocation9 + $0x364] ss:$16 sps:$4 sm:$0xff]  }
 0x521   :  { %2707 = vmatmul.mubr.bf16.gmra.mrb[100].mxu0 %v11972_v42  ;;  %3017 = vmatmul.mubr.bf16.gmra.mrb[28].mxu1 %v2337_v19  ;;  %v10022_v42 = vld [vmem:[#allocation9 + $0x240] ss:$16 sps:$4 sm:$0xff]  }
 0x522   :  { %2716 = vmatprep.mubr.bf16.mxu0 %v11204_v0  ;;  %2899 = vmatpush1.bf16.msra.mxu0 %v11908_v33  ;;  %v10009_v33 = vld [vmem:[#allocation9 + $0x20c] ss:$16 sps:$4 sm:$0xff]   ;;  %v10076_v19 = vld [vmem:[#allocation9 + $0x360] ss:$16 sps:$4 sm:$0xff]  }
 0x523   :  { %2900 = vmatprep.subr.bf16.mxu0 %v11913_v34  ;;  %v10007_v34 = vld [vmem:[#allocation9 + $0x208] ss:$16 sps:$4 sm:$0xff]   ;;  %3671 = vmatprep.subr.bf16.mxu1 %v10009_v33  ;;  %v10081_v33 = vld [vmem:[#allocation9 + $0x38c] ss:$16 sps:$4 sm:$0xff]  }
 0x524   :  { %3672 = vmatpush1.bf16.msra.mxu1 %v10007_v34  ;;  %v10079_v34 = vld [vmem:[#allocation9 + $0x388] ss:$16 sps:$4 sm:$0xff]  }
 0x526   :  { %2901 = vmatpush1.bf16.msra.mxu0 %v11915_v35  ;;  %v10012_v35 = vld [vmem:[#allocation9 + $0x204] ss:$16 sps:$4 sm:$0xff]  }
 0x527   :  { %2902 = vmatprep.subr.bf16.mxu0 %v11919_v36  ;;  %v10010_v36 = vld [vmem:[#allocation9 + $0x200] ss:$16 sps:$4 sm:$0xff]  }
 0x529   :  { %2717 = vmatmul.mubr.bf16.gmra.mrb[104].mxu0 %v11978_v12 }
 0x52a   :  { %2726 = vmatprep.mubr.bf16.mxu0 %v11204_v0  ;;  %2903 = vmatpush1.bf16.msra.mxu0 %v11925_v38  ;;  %v10015_v38 = vld [vmem:[#allocation9 + $0x22c] ss:$16 sps:$4 sm:$0xff]  }
 0x52b   :  { %2904 = vmatprep.subr.bf16.mxu0 %v11930_v39  ;;  %v10018_v39 = vld [vmem:[#allocation9 + $0x224] ss:$16 sps:$4 sm:$0xff]   ;;  %3673 = vmatprep.subr.bf16.mxu1 %v10015_v38  ;;  %v10087_v38 = vld [vmem:[#allocation9 + $0x3ac] ss:$16 sps:$4 sm:$0xff]  }
 0x52e   :  { %2905 = vmatpush1.bf16.msra.mxu0 %v11932_v40  ;;  %v10016_v40 = vld [vmem:[#allocation9 + $0x220] ss:$16 sps:$4 sm:$0xff]  }
 0x52f   :  { %2906 = vmatprep.subr.bf16.mxu0 %v11936_v41 }
 0x531   :  { %2727 = vmatmul.mubr.bf16.gmra.mrb[108].mxu0 %v11984_v54 }
 0x532   :  { %2736 = vmatprep.mubr.bf16.mxu0 %v11204_v0  ;;  %2907 = vmatpush1.bf16.msra.mxu0 %v11942_v43  ;;  %v10021_v43 = vld [vmem:[#allocation9 + $0x24c] ss:$16 sps:$4 sm:$0xff]  }
 0x533   :  { %2908 = vmatprep.subr.bf16.mxu0 %v11947_v44 }
 0x536   :  { %2909 = vmatpush1.bf16.msra.mxu0 %v11949_v45  ;;  %v10019_v45 = vld [vmem:[#allocation9 + $0x248] ss:$16 sps:$4 sm:$0xff]  }
 0x537   :  { %3628 = vmatprep.subr.bf16.mxu0 %v10012_v35  ;;  %v10084_v35 = vld [vmem:[#allocation9 + $0x384] ss:$16 sps:$4 sm:$0xff]  }
 0x539   :  { %2737 = vmatmul.mubr.bf16.gmra.mrb[112].mxu0 %v11991_v11  ;;  %v10025_v11 = vld [vmem:[#allocation9 + $0x268] ss:$16 sps:$4 sm:$0xff]  }
 0x53a   :  { %2746 = vmatprep.mubr.bf16.mxu0 %v11204_v0 }
 0x541   :  { %2747 = vmatmul.mubr.bf16.gmra.mrb[116].mxu0 %v11999_v48  ;;  %v10030_v48 = vld [vmem:[#allocation9 + $0x264] ss:$16 sps:$4 sm:$0xff]  }
 0x542   :  { %2756 = vmatprep.mubr.bf16.mxu0 %v11204_v0 }
 0x549   :  { %2757 = vmatmul.mubr.bf16.gmra.mrb[120].mxu0 %v12007_v28  ;;  %v10028_v28 = vld [vmem:[#allocation9 + $0x260] ss:$16 sps:$4 sm:$0xff]  }
 0x54a   :  { %2766 = vmatprep.mubr.bf16.mxu0 %v11204_v0 }
 0x551   :  { %2767 = vmatmul.mubr.bf16.gmra.mrb[124].mxu0 %v12015_v27  ;;  %v10033_v27 = vld [vmem:[#allocation9 + $0x28c] ss:$16 sps:$4 sm:$0xff]  }
 0x552   :  { %2776 = vmatprep.mubr.bf16.mxu0 %v11204_v0 }
 0x559   :  { %2777 = vmatmul.mubr.bf16.gmra.mrb[128].mxu0 %v12023_v3  ;;  %v10031_v3 = vld [vmem:[#allocation9 + $0x288] ss:$16 sps:$4 sm:$0xff]  }
 0x55a   :  { %2786 = vmatprep.mubr.bf16.mxu0 %v11204_v0 }
 0x561   :  { %2787 = vmatmul.mubr.bf16.gmra.mrb[132].mxu0 %v12031_v25  ;;  %v10040_v25 = vld [vmem:[#allocation9 + $0x2a0] ss:$16 sps:$4 sm:$0xff]  }
 0x562   :  { %2926 = vmatprep.mubr.bf16.mxu0 %v11204_v0 }
 0x569   :  { %2927 = vmatmul.mubr.bf16.vlgmr.msra.gmra.mrb[96].mxu0 %v11978_v12 }
 0x56a   :  { %2936 = vmatprep.mubr.bf16.mxu0 %v11204_v0  ;;  %3629 = vmatpush1.bf16.msra.mxu0 %v10010_v36  ;;  %v10013_v0 = vld [vmem:[#allocation9 + $0x228] ss:$16 sps:$4 sm:$0xff]   ;;  %v10082_v36 = vld [vmem:[#allocation9 + $0x380] ss:$16 sps:$4 sm:$0xff]  }
 0x56b   :  { %3630 = vmatprep.subr.bf16.mxu0 %v10018_v39  ;;  %3674 = vmatpush1.bf16.msra.mxu1 %v10013_v0  ;;  %v10085_v0 = vld [vmem:[#allocation9 + $0x3a8] ss:$16 sps:$4 sm:$0xff]   ;;  %v10090_v39 = vld [vmem:[#allocation9 + $0x3a4] ss:$16 sps:$4 sm:$0xff]  }
 0x56c   :  { %3675 = vmatprep.subr.bf16.mxu1 %v10021_v43 }
 0x56e   :  { %3631 = vmatpush1.bf16.msra.mxu0 %v10016_v40  ;;  %v10088_v40 = vld [vmem:[#allocation9 + $0x3a0] ss:$16 sps:$4 sm:$0xff]  }
 0x56f   :  { %3632 = vmatprep.subr.bf16.mxu0 %v10024_v58  ;;  %3676 = vmatpush1.bf16.msra.mxu1 %v10019_v45  ;;  %v10093_v45 = vld [vmem:[#allocation9 + $0x3cc] ss:$16 sps:$4 sm:$0xff]  }
 0x571   :  { %2937 = vmatmul.mubr.bf16.gmra.mrb[100].mxu0 %v11984_v54  ;;  %v10027_v54 = vld [vmem:[#allocation9 + $0x26c] ss:$16 sps:$4 sm:$0xff]  }
 0x572   :  { %3633 = vmatpush1.bf16.msra.mxu0 %v10022_v42  ;;  %3677 = vmatprep.subr.bf16.mxu1 %v10027_v54  ;;  %v10091_v42 = vld [vmem:[#allocation9 + $0x3c8] ss:$16 sps:$4 sm:$0xff]   ;;  %v10096_v54 = vld [vmem:[#allocation9 + $0x3c4] ss:$16 sps:$4 sm:$0xff]  }
 0x573   :  { %3634 = vmatprep.subr.bf16.mxu0 %v10030_v48  ;;  %3678 = vmatpush1.bf16.msra.mxu1 %v10025_v11  ;;  %v10094_v48 = vld [vmem:[#allocation9 + $0x3c0] ss:$16 sps:$4 sm:$0xff]  }
 0x574   :  { %3679 = vmatprep.subr.bf16.mxu1 %v10033_v27  ;;  %v10099_v27 = vld [vmem:[#allocation9 + $0x3ec] ss:$16 sps:$4 sm:$0xff]  }
 0x576   :  { %3635 = vmatpush1.bf16.msra.mxu0 %v10028_v28 }
 0x577   :  { %3636 = vmatprep.subr.bf16.mxu0 %v10036_v20  ;;  %3680 = vmatpush1.bf16.msra.mxu1 %v10031_v3  ;;  %v10097_v3 = vld [vmem:[#allocation9 + $0x3e8] ss:$16 sps:$4 sm:$0xff]   ;;  %v10102_v20 = vld [vmem:[#allocation9 + $0x3e4] ss:$16 sps:$4 sm:$0xff]  }
 0x578   :  { %3681 = vmatprep.subr.bf16.mxu1 %v10039_v22  ;;  %v10105_v22 = vld [vmem:[#allocation9 + $0x4] ss:$16 sps:$4 sm:$0xff]  }
 0x57a   :  { %3637 = vmatpush1.bf16.msra.mxu0 %v10034_v21  ;;  %v10100_v21 = vld [vmem:[#allocation9 + $0x3e0] ss:$16 sps:$4 sm:$0xff]  }
 0x57b   :  { %3638 = vmatprep.subr.bf16.mxu0 %v10042_v24  ;;  %3682 = vmatpush1.bf16.msra.mxu1 %v10037_v23 }
 0x57c   :  { %3683 = vmatprep.subr.bf16.mxu1 %v10045_v37 }
 0x57e   :  { %3639 = vmatpush1.bf16.msra.mxu0 %v10040_v25 }
 0x57f   :  { %3640 = vmatprep.subr.bf16.mxu0 %v10048_v49  ;;  %3684 = vmatpush1.bf16.msra.mxu1 %v10043_v47 }
 0x580   :  { %3685 = vmatprep.subr.bf16.mxu1 %v10051_v53 }
 0x582   :  { %3641 = vmatpush1.bf16.msra.mxu0 %v10046_v51 }
 0x583   :  { %3642 = vmatprep.subr.bf16.mxu0 %v10054_v56  ;;  %3686 = vmatpush1.bf16.msra.mxu1 %v10049_v55  ;;  %v3069_v55 = vlaneseq }
 0x584   :  { %v12081_v29 = vpop.f32.mrb[0].mxu1  ;;  %3687 = vmatprep.subr.bf16.mxu1 %v10057_v59 }
 0x585   :  { %v12083_v30 = vpop.f32.mrb[1].mxu1  ;;  %v12137_v56 = vshrl.u32 %v3069_v55, 7 }
 0x586   :  { %v12085_v31 = vpop.f32.mrb[2].mxu1  ;;  %3643 = vmatpush1.bf16.msra.mxu0 %v10052_v57 }
 0x587   :  { %v12087_v32 = vpop.f32.mrb[3].mxu1  ;;  %3644 = vmatprep.subr.bf16.mxu0 %v10060_v61  ;;  %3688 = vmatpush1.bf16.msra.mxu1 %v10055_v60 }
 0x588   :  { %3689 = vmatprep.subr.bf16.mxu1 %v10063_v63  ;;  %v3067_v63 = vld [vmem:[#allocation7] sm:$0x3] }
 0x58a   :  { %3645 = vmatpush1.bf16.msra.mxu0 %v10058_v62  ;;  %v3071_v62 = vsub.s32 0, %v12137_v56 }
 0x58b   :  { %3646 = vmatprep.subr.bf16.mxu0 %v10066_v2  ;;  %3690 = vmatpush1.bf16.msra.mxu1 %v10061_v1  ;;  %v3075_v1 = vsub.s32 1, %v12137_v56 }
 0x58c   :  { %3691 = vmatprep.subr.bf16.mxu1 %v10069_v6  ;;  %v12151_v2 = vrot.slane %v3067_v63, %v3071_v62 }
 0x58d   :  { %v12155_v6 = vrot.slane %v3067_v63, %v3075_v1 }
 0x58e   :  { %3647 = vmatpush1.bf16.msra.mxu0 %v10064_v4 }
 0x58f   :  { %3648 = vmatprep.subr.bf16.mxu0 %v10072_v10  ;;  %3692 = vmatpush1.bf16.msra.mxu1 %v10067_v8 }
 0x590   :  { %3693 = vmatprep.subr.bf16.mxu1 %v10075_v16 }
 0x592   :  { %3649 = vmatpush1.bf16.msra.mxu0 %v10070_v14 }
 0x593   :  { %3650 = vmatprep.subr.bf16.mxu0 %v10078_v18  ;;  %3694 = vmatpush1.bf16.msra.mxu1 %v10073_v17 }
 0x594   :  { %v12089_v41 = vpop.f32.mrb[4].mxu1  ;;  %3695 = vmatprep.subr.bf16.mxu1 %v10081_v33 }
 0x595   :  { %v12091_v44 = vpop.f32.mrb[5].mxu1 }
 0x596   :  { %v12093_v9 = vpop.f32.mrb[6].mxu1  ;;  %3651 = vmatpush1.bf16.msra.mxu0 %v10076_v19 }
 0x597   :  { %v12095_v12 = vpop.f32.mrb[7].mxu1  ;;  %3652 = vmatprep.subr.bf16.mxu0 %v10084_v35  ;;  %3696 = vmatpush1.bf16.msra.mxu1 %v10079_v34 }
 0x598   :  { %3697 = vmatprep.subr.bf16.mxu1 %v10087_v38 }
 0x59a   :  { %3653 = vmatpush1.bf16.msra.mxu0 %v10082_v36 }
 0x59b   :  { %3654 = vmatprep.subr.bf16.mxu0 %v10090_v39  ;;  %3698 = vmatpush1.bf16.msra.mxu1 %v10085_v0 }
 0x59c   :  { %3699 = vmatprep.subr.bf16.mxu1 %v10093_v45 }
 0x59e   :  { %3655 = vmatpush1.bf16.msra.mxu0 %v10088_v40 }
 0x59f   :  { %3656 = vmatprep.subr.bf16.mxu0 %v10096_v54  ;;  %3700 = vmatpush1.bf16.msra.mxu1 %v10091_v42 }
 0x5a0   :  { %3701 = vmatprep.subr.bf16.mxu1 %v10099_v27 }
 0x5a2   :  { %3657 = vmatpush1.bf16.msra.mxu0 %v10094_v48 }
 0x5a3   :  { %3658 = vmatprep.subr.bf16.mxu0 %v10102_v20  ;;  %3702 = vmatpush1.bf16.msra.mxu1 %v10097_v3 }
 0x5a4   :  { %v12097_v26 = vpop.f32.mrb[8].mxu1  ;;  %4034 = vmatprep.subr.bf16.mxu1 %v10105_v22 }
 0x5a5   :  { %v12099_v46 = vpop.f32.mrb[9].mxu1 }
 0x5a6   :  { %v12101_v50 = vpop.f32.mrb[10].mxu1  ;;  %3659 = vmatpush1.bf16.msra.mxu0 %v10100_v21 }
 0x5a7   :  { %v12103_v52 = vpop.f32.mrb[11].mxu1 }
 0x5b4   :  { %v12105_v5 = vpop.f32.mrb[12].mxu1 }
 0x5b5   :  { %v12107_v7 = vpop.f32.mrb[13].mxu1 }
 0x5b6   :  { %v12109_v13 = vpop.f32.mrb[14].mxu1 }
 0x5b7   :  { %v12111_v15 = vpop.f32.mrb[15].mxu1 }
 0x5c4   :  { %v12113_v43 = vpop.f32.mrb[16].mxu1 }
 0x5c5   :  { %v12115_v58 = vpop.f32.mrb[17].mxu1 }
 0x5c6   :  { %v12117_v11 = vpop.f32.mrb[18].mxu1 }
 0x5c7   :  { %v12119_v28 = vpop.f32.mrb[19].mxu1 }
 0x5d4   :  { %v12121_v23 = vpop.f32.mrb[20].mxu1 }
 0x5d5   :  { %v12123_v24 = vpop.f32.mrb[21].mxu1 }
 0x5d6   :  { %v12125_v25 = vpop.f32.mrb[22].mxu1 }
 0x5d7   :  { %v12127_v37 = vpop.f32.mrb[23].mxu1 }
 0x5e4   :  { %v12129_v47 = vpop.f32.mrb[24].mxu1 }
 0x5e5   :  { %v12131_v49 = vpop.f32.mrb[25].mxu1 }
 0x5e6   :  { %v12133_v51 = vpop.f32.mrb[26].mxu1 }
 0x5e7   :  { %v12135_v53 = vpop.f32.mrb[27].mxu1 }
 0x5f4   :  { %v12139_v57 = vpop.f32.mrb[28].mxu1 }
 0x5f5   :  { %v12141_v59 = vpop.f32.mrb[29].mxu1 }
 0x5f6   :  { %v12143_v60 = vpop.f32.mrb[30].mxu1 }
 0x5f7   :  { %v12145_v61 = vpop.f32.mrb[31].mxu1 }
 0x5fc   :  { %v2718_v4 = vpop.f32.mrb[104].mxu0 }
 0x5fd   :  { %v9329_v8 = vadd.f32 %v12081_v29, %v2718_v4  ;;  %v2720_v10 = vpop.f32.mrb[105].mxu0 }
 0x5fe   :  { %v9330_v14 = vadd.f32 %v12083_v30, %v2720_v10  ;;  %v2722_v16 = vpop.f32.mrb[106].mxu0 }
 0x5ff   :  { %v3087_v17 = vadd.f32 %v9329_v8, %v12151_v2  ;;  %v9331_v18 = vadd.f32 %v12085_v31, %v2722_v16  ;;  %v2724_v19 = vpop.f32.mrb[107].mxu0 }
 0x600   :  { %v3088_v33 = vadd.f32 %v9330_v14, %v12155_v6  ;;  %v9332_v34 = vadd.f32 %v12087_v32, %v2724_v19 }
 0x601   :  { %v3089_v35 = vadd.f32 %v9331_v18, %v12151_v2  ;;  %v3127_v38 = vmax.f32 %v3087_v17, 0.0 }
 0x602   :  { %v3090_v36 = vadd.f32 %v9332_v34, %v12155_v6  ;;  %v3128_v29 = vmax.f32 %v3088_v33, 0.0 }
 0x603   :  { %v3129_v0 = vmax.f32 %v3089_v35, 0.0 }
 0x604   :  { %v3130_v39 = vmax.f32 %v3090_v36, 0.0  ;;  %v2728_v40 = vpop.f32.mrb[108].mxu0 }
 0x605   :  { %v12165_v30 = vpack.c.bf16 %v3129_v0, %v3127_v38  ;;  %v9333_v45 = vadd.f32 %v12089_v41, %v2728_v40  ;;  %v2730_v42 = vpop.f32.mrb[109].mxu0 }
 0x606   :  { %v9334_v31 = vadd.f32 %v12091_v44, %v2730_v42  ;;  %v2732_v54 = vpop.f32.mrb[110].mxu0  ;;  %v12169_v48 = vpack.c.bf16 %v3130_v39, %v3128_v29 }
 0x607   :  { %v3091_v32 = vadd.f32 %v9333_v45, %v12151_v2  ;;  %v9335_v27 = vadd.f32 %v12093_v9, %v2732_v54  ;;  %v2734_v3 = vpop.f32.mrb[111].mxu0 }
 0x608   :  { %v3092_v20 = vadd.f32 %v9334_v31, %v12155_v6  ;;  %v9336_v21 = vadd.f32 %v12095_v12, %v2734_v3 }
 0x609   :  { %v3093_v22 = vadd.f32 %v9335_v27, %v12151_v2  ;;  %v3131_v41 = vmax.f32 %v3091_v32, 0.0 }
 0x60a   :  { %v3094_v55 = vadd.f32 %v9336_v21, %v12155_v6  ;;  %v3132_v4 = vmax.f32 %v3092_v20, 0.0 }
 0x60b   :  { %v3133_v63 = vmax.f32 %v3093_v22, 0.0 }
 0x60c   :  { %v3134_v44 = vmax.f32 %v3094_v55, 0.0  ;;  %v2738_v8 = vpop.f32.mrb[112].mxu0 }
 0x60d   :  { %v12177_v10 = vpack.c.bf16 %v3133_v63, %v3131_v41  ;;  %v9337_v14 = vadd.f32 %v12097_v26, %v2738_v8  ;;  %v2740_v16 = vpop.f32.mrb[113].mxu0 }
 0x60e   :  { %v9338_v9 = vadd.f32 %v12099_v46, %v2740_v16  ;;  %v2742_v17 = vpop.f32.mrb[114].mxu0  ;;  %v12181_v18 = vpack.c.bf16 %v3134_v44, %v3132_v4 }
 0x60f   :  { %v3095_v12 = vadd.f32 %v9337_v14, %v12151_v2  ;;  %v9339_v19 = vadd.f32 %v12101_v50, %v2742_v17  ;;  %v2744_v33 = vpop.f32.mrb[115].mxu0 }
 0x610   :  { %v3096_v34 = vadd.f32 %v9338_v9, %v12155_v6  ;;  %v9340_v35 = vadd.f32 %v12103_v52, %v2744_v33 }
 0x611   :  { %v3097_v36 = vadd.f32 %v9339_v19, %v12151_v2  ;;  %v3135_v26 = vmax.f32 %v3095_v12, 0.0 }
 0x612   :  { %v3098_v38 = vadd.f32 %v9340_v35, %v12155_v6  ;;  %v3136_v29 = vmax.f32 %v3096_v34, 0.0 }
 0x613   :  { %v3137_v0 = vmax.f32 %v3097_v36, 0.0 }
 0x614   :  { %v3138_v46 = vmax.f32 %v3098_v38, 0.0  ;;  %v2748_v39 = vpop.f32.mrb[116].mxu0 }
 0x615   :  { %v12189_v40 = vpack.c.bf16 %v3137_v0, %v3135_v26  ;;  %v9341_v45 = vadd.f32 %v12105_v5, %v2748_v39  ;;  %v2750_v42 = vpop.f32.mrb[117].mxu0 }
 0x616   :  { %v9342_v50 = vadd.f32 %v12107_v7, %v2750_v42  ;;  %v2752_v31 = vpop.f32.mrb[118].mxu0  ;;  %v12193_v54 = vpack.c.bf16 %v3138_v46, %v3136_v29 }
 0x617   :  { %v3099_v52 = vadd.f32 %v9341_v45, %v12151_v2  ;;  %v9343_v32 = vadd.f32 %v12109_v13, %v2752_v31  ;;  %v2754_v27 = vpop.f32.mrb[119].mxu0 }
 0x618   :  { %v3100_v3 = vadd.f32 %v9342_v50, %v12155_v6  ;;  %v9344_v20 = vadd.f32 %v12111_v15, %v2754_v27 }
 0x619   :  { %v3101_v21 = vadd.f32 %v9343_v32, %v12151_v2  ;;  %v3139_v5 = vmax.f32 %v3099_v52, 0.0 }
 0x61a   :  { %v3102_v22 = vadd.f32 %v9344_v20, %v12155_v6  ;;  %v3140_v41 = vmax.f32 %v3100_v3, 0.0 }
 0x61b   :  { %v3141_v55 = vmax.f32 %v3101_v21, 0.0 }
 0x61c   :  { %v3142_v7 = vmax.f32 %v3102_v22, 0.0  ;;  %v2758_v63 = vpop.f32.mrb[120].mxu0 }
 0x61d   :  { %v12201_v4 = vpack.c.bf16 %v3141_v55, %v3139_v5  ;;  %v9345_v44 = vadd.f32 %v12113_v43, %v2758_v63  ;;  %v2760_v8 = vpop.f32.mrb[121].mxu0 }
 0x61e   :  { %v9346_v13 = vadd.f32 %v12115_v58, %v2760_v8  ;;  %v2762_v14 = vpop.f32.mrb[122].mxu0  ;;  %v12205_v16 = vpack.c.bf16 %v3142_v7, %v3140_v41 }
 0x61f   :  { %v3103_v15 = vadd.f32 %v9345_v44, %v12151_v2  ;;  %v9347_v9 = vadd.f32 %v12117_v11, %v2762_v14  ;;  %v2764_v17 = vpop.f32.mrb[123].mxu0 }
 0x620   :  { %v3104_v12 = vadd.f32 %v9346_v13, %v12155_v6  ;;  %v9348_v19 = vadd.f32 %v12119_v28, %v2764_v17 }
 0x621   :  { %v3105_v33 = vadd.f32 %v9347_v9, %v12151_v2  ;;  %v3143_v43 = vmax.f32 %v3103_v15, 0.0 }
 0x622   :  { %v3106_v34 = vadd.f32 %v9348_v19, %v12155_v6  ;;  %v3144_v36 = vmax.f32 %v3104_v12, 0.0 }
 0x623   :  { %v3145_v35 = vmax.f32 %v3105_v33, 0.0 }
 0x624   :  { %v3146_v58 = vmax.f32 %v3106_v34, 0.0  ;;  %v2768_v38 = vpop.f32.mrb[124].mxu0 }
 0x625   :  { %v12213_v26 = vpack.c.bf16 %v3145_v35, %v3143_v43  ;;  %v9349_v0 = vadd.f32 %v12121_v23, %v2768_v38  ;;  %v2770_v29 = vpop.f32.mrb[125].mxu0 }
 0x626   :  { %v9350_v11 = vadd.f32 %v12123_v24, %v2770_v29  ;;  %v2772_v46 = vpop.f32.mrb[126].mxu0  ;;  %v12217_v39 = vpack.c.bf16 %v3146_v58, %v3144_v36 }
 0x627   :  { %v3107_v28 = vadd.f32 %v9349_v0, %v12151_v2  ;;  %v9351_v45 = vadd.f32 %v12125_v25, %v2772_v46  ;;  %v2774_v42 = vpop.f32.mrb[127].mxu0 }
 0x628   :  { %v3108_v50 = vadd.f32 %v9350_v11, %v12155_v6  ;;  %v9352_v31 = vadd.f32 %v12127_v37, %v2774_v42 }
 0x629   :  { %v3109_v52 = vadd.f32 %v9351_v45, %v12151_v2  ;;  %v3147_v23 = vmax.f32 %v3107_v28, 0.0 }
 0x62a   :  { %v3110_v32 = vadd.f32 %v9352_v31, %v12155_v6  ;;  %v3148_v3 = vmax.f32 %v3108_v50, 0.0 }
 0x62b   :  { %v3149_v27 = vmax.f32 %v3109_v52, 0.0 }
 0x62c   :  { %v3150_v24 = vmax.f32 %v3110_v32, 0.0  ;;  %v2778_v20 = vpop.f32.mrb[128].mxu0 }
 0x62d   :  { %v12225_v21 = vpack.c.bf16 %v3149_v27, %v3147_v23  ;;  %v9353_v22 = vadd.f32 %v12129_v47, %v2778_v20  ;;  %v2780_v5 = vpop.f32.mrb[129].mxu0 }
 0x62e   :  { %v9354_v25 = vadd.f32 %v12131_v49, %v2780_v5  ;;  %v2782_v55 = vpop.f32.mrb[130].mxu0  ;;  %v12229_v41 = vpack.c.bf16 %v3150_v24, %v3148_v3 }
 0x62f   :  { %v3111_v37 = vadd.f32 %v9353_v22, %v12151_v2  ;;  %v9355_v7 = vadd.f32 %v12133_v51, %v2782_v55  ;;  %v2784_v63 = vpop.f32.mrb[131].mxu0 }
 0x630   :  { %v3112_v44 = vadd.f32 %v9354_v25, %v12155_v6  ;;  %v9356_v8 = vadd.f32 %v12135_v53, %v2784_v63 }
 0x631   :  { %v3113_v13 = vadd.f32 %v9355_v7, %v12151_v2  ;;  %v3151_v47 = vmax.f32 %v3111_v37, 0.0 }
 0x632   :  { %v3114_v14 = vadd.f32 %v9356_v8, %v12155_v6  ;;  %v3152_v9 = vmax.f32 %v3112_v44, 0.0 }
 0x633   :  { %v3153_v15 = vmax.f32 %v3113_v13, 0.0 }
 0x634   :  { %v3154_v49 = vmax.f32 %v3114_v14, 0.0  ;;  %v2788_v17 = vpop.f32.mrb[132].mxu0 }
 0x635   :  { %v12237_v12 = vpack.c.bf16 %v3153_v15, %v3151_v47  ;;  %v9357_v19 = vadd.f32 %v12139_v57, %v2788_v17  ;;  %v2790_v33 = vpop.f32.mrb[133].mxu0 }
 0x636   :  { %v9358_v51 = vadd.f32 %v12141_v59, %v2790_v33  ;;  %v2792_v34 = vpop.f32.mrb[134].mxu0  ;;  %v12241_v43 = vpack.c.bf16 %v3154_v49, %v3152_v9  ;;  %v10108_v33 = vld [vmem:[#allocation9 + $0x24] ss:$16 sps:$4 sm:$0xff]  }
 0x637   :  { %v3115_v53 = vadd.f32 %v9357_v19, %v12151_v2  ;;  %v9359_v35 = vadd.f32 %v12143_v60, %v2792_v34  ;;  %v2794_v36 = vpop.f32.mrb[135].mxu0  ;;  %v10103_v19 = vld [vmem:[#allocation9] ss:$16 sps:$4 sm:$0xff]   ;;  %v10114_v34 = vld [vmem:[#allocation9 + $0x64] ss:$16 sps:$4 sm:$0xff]  }
 0x638   :  { %v3116_v58 = vadd.f32 %v9358_v51, %v12155_v6  ;;  %v9360_v38 = vadd.f32 %v12145_v61, %v2794_v36  ;;  %v10106_v51 = vld [vmem:[#allocation9 + $0x20] ss:$16 sps:$4 sm:$0xff]  }
 0x639   :  { %v3117_v0 = vadd.f32 %v9359_v35, %v12151_v2  ;;  %v3155_v57 = vmax.f32 %v3115_v53, 0.0  ;;  %v10112_v53 = vld [vmem:[#allocation9 + $0x60] ss:$16 sps:$4 sm:$0xff]   ;;  %v10117_v35 = vld [vmem:[#allocation9 + $0x84] ss:$16 sps:$4 sm:$0xff]  }
 0x63a   :  { %v3118_v29 = vadd.f32 %v9360_v38, %v12155_v6  ;;  %v3156_v46 = vmax.f32 %v3116_v58, 0.0  ;;  %v10115_v36 = vld [vmem:[#allocation9 + $0x80] ss:$16 sps:$4 sm:$0xff]   ;;  %v10120_v58 = vld [vmem:[#allocation9 + $0xa4] ss:$16 sps:$4 sm:$0xff]  }
 0x63b   :  { %v3157_v11 = vmax.f32 %v3117_v0, 0.0  ;;  %v10118_v38 = vld [vmem:[#allocation9 + $0xa0] ss:$16 sps:$4 sm:$0xff]   ;;  %v10123_v0 = vld [vmem:[#allocation9 + $0xc4] ss:$16 sps:$4 sm:$0xff]  }
 0x63c   :  { %v3158_v59 = vmax.f32 %v3118_v29, 0.0  ;;  %v2928_v28 = vpop.f32.mrb[96].mxu0  ;;  %v10121_v29 = vld [vmem:[#allocation9 + $0xc0] ss:$16 sps:$4 sm:$0xff]  }
 0x63d   :  { %v12249_v45 = vpack.c.bf16 %v3157_v11, %v3155_v57  ;;  %v3079_v42 = vadd.f32 %v12151_v2, %v2928_v28  ;;  %v2930_v50 = vpop.f32.mrb[97].mxu0  ;;  %v10126_v57 = vld [vmem:[#allocation9 + $0xe4] ss:$16 sps:$4 sm:$0xff]   ;;  %v10124_v11 = vld [vmem:[#allocation9 + $0xe0] ss:$16 sps:$4 sm:$0xff]  }
 0x63e   :  { %v3080_v60 = vadd.f32 %v12155_v6, %v2930_v50  ;;  %v2932_v31 = vpop.f32.mrb[98].mxu0  ;;  %v12253_v52 = vpack.c.bf16 %v3158_v59, %v3156_v46  ;;  %v10129_v46 = vld [vmem:[#allocation9 + $0x104] ss:$16 sps:$4 sm:$0xff]   ;;  %v10127_v59 = vld [vmem:[#allocation9 + $0x100] ss:$16 sps:$4 sm:$0xff]  }
 0x63f   :  { %v3081_v61 = vadd.f32 %v12151_v2, %v2932_v31  ;;  %v2934_v32 = vpop.f32.mrb[99].mxu0  ;;  %v3119_v27 = vmax.f32 %v3079_v42, 0.0  ;;  %v10132_v28 = vld [vmem:[#allocation9 + $0x124] ss:$16 sps:$4 sm:$0xff]   ;;  %v10130_v42 = vld [vmem:[#allocation9 + $0x120] ss:$16 sps:$4 sm:$0xff]  }
 0x640   :  { %v3082_v23 = vadd.f32 %v12155_v6, %v2934_v32  ;;  %v3120_v24 = vmax.f32 %v3080_v60, 0.0  ;;  %v10135_v50 = vld [vmem:[#allocation9 + $0x144] ss:$16 sps:$4 sm:$0xff]   ;;  %v10133_v60 = vld [vmem:[#allocation9 + $0x140] ss:$16 sps:$4 sm:$0xff]  }
 0x641   :  { %v3121_v3 = vmax.f32 %v3081_v61, 0.0  ;;  %v10138_v31 = vld [vmem:[#allocation9 + $0x164] ss:$16 sps:$4 sm:$0xff]   ;;  %v10136_v61 = vld [vmem:[#allocation9 + $0x160] ss:$16 sps:$4 sm:$0xff]  }
 0x642   :  { %v3122_v20 = vmax.f32 %v3082_v23, 0.0  ;;  %v10141_v32 = vld [vmem:[#allocation9 + $0x184] ss:$16 sps:$4 sm:$0xff]   ;;  %v10139_v23 = vld [vmem:[#allocation9 + $0x180] ss:$16 sps:$4 sm:$0xff]  }
 0x643   :  { %v12257_v22 = vpack.c.bf16 %v3121_v3, %v3119_v27  ;;  %v10144_v27 = vld [vmem:[#allocation9 + $0x1a4] ss:$16 sps:$4 sm:$0xff]   ;;  %v10142_v3 = vld [vmem:[#allocation9 + $0x1a0] ss:$16 sps:$4 sm:$0xff]  }
 0x644   :  { %v12259_v5 = vpack.c.bf16 %v3122_v20, %v3120_v24  ;;  %v2938_v25 = vpop.f32.mrb[100].mxu0  ;;  %v10147_v24 = vld [vmem:[#allocation9 + $0x1c4] ss:$16 sps:$4 sm:$0xff]   ;;  %v10145_v20 = vld [vmem:[#allocation9 + $0x1c0] ss:$16 sps:$4 sm:$0xff]  }
 0x645   :  { %v3083_v55 = vadd.f32 %v12151_v2, %v2938_v25  ;;  %v2940_v37 = vpop.f32.mrb[101].mxu0  ;;  %v10150_v25 = vld [vmem:[#allocation9 + $0x1e4] ss:$16 sps:$4 sm:$0xff]  }
 0x646   :  { %v3084_v7 = vadd.f32 %v12155_v6, %v2940_v37  ;;  %v2942_v63 = vpop.f32.mrb[102].mxu0  ;;  %v10153_v37 = vld [vmem:[#allocation9 + $0xc] ss:$16 sps:$4 sm:$0xff]  }
 0x647   :  { %v3085_v44 = vadd.f32 %v12151_v2, %v2942_v63  ;;  %v2944_v8 = vpop.f32.mrb[103].mxu0  ;;  %v3123_v14 = vmax.f32 %v3083_v55, 0.0  ;;  %v10111_v2 = vld [vmem:[#allocation9 + $0x44] ss:$16 sps:$4 sm:$0xff]   ;;  %v10148_v55 = vld [vmem:[#allocation9 + $0x1e0] ss:$16 sps:$4 sm:$0xff]  }
 0x648   :  { %v3086_v13 = vadd.f32 %v12155_v6, %v2944_v8  ;;  %v3124_v15 = vmax.f32 %v3084_v7, 0.0  ;;  %v10109_v6 = vld [vmem:[#allocation9 + $0x40] ss:$16 sps:$4 sm:$0xff]   ;;  %v10151_v7 = vld [vmem:[#allocation9 + $0x8] ss:$16 sps:$4 sm:$0xff]  }
 0x649   :  { %v3125_v47 = vmax.f32 %v3085_v44, 0.0  ;;  %v10156_v63 = vld [vmem:[#allocation9 + $0x2c] ss:$16 sps:$4 sm:$0xff]   ;;  %v10154_v44 = vld [vmem:[#allocation9 + $0x28] ss:$16 sps:$4 sm:$0xff]  }
 0x64a   :  { %v3126_v9 = vmax.f32 %v3086_v13, 0.0  ;;  %v10159_v8 = vld [vmem:[#allocation9 + $0x4c] ss:$16 sps:$4 sm:$0xff]   ;;  %v10157_v13 = vld [vmem:[#allocation9 + $0x48] ss:$16 sps:$4 sm:$0xff]  }
 0x64b   :  { %v3161_v49 = vpack.c.bf16 %v3125_v47, %v3123_v14  ;;  %v10162_v14 = vld [vmem:[#allocation9 + $0x6c] ss:$16 sps:$4 sm:$0xff]   ;;  %v10160_v47 = vld [vmem:[#allocation9 + $0x68] ss:$16 sps:$4 sm:$0xff]  }
 0x64c   :  { %v3162_v17 = vpack.c.bf16 %v3126_v9, %v3124_v15  ;;  %v10165_v15 = vld [vmem:[#allocation9 + $0x8c] ss:$16 sps:$4 sm:$0xff]   ;;  %v10163_v9 = vld [vmem:[#allocation9 + $0x88] ss:$16 sps:$4 sm:$0xff]  }
 0x64e   :  { %3660 = vmatprep.mubr.bf16.mxu0 %v3162_v17  ;;  %3703 = vmatprep.mubr.bf16.mxu1 %v3162_v17  ;;  %v10166_v17 = vld [vmem:[#allocation9 + $0xa8] ss:$16 sps:$4 sm:$0xff]  }
 0x64f   :  { %3661 = vmatmul.mubr.bf16.vlgmr.msra.gmra.mrb[136].mxu0 %v3161_v49  ;;  %3704 = vmatmul.mubr.bf16.vlgmr.msra.gmra.mrb[32].mxu1 %v3161_v49  ;;  %v10168_v49 = vld [vmem:[#allocation9 + $0xac] ss:$16 sps:$4 sm:$0xff]  }
 0x650   :  { %4035 = vmatpush1.bf16.msra.mxu1 %v10103_v19  ;;  %4066 = vmatprep.mubr.bf16.mxu1 %v12259_v5  ;;  %v10171_v19 = vld [vmem:[#allocation9 + $0xcc] ss:$16 sps:$4 sm:$0xff]  }
 0x651   :  { %4036 = vmatprep.subr.bf16.mxu1 %v10108_v33  ;;  %v10174_v33 = vld [vmem:[#allocation9 + $0xec] ss:$16 sps:$4 sm:$0xff]  }
 0x654   :  { %4037 = vmatpush1.bf16.msra.mxu1 %v10106_v51  ;;  %v10172_v51 = vld [vmem:[#allocation9 + $0xe8] ss:$16 sps:$4 sm:$0xff]  }
 0x655   :  { %4038 = vmatprep.subr.bf16.mxu1 %v10111_v2  ;;  %v10177_v2 = vld [vmem:[#allocation9 + $0x10c] ss:$16 sps:$4 sm:$0xff]  }
 0x658   :  { %4039 = vmatpush1.bf16.msra.mxu1 %v10109_v6  ;;  %v10175_v6 = vld [vmem:[#allocation9 + $0x108] ss:$16 sps:$4 sm:$0xff]  }
 0x659   :  { %4040 = vmatprep.subr.bf16.mxu1 %v10114_v34  ;;  %v10180_v34 = vld [vmem:[#allocation9 + $0x12c] ss:$16 sps:$4 sm:$0xff]  }
 0x65c   :  { %4041 = vmatpush1.bf16.msra.mxu1 %v10112_v53  ;;  %v10178_v53 = vld [vmem:[#allocation9 + $0x128] ss:$16 sps:$4 sm:$0xff]  }
 0x65d   :  { %4042 = vmatprep.subr.bf16.mxu1 %v10117_v35  ;;  %v10183_v35 = vld [vmem:[#allocation9 + $0x14c] ss:$16 sps:$4 sm:$0xff]  }
 0x660   :  { %4043 = vmatpush1.bf16.msra.mxu1 %v10115_v36  ;;  %v10181_v36 = vld [vmem:[#allocation9 + $0x148] ss:$16 sps:$4 sm:$0xff]  }
 0x661   :  { %4044 = vmatprep.subr.bf16.mxu1 %v10120_v58  ;;  %v10186_v58 = vld [vmem:[#allocation9 + $0x16c] ss:$16 sps:$4 sm:$0xff]  }
 0x664   :  { %4045 = vmatpush1.bf16.msra.mxu1 %v10118_v38  ;;  %v10184_v38 = vld [vmem:[#allocation9 + $0x168] ss:$16 sps:$4 sm:$0xff]  }
 0x665   :  { %4046 = vmatprep.subr.bf16.mxu1 %v10123_v0  ;;  %v10189_v0 = vld [vmem:[#allocation9 + $0x18c] ss:$16 sps:$4 sm:$0xff]  }
 0x668   :  { %4047 = vmatpush1.bf16.msra.mxu1 %v10121_v29  ;;  %v10187_v29 = vld [vmem:[#allocation9 + $0x188] ss:$16 sps:$4 sm:$0xff]  }
 0x669   :  { %4048 = vmatprep.subr.bf16.mxu1 %v10126_v57  ;;  %v10192_v57 = vld [vmem:[#allocation9 + $0x1ac] ss:$16 sps:$4 sm:$0xff]  }
 0x66c   :  { %4049 = vmatpush1.bf16.msra.mxu1 %v10124_v11  ;;  %v10190_v11 = vld [vmem:[#allocation9 + $0x1a8] ss:$16 sps:$4 sm:$0xff]  }
 0x66d   :  { %4050 = vmatprep.subr.bf16.mxu1 %v10129_v46  ;;  %v10195_v46 = vld [vmem:[#allocation9 + $0x1cc] ss:$16 sps:$4 sm:$0xff]  }
 0x670   :  { %4051 = vmatpush1.bf16.msra.mxu1 %v10127_v59  ;;  %v10193_v59 = vld [vmem:[#allocation9 + $0x1c8] ss:$16 sps:$4 sm:$0xff]  }
 0x671   :  { %4052 = vmatprep.subr.bf16.mxu1 %v10132_v28  ;;  %v10198_v28 = vld [vmem:[#allocation9 + $0x1ec] ss:$16 sps:$4 sm:$0xff]  }
 0x674   :  { %4053 = vmatpush1.bf16.msra.mxu1 %v10130_v42  ;;  %v10196_v42 = vld [vmem:[#allocation9 + $0x1e8] ss:$16 sps:$4 sm:$0xff]  }
 0x675   :  { %4054 = vmatprep.subr.bf16.mxu1 %v10135_v50  ;;  %v10201_v50 = vld [vmem:[#allocation9 + $0x404] ss:$16 sps:$4 sm:$0xff]  }
 0x678   :  { %4055 = vmatpush1.bf16.msra.mxu1 %v10133_v60  ;;  %v10199_v60 = vld [vmem:[#allocation9 + $0x400] ss:$16 sps:$4 sm:$0xff]  }
 0x679   :  { %4056 = vmatprep.subr.bf16.mxu1 %v10138_v31  ;;  %v10204_v31 = vld [vmem:[#allocation9 + $0x424] ss:$16 sps:$4 sm:$0xff]  }
 0x67c   :  { %4057 = vmatpush1.bf16.msra.mxu1 %v10136_v61  ;;  %v10202_v61 = vld [vmem:[#allocation9 + $0x420] ss:$16 sps:$4 sm:$0xff]  }
 0x67d   :  { %4058 = vmatprep.subr.bf16.mxu1 %v10141_v32  ;;  %v10207_v32 = vld [vmem:[#allocation9 + $0x444] ss:$16 sps:$4 sm:$0xff]  }
 0x680   :  { %4059 = vmatpush1.bf16.msra.mxu1 %v10139_v23  ;;  %v10205_v23 = vld [vmem:[#allocation9 + $0x440] ss:$16 sps:$4 sm:$0xff]  }
 0x681   :  { %4060 = vmatprep.subr.bf16.mxu1 %v10144_v27  ;;  %v10210_v27 = vld [vmem:[#allocation9 + $0x464] ss:$16 sps:$4 sm:$0xff]  }
 0x684   :  { %4061 = vmatpush1.bf16.msra.mxu1 %v10142_v3  ;;  %v10208_v3 = vld [vmem:[#allocation9 + $0x460] ss:$16 sps:$4 sm:$0xff]  }
 0x685   :  { %4062 = vmatprep.subr.bf16.mxu1 %v10147_v24  ;;  %v10213_v24 = vld [vmem:[#allocation9 + $0x484] ss:$16 sps:$4 sm:$0xff]  }
 0x688   :  { %4063 = vmatpush1.bf16.msra.mxu1 %v10145_v20  ;;  %v10211_v20 = vld [vmem:[#allocation9 + $0x480] ss:$16 sps:$4 sm:$0xff]  }
 0x689   :  { %4064 = vmatprep.subr.bf16.mxu1 %v10150_v25  ;;  %v10216_v25 = vld [vmem:[#allocation9 + $0x4a4] ss:$16 sps:$4 sm:$0xff]  }
 0x68c   :  { %4065 = vmatpush1.bf16.msra.mxu1 %v10148_v55  ;;  %v10219_v55 = vld [vmem:[#allocation9 + $0x4c4] ss:$16 sps:$4 sm:$0xff]  }
 0x68d   :  { %4077 = vmatprep.subr.bf16.mxu1 %v10153_v37  ;;  %v10217_v37 = vld [vmem:[#allocation9 + $0x4c0] ss:$16 sps:$4 sm:$0xff]  }
 0x68f   :  { %4067 = vmatmul.mubr.bf16.vlgmr.msra.gmra.mrb[36].mxu1 %v12257_v22 }
 0x690   :  { %4078 = vmatpush1.bf16.msra.mxu1 %v10151_v7  ;;  %4109 = vmatprep.mubr.bf16.mxu1 %v12259_v5  ;;  %v10169_v5 = vld [vmem:[#allocation9 + $0xc8] ss:$16 sps:$4 sm:$0xff]   ;;  %v10222_v7 = vld [vmem:[#allocation9 + $0x4e4] ss:$16 sps:$4 sm:$0xff]  }
 0x691   :  { %4079 = vmatprep.subr.bf16.mxu1 %v10156_v63  ;;  %v10220_v63 = vld [vmem:[#allocation9 + $0x4e0] ss:$16 sps:$4 sm:$0xff]  }
 0x694   :  { %4080 = vmatpush1.bf16.msra.mxu1 %v10154_v44  ;;  %v10225_v44 = vld [vmem:[#allocation9 + $0x504] ss:$16 sps:$4 sm:$0xff]  }
 0x695   :  { %4081 = vmatprep.subr.bf16.mxu1 %v10159_v8  ;;  %v10223_v8 = vld [vmem:[#allocation9 + $0x500] ss:$16 sps:$4 sm:$0xff]  }
 0x698   :  { %4082 = vmatpush1.bf16.msra.mxu1 %v10157_v13  ;;  %v10228_v13 = vld [vmem:[#allocation9 + $0x524] ss:$16 sps:$4 sm:$0xff]  }
 0x699   :  { %4083 = vmatprep.subr.bf16.mxu1 %v10162_v14  ;;  %v10226_v14 = vld [vmem:[#allocation9 + $0x520] ss:$16 sps:$4 sm:$0xff]  }
 0x69c   :  { %4084 = vmatpush1.bf16.msra.mxu1 %v10160_v47  ;;  %v10231_v47 = vld [vmem:[#allocation9 + $0x544] ss:$16 sps:$4 sm:$0xff]  }
 0x69d   :  { %4085 = vmatprep.subr.bf16.mxu1 %v10165_v15  ;;  %v10229_v15 = vld [vmem:[#allocation9 + $0x540] ss:$16 sps:$4 sm:$0xff]  }
 0x6a0   :  { %4086 = vmatpush1.bf16.msra.mxu1 %v10163_v9  ;;  %v10234_v9 = vld [vmem:[#allocation9 + $0x564] ss:$16 sps:$4 sm:$0xff]  }
 0x6a1   :  { %4087 = vmatprep.subr.bf16.mxu1 %v10168_v49  ;;  %v10232_v49 = vld [vmem:[#allocation9 + $0x560] ss:$16 sps:$4 sm:$0xff]  }
 0x6a4   :  { %4088 = vmatpush1.bf16.msra.mxu1 %v10166_v17  ;;  %v10237_v17 = vld [vmem:[#allocation9 + $0x584] ss:$16 sps:$4 sm:$0xff]  }
 0x6a5   :  { %4089 = vmatprep.subr.bf16.mxu1 %v10171_v19  ;;  %v10235_v19 = vld [vmem:[#allocation9 + $0x580] ss:$16 sps:$4 sm:$0xff]  }
 0x6a8   :  { %4090 = vmatpush1.bf16.msra.mxu1 %v10169_v5  ;;  %v10240_v5 = vld [vmem:[#allocation9 + $0x5a4] ss:$16 sps:$4 sm:$0xff]  }
 0x6a9   :  { %4091 = vmatprep.subr.bf16.mxu1 %v10174_v33  ;;  %v10238_v33 = vld [vmem:[#allocation9 + $0x5a0] ss:$16 sps:$4 sm:$0xff]  }
 0x6ac   :  { %4092 = vmatpush1.bf16.msra.mxu1 %v10172_v51  ;;  %v10243_v51 = vld [vmem:[#allocation9 + $0x5c4] ss:$16 sps:$4 sm:$0xff]  }
 0x6ad   :  { %4093 = vmatprep.subr.bf16.mxu1 %v10177_v2  ;;  %v10241_v2 = vld [vmem:[#allocation9 + $0x5c0] ss:$16 sps:$4 sm:$0xff]  }
 0x6b0   :  { %4094 = vmatpush1.bf16.msra.mxu1 %v10175_v6  ;;  %v10246_v6 = vld [vmem:[#allocation9 + $0x5e4] ss:$16 sps:$4 sm:$0xff]  }
 0x6b1   :  { %4095 = vmatprep.subr.bf16.mxu1 %v10180_v34  ;;  %v10244_v34 = vld [vmem:[#allocation9 + $0x5e0] ss:$16 sps:$4 sm:$0xff]  }
 0x6b4   :  { %4096 = vmatpush1.bf16.msra.mxu1 %v10178_v53  ;;  %v10249_v53 = vld [vmem:[#allocation9 + $0x40c] ss:$16 sps:$4 sm:$0xff]  }
 0x6b5   :  { %4097 = vmatprep.subr.bf16.mxu1 %v10183_v35  ;;  %v10247_v35 = vld [vmem:[#allocation9 + $0x408] ss:$16 sps:$4 sm:$0xff]  }
 0x6b8   :  { %4098 = vmatpush1.bf16.msra.mxu1 %v10181_v36  ;;  %v10252_v36 = vld [vmem:[#allocation9 + $0x42c] ss:$16 sps:$4 sm:$0xff]  }
 0x6b9   :  { %4099 = vmatprep.subr.bf16.mxu1 %v10186_v58  ;;  %v10250_v58 = vld [vmem:[#allocation9 + $0x428] ss:$16 sps:$4 sm:$0xff]  }
 0x6bc   :  { %4100 = vmatpush1.bf16.msra.mxu1 %v10184_v38  ;;  %v10255_v38 = vld [vmem:[#allocation9 + $0x44c] ss:$16 sps:$4 sm:$0xff]  }
 0x6bd   :  { %4101 = vmatprep.subr.bf16.mxu1 %v10189_v0  ;;  %v10253_v0 = vld [vmem:[#allocation9 + $0x448] ss:$16 sps:$4 sm:$0xff]  }
 0x6c0   :  { %4102 = vmatpush1.bf16.msra.mxu1 %v10187_v29  ;;  %v10258_v29 = vld [vmem:[#allocation9 + $0x46c] ss:$16 sps:$4 sm:$0xff]  }
 0x6c1   :  { %4103 = vmatprep.subr.bf16.mxu1 %v10192_v57  ;;  %v10256_v57 = vld [vmem:[#allocation9 + $0x468] ss:$16 sps:$4 sm:$0xff]  }
 0x6c4   :  { %4104 = vmatpush1.bf16.msra.mxu1 %v10190_v11  ;;  %v10261_v11 = vld [vmem:[#allocation9 + $0x48c] ss:$16 sps:$4 sm:$0xff]  }
 0x6c5   :  { %4105 = vmatprep.subr.bf16.mxu1 %v10195_v46  ;;  %v10259_v46 = vld [vmem:[#allocation9 + $0x488] ss:$16 sps:$4 sm:$0xff]  }
 0x6c8   :  { %4106 = vmatpush1.bf16.msra.mxu1 %v10193_v59  ;;  %v10264_v59 = vld [vmem:[#allocation9 + $0x4ac] ss:$16 sps:$4 sm:$0xff]  }
 0x6c9   :  { %4107 = vmatprep.subr.bf16.mxu1 %v10198_v28  ;;  %v10262_v28 = vld [vmem:[#allocation9 + $0x4a8] ss:$16 sps:$4 sm:$0xff]  }
 0x6cc   :  { %4108 = vmatpush1.bf16.msra.mxu1 %v10196_v42  ;;  %v10267_v42 = vld [vmem:[#allocation9 + $0x4cc] ss:$16 sps:$4 sm:$0xff]  }
 0x6cd   :  { %4505 = vmatprep.subr.bf16.mxu1 %v10201_v50 }
 0x6cf   :  { %4110 = vmatmul.mubr.bf16.vlgmr.msra.gmra.mrb[32].mxu1 %v12257_v22  ;;  %v10214_v22 = vld [vmem:[#allocation9 + $0x4a0] ss:$16 sps:$4 sm:$0xff]  }
 0x6d0   :  { %4506 = vmatpush1.bf16.msra.mxu1 %v10199_v60  ;;  %4537 = vmatprep.mubr.bf16.mxu1 %v12169_v48 }
 0x6d1   :  { %4507 = vmatprep.subr.bf16.mxu1 %v10204_v31  ;;  %v10265_v31 = vld [vmem:[#allocation9 + $0x4c8] ss:$16 sps:$4 sm:$0xff]  }
 0x6d4   :  { %4508 = vmatpush1.bf16.msra.mxu1 %v10202_v61 }
 0x6d5   :  { %4509 = vmatprep.subr.bf16.mxu1 %v10207_v32  ;;  %v10270_v32 = vld [vmem:[#allocation9 + $0x4ec] ss:$16 sps:$4 sm:$0xff]  }
 0x6d8   :  { %4510 = vmatpush1.bf16.msra.mxu1 %v10205_v23  ;;  %v10268_v23 = vld [vmem:[#allocation9 + $0x4e8] ss:$16 sps:$4 sm:$0xff]  }
 0x6d9   :  { %4511 = vmatprep.subr.bf16.mxu1 %v10210_v27  ;;  %v10273_v27 = vld [vmem:[#allocation9 + $0x50c] ss:$16 sps:$4 sm:$0xff]  }
 0x6dc   :  { %4512 = vmatpush1.bf16.msra.mxu1 %v10208_v3  ;;  %v10271_v3 = vld [vmem:[#allocation9 + $0x508] ss:$16 sps:$4 sm:$0xff]  }
 0x6dd   :  { %4513 = vmatprep.subr.bf16.mxu1 %v10213_v24  ;;  %v10276_v24 = vld [vmem:[#allocation9 + $0x52c] ss:$16 sps:$4 sm:$0xff]  }
 0x6e0   :  { %4514 = vmatpush1.bf16.msra.mxu1 %v10211_v20  ;;  %v10274_v20 = vld [vmem:[#allocation9 + $0x528] ss:$16 sps:$4 sm:$0xff]  }
 0x6e1   :  { %4515 = vmatprep.subr.bf16.mxu1 %v10216_v25  ;;  %v10279_v25 = vld [vmem:[#allocation9 + $0x54c] ss:$16 sps:$4 sm:$0xff]  }
 0x6e4   :  { %4516 = vmatpush1.bf16.msra.mxu1 %v10214_v22  ;;  %v10277_v22 = vld [vmem:[#allocation9 + $0x548] ss:$16 sps:$4 sm:$0xff]  }
 0x6e5   :  { %4517 = vmatprep.subr.bf16.mxu1 %v10219_v55  ;;  %v10282_v55 = vld [vmem:[#allocation9 + $0x56c] ss:$16 sps:$4 sm:$0xff]  }
 0x6e8   :  { %4518 = vmatpush1.bf16.msra.mxu1 %v10217_v37  ;;  %v10280_v37 = vld [vmem:[#allocation9 + $0x568] ss:$16 sps:$4 sm:$0xff]  }
 0x6e9   :  { %4519 = vmatprep.subr.bf16.mxu1 %v10222_v7  ;;  %v10285_v7 = vld [vmem:[#allocation9 + $0x58c] ss:$16 sps:$4 sm:$0xff]  }
 0x6ec   :  { %4520 = vmatpush1.bf16.msra.mxu1 %v10220_v63  ;;  %v10283_v63 = vld [vmem:[#allocation9 + $0x588] ss:$16 sps:$4 sm:$0xff]  }
 0x6ed   :  { %4521 = vmatprep.subr.bf16.mxu1 %v10225_v44  ;;  %v10288_v44 = vld [vmem:[#allocation9 + $0x5ac] ss:$16 sps:$4 sm:$0xff]  }
 0x6f0   :  { %4522 = vmatpush1.bf16.msra.mxu1 %v10223_v8  ;;  %v10286_v8 = vld [vmem:[#allocation9 + $0x5a8] ss:$16 sps:$4 sm:$0xff]  }
 0x6f1   :  { %4523 = vmatprep.subr.bf16.mxu1 %v10228_v13  ;;  %v10291_v13 = vld [vmem:[#allocation9 + $0x5cc] ss:$16 sps:$4 sm:$0xff]  }
 0x6f4   :  { %4524 = vmatpush1.bf16.msra.mxu1 %v10226_v14  ;;  %v10289_v14 = vld [vmem:[#allocation9 + $0x5c8] ss:$16 sps:$4 sm:$0xff]  }
 0x6f5   :  { %4525 = vmatprep.subr.bf16.mxu1 %v10231_v47  ;;  %v10294_v47 = vld [vmem:[#allocation9 + $0x5ec] ss:$16 sps:$4 sm:$0xff]  }
 0x6f8   :  { %4526 = vmatpush1.bf16.msra.mxu1 %v10229_v15  ;;  %v10292_v15 = vld [vmem:[#allocation9 + $0x5e8] ss:$16 sps:$4 sm:$0xff]  }
 0x6f9   :  { %4527 = vmatprep.subr.bf16.mxu1 %v10234_v9  ;;  %v10297_v9 = vld [vmem:[#allocation9 + $0x604] ss:$16 sps:$4 sm:$0xff]  }
 0x6fc   :  { %4528 = vmatpush1.bf16.msra.mxu1 %v10232_v49  ;;  %v10295_v49 = vld [vmem:[#allocation9 + $0x600] ss:$16 sps:$4 sm:$0xff]  }
 0x6fd   :  { %4529 = vmatprep.subr.bf16.mxu1 %v10237_v17  ;;  %v10300_v17 = vld [vmem:[#allocation9 + $0x624] ss:$16 sps:$4 sm:$0xff]  }
 0x700   :  { %4530 = vmatpush1.bf16.msra.mxu1 %v10235_v19  ;;  %v10298_v19 = vld [vmem:[#allocation9 + $0x620] ss:$16 sps:$4 sm:$0xff]  }
 0x701   :  { %4531 = vmatprep.subr.bf16.mxu1 %v10240_v5  ;;  %v10303_v5 = vld [vmem:[#allocation9 + $0x644] ss:$16 sps:$4 sm:$0xff]  }
 0x704   :  { %4532 = vmatpush1.bf16.msra.mxu1 %v10238_v33  ;;  %v10301_v33 = vld [vmem:[#allocation9 + $0x640] ss:$16 sps:$4 sm:$0xff]  }
 0x705   :  { %4533 = vmatprep.subr.bf16.mxu1 %v10243_v51  ;;  %v10306_v51 = vld [vmem:[#allocation9 + $0x664] ss:$16 sps:$4 sm:$0xff]  }
 0x708   :  { %4534 = vmatpush1.bf16.msra.mxu1 %v10241_v2  ;;  %v10304_v2 = vld [vmem:[#allocation9 + $0x660] ss:$16 sps:$4 sm:$0xff]  }
 0x709   :  { %4535 = vmatprep.subr.bf16.mxu1 %v10246_v6  ;;  %v10309_v6 = vld [vmem:[#allocation9 + $0x684] ss:$16 sps:$4 sm:$0xff]  }
 0x70c   :  { %4536 = vmatpush1.bf16.msra.mxu1 %v10244_v34  ;;  %v10307_v34 = vld [vmem:[#allocation9 + $0x680] ss:$16 sps:$4 sm:$0xff]  }
 0x70d   :  { %4548 = vmatprep.subr.bf16.mxu1 %v10249_v53  ;;  %v10312_v53 = vld [vmem:[#allocation9 + $0x6a4] ss:$16 sps:$4 sm:$0xff]  }
 0x70f   :  { %4538 = vmatmul.mubr.bf16.vlgmr.msra.gmra.mrb[36].mxu1 %v12165_v30 }
 0x710   :  { %4549 = vmatpush1.bf16.msra.mxu1 %v10247_v35  ;;  %4580 = vmatprep.mubr.bf16.mxu1 %v12169_v48  ;;  %v10315_v35 = vld [vmem:[#allocation9 + $0x6c4] ss:$16 sps:$4 sm:$0xff]  }
 0x711   :  { %4550 = vmatprep.subr.bf16.mxu1 %v10252_v36  ;;  %v10313_v36 = vld [vmem:[#allocation9 + $0x6c0] ss:$16 sps:$4 sm:$0xff]  }
 0x714   :  { %4551 = vmatpush1.bf16.msra.mxu1 %v10250_v58  ;;  %v10318_v58 = vld [vmem:[#allocation9 + $0x6e4] ss:$16 sps:$4 sm:$0xff]  }
 0x715   :  { %4552 = vmatprep.subr.bf16.mxu1 %v10255_v38  ;;  %v10316_v38 = vld [vmem:[#allocation9 + $0x6e0] ss:$16 sps:$4 sm:$0xff]  }
 0x718   :  { %4553 = vmatpush1.bf16.msra.mxu1 %v10253_v0  ;;  %v10321_v0 = vld [vmem:[#allocation9 + $0x704] ss:$16 sps:$4 sm:$0xff]  }
 0x719   :  { %4554 = vmatprep.subr.bf16.mxu1 %v10258_v29  ;;  %v10319_v29 = vld [vmem:[#allocation9 + $0x700] ss:$16 sps:$4 sm:$0xff]  }
 0x71c   :  { %4555 = vmatpush1.bf16.msra.mxu1 %v10256_v57  ;;  %v10324_v57 = vld [vmem:[#allocation9 + $0x724] ss:$16 sps:$4 sm:$0xff]  }
 0x71d   :  { %4556 = vmatprep.subr.bf16.mxu1 %v10261_v11  ;;  %v10322_v11 = vld [vmem:[#allocation9 + $0x720] ss:$16 sps:$4 sm:$0xff]  }
 0x720   :  { %4557 = vmatpush1.bf16.msra.mxu1 %v10259_v46  ;;  %v10327_v46 = vld [vmem:[#allocation9 + $0x744] ss:$16 sps:$4 sm:$0xff]  }
 0x721   :  { %4558 = vmatprep.subr.bf16.mxu1 %v10264_v59  ;;  %v10325_v59 = vld [vmem:[#allocation9 + $0x740] ss:$16 sps:$4 sm:$0xff]  }
 0x722   :  { %v12272_v48 = vpop.f32.mrb[136].mxu0 }
 0x723   :  { %v12274_v50 = vpop.f32.mrb[137].mxu0 }
 0x724   :  { %4559 = vmatpush1.bf16.msra.mxu1 %v10262_v28  ;;  %v12276_v60 = vpop.f32.mrb[138].mxu0  ;;  %v10330_v28 = vld [vmem:[#allocation9 + $0x764] ss:$16 sps:$4 sm:$0xff]  }
 0x725   :  { %v12278_v61 = vpop.f32.mrb[139].mxu0  ;;  %4560 = vmatprep.subr.bf16.mxu1 %v10267_v42  ;;  %v10328_v42 = vld [vmem:[#allocation9 + $0x760] ss:$16 sps:$4 sm:$0xff]  }
 0x728   :  { %4561 = vmatpush1.bf16.msra.mxu1 %v10265_v31  ;;  %v10333_v31 = vld [vmem:[#allocation9 + $0x784] ss:$16 sps:$4 sm:$0xff]  }
 0x729   :  { %4562 = vmatprep.subr.bf16.mxu1 %v10270_v32  ;;  %v10331_v32 = vld [vmem:[#allocation9 + $0x780] ss:$16 sps:$4 sm:$0xff]  }
 0x72c   :  { %4563 = vmatpush1.bf16.msra.mxu1 %v10268_v23  ;;  %v10336_v23 = vld [vmem:[#allocation9 + $0x7a4] ss:$16 sps:$4 sm:$0xff]  }
 0x72d   :  { %4564 = vmatprep.subr.bf16.mxu1 %v10273_v27  ;;  %v10334_v27 = vld [vmem:[#allocation9 + $0x7a0] ss:$16 sps:$4 sm:$0xff]  }
 0x730   :  { %4565 = vmatpush1.bf16.msra.mxu1 %v10271_v3  ;;  %v10339_v3 = vld [vmem:[#allocation9 + $0x7c4] ss:$16 sps:$4 sm:$0xff]  }
 0x731   :  { %4566 = vmatprep.subr.bf16.mxu1 %v10276_v24  ;;  %v10337_v24 = vld [vmem:[#allocation9 + $0x7c0] ss:$16 sps:$4 sm:$0xff]  }
 0x734   :  { %4567 = vmatpush1.bf16.msra.mxu1 %v10274_v20  ;;  %v10342_v20 = vld [vmem:[#allocation9 + $0x7e4] ss:$16 sps:$4 sm:$0xff]  }
 0x735   :  { %4568 = vmatprep.subr.bf16.mxu1 %v10279_v25  ;;  %v10340_v25 = vld [vmem:[#allocation9 + $0x7e0] ss:$16 sps:$4 sm:$0xff]  }
 0x738   :  { %4569 = vmatpush1.bf16.msra.mxu1 %v10277_v22  ;;  %v10345_v22 = vld [vmem:[#allocation9 + $0x60c] ss:$16 sps:$4 sm:$0xff]  }
 0x739   :  { %4570 = vmatprep.subr.bf16.mxu1 %v10282_v55  ;;  %v10343_v55 = vld [vmem:[#allocation9 + $0x608] ss:$16 sps:$4 sm:$0xff]  }
 0x73c   :  { %4571 = vmatpush1.bf16.msra.mxu1 %v10280_v37  ;;  %v10348_v37 = vld [vmem:[#allocation9 + $0x62c] ss:$16 sps:$4 sm:$0xff]  }
 0x73d   :  { %4572 = vmatprep.subr.bf16.mxu1 %v10285_v7  ;;  %v10346_v7 = vld [vmem:[#allocation9 + $0x628] ss:$16 sps:$4 sm:$0xff]  }
 0x740   :  { %4573 = vmatpush1.bf16.msra.mxu1 %v10283_v63  ;;  %v10351_v63 = vld [vmem:[#allocation9 + $0x64c] ss:$16 sps:$4 sm:$0xff]  }
 0x741   :  { %4574 = vmatprep.subr.bf16.mxu1 %v10288_v44  ;;  %v10349_v44 = vld [vmem:[#allocation9 + $0x648] ss:$16 sps:$4 sm:$0xff]  }
 0x744   :  { %4575 = vmatpush1.bf16.msra.mxu1 %v10286_v8  ;;  %v10354_v8 = vld [vmem:[#allocation9 + $0x66c] ss:$16 sps:$4 sm:$0xff]  }
 0x745   :  { %4576 = vmatprep.subr.bf16.mxu1 %v10291_v13  ;;  %v10352_v13 = vld [vmem:[#allocation9 + $0x668] ss:$16 sps:$4 sm:$0xff]  }
 0x748   :  { %4577 = vmatpush1.bf16.msra.mxu1 %v10289_v14  ;;  %v10357_v14 = vld [vmem:[#allocation9 + $0x68c] ss:$16 sps:$4 sm:$0xff]  }
 0x749   :  { %4578 = vmatprep.subr.bf16.mxu1 %v10294_v47  ;;  %v10355_v47 = vld [vmem:[#allocation9 + $0x688] ss:$16 sps:$4 sm:$0xff]  }
 0x74c   :  { %4579 = vmatpush1.bf16.msra.mxu1 %v10292_v15  ;;  %v10360_v15 = vld [vmem:[#allocation9 + $0x6ac] ss:$16 sps:$4 sm:$0xff]  }
 0x74d   :  { %4984 = vmatprep.subr.bf16.mxu1 %v10297_v9  ;;  %v10358_v9 = vld [vmem:[#allocation9 + $0x6a8] ss:$16 sps:$4 sm:$0xff]  }
 0x74f   :  { %4581 = vmatmul.mubr.bf16.vlgmr.msra.gmra.mrb[32].mxu1 %v12165_v30  ;;  %v10310_v30 = vld [vmem:[#allocation9 + $0x6a0] ss:$16 sps:$4 sm:$0xff]  }
 0x750   :  { %4985 = vmatpush1.bf16.msra.mxu1 %v10295_v49  ;;  %5016 = vmatprep.mubr.bf16.mxu1 %v12181_v18  ;;  %v10363_v49 = vld [vmem:[#allocation9 + $0x6cc] ss:$16 sps:$4 sm:$0xff]  }
 0x751   :  { %4986 = vmatprep.subr.bf16.mxu1 %v10300_v17  ;;  %v10366_v17 = vld [vmem:[#allocation9 + $0x6ec] ss:$16 sps:$4 sm:$0xff]  }
 0x754   :  { %4987 = vmatpush1.bf16.msra.mxu1 %v10298_v19  ;;  %v10364_v19 = vld [vmem:[#allocation9 + $0x6e8] ss:$16 sps:$4 sm:$0xff]  }
 0x755   :  { %4988 = vmatprep.subr.bf16.mxu1 %v10303_v5  ;;  %v10369_v5 = vld [vmem:[#allocation9 + $0x70c] ss:$16 sps:$4 sm:$0xff]  }
 0x758   :  { %4989 = vmatpush1.bf16.msra.mxu1 %v10301_v33  ;;  %v10367_v33 = vld [vmem:[#allocation9 + $0x708] ss:$16 sps:$4 sm:$0xff]  }
 0x759   :  { %4990 = vmatprep.subr.bf16.mxu1 %v10306_v51  ;;  %v10372_v51 = vld [vmem:[#allocation9 + $0x72c] ss:$16 sps:$4 sm:$0xff]  }
 0x75c   :  { %4991 = vmatpush1.bf16.msra.mxu1 %v10304_v2  ;;  %v10370_v2 = vld [vmem:[#allocation9 + $0x728] ss:$16 sps:$4 sm:$0xff]  }
 0x75d   :  { %4992 = vmatprep.subr.bf16.mxu1 %v10309_v6  ;;  %v10375_v6 = vld [vmem:[#allocation9 + $0x74c] ss:$16 sps:$4 sm:$0xff]  }
 0x760   :  { %4993 = vmatpush1.bf16.msra.mxu1 %v10307_v34  ;;  %v10373_v34 = vld [vmem:[#allocation9 + $0x748] ss:$16 sps:$4 sm:$0xff]  }
 0x761   :  { %4994 = vmatprep.subr.bf16.mxu1 %v10312_v53  ;;  %v10378_v53 = vld [vmem:[#allocation9 + $0x76c] ss:$16 sps:$4 sm:$0xff]  }
 0x764   :  { %4995 = vmatpush1.bf16.msra.mxu1 %v10310_v30  ;;  %v10376_v30 = vld [vmem:[#allocation9 + $0x768] ss:$16 sps:$4 sm:$0xff]  }
 0x765   :  { %4996 = vmatprep.subr.bf16.mxu1 %v10315_v35  ;;  %v10381_v35 = vld [vmem:[#allocation9 + $0x78c] ss:$16 sps:$4 sm:$0xff]  }
 0x768   :  { %4997 = vmatpush1.bf16.msra.mxu1 %v10313_v36  ;;  %v10379_v36 = vld [vmem:[#allocation9 + $0x788] ss:$16 sps:$4 sm:$0xff]  }
 0x769   :  { %4998 = vmatprep.subr.bf16.mxu1 %v10318_v58  ;;  %v10384_v58 = vld [vmem:[#allocation9 + $0x7ac] ss:$16 sps:$4 sm:$0xff]  }
 0x76c   :  { %4999 = vmatpush1.bf16.msra.mxu1 %v10316_v38  ;;  %v10382_v38 = vld [vmem:[#allocation9 + $0x7a8] ss:$16 sps:$4 sm:$0xff]  }
 0x76d   :  { %5000 = vmatprep.subr.bf16.mxu1 %v10321_v0  ;;  %v10387_v0 = vld [vmem:[#allocation9 + $0x7cc] ss:$16 sps:$4 sm:$0xff]  }
 0x770   :  { %5001 = vmatpush1.bf16.msra.mxu1 %v10319_v29  ;;  %v10385_v29 = vld [vmem:[#allocation9 + $0x7c8] ss:$16 sps:$4 sm:$0xff]  }
 0x771   :  { %5002 = vmatprep.subr.bf16.mxu1 %v10324_v57  ;;  %v10390_v57 = vld [vmem:[#allocation9 + $0x7ec] ss:$16 sps:$4 sm:$0xff]  }
 0x774   :  { %5003 = vmatpush1.bf16.msra.mxu1 %v10322_v11  ;;  %v10388_v11 = vld [vmem:[#allocation9 + $0x7e8] ss:$16 sps:$4 sm:$0xff]  }
 0x775   :  { %5004 = vmatprep.subr.bf16.mxu1 %v10327_v46  ;;  %v10393_v46 = vld [vmem:[#allocation9 + $0x804] ss:$16 sps:$4 sm:$0xff]  }
 0x778   :  { %5005 = vmatpush1.bf16.msra.mxu1 %v10325_v59  ;;  %v10391_v59 = vld [vmem:[#allocation9 + $0x800] ss:$16 sps:$4 sm:$0xff]  }
 0x779   :  { %5006 = vmatprep.subr.bf16.mxu1 %v10330_v28  ;;  %v10396_v28 = vld [vmem:[#allocation9 + $0x824] ss:$16 sps:$4 sm:$0xff]  }
 0x77c   :  { %5007 = vmatpush1.bf16.msra.mxu1 %v10328_v42  ;;  %v10394_v42 = vld [vmem:[#allocation9 + $0x820] ss:$16 sps:$4 sm:$0xff]  }
 0x77d   :  { %5008 = vmatprep.subr.bf16.mxu1 %v10333_v31  ;;  %v10399_v31 = vld [vmem:[#allocation9 + $0x844] ss:$16 sps:$4 sm:$0xff]  }
 0x780   :  { %5009 = vmatpush1.bf16.msra.mxu1 %v10331_v32  ;;  %v10397_v32 = vld [vmem:[#allocation9 + $0x840] ss:$16 sps:$4 sm:$0xff]  }
 0x781   :  { %5010 = vmatprep.subr.bf16.mxu1 %v10336_v23  ;;  %v10402_v23 = vld [vmem:[#allocation9 + $0x864] ss:$16 sps:$4 sm:$0xff]  }
 0x784   :  { %5011 = vmatpush1.bf16.msra.mxu1 %v10334_v27  ;;  %v10400_v27 = vld [vmem:[#allocation9 + $0x860] ss:$16 sps:$4 sm:$0xff]  }
 0x785   :  { %5012 = vmatprep.subr.bf16.mxu1 %v10339_v3  ;;  %v10405_v3 = vld [vmem:[#allocation9 + $0x884] ss:$16 sps:$4 sm:$0xff]  }
 0x788   :  { %5013 = vmatpush1.bf16.msra.mxu1 %v10337_v24  ;;  %v10403_v24 = vld [vmem:[#allocation9 + $0x880] ss:$16 sps:$4 sm:$0xff]  }
 0x789   :  { %5014 = vmatprep.subr.bf16.mxu1 %v10342_v20  ;;  %v10408_v20 = vld [vmem:[#allocation9 + $0x8a4] ss:$16 sps:$4 sm:$0xff]  }
 0x78c   :  { %5015 = vmatpush1.bf16.msra.mxu1 %v10340_v25  ;;  %v10411_v25 = vld [vmem:[#allocation9 + $0x8c4] ss:$16 sps:$4 sm:$0xff]  }
 0x78d   :  { %5027 = vmatprep.subr.bf16.mxu1 %v10345_v22  ;;  %v10409_v22 = vld [vmem:[#allocation9 + $0x8c0] ss:$16 sps:$4 sm:$0xff]  }
 0x78f   :  { %5017 = vmatmul.mubr.bf16.vlgmr.msra.gmra.mrb[36].mxu1 %v12177_v10 }
 0x790   :  { %5028 = vmatpush1.bf16.msra.mxu1 %v10343_v55  ;;  %5059 = vmatprep.mubr.bf16.mxu1 %v12181_v18  ;;  %v10361_v18 = vld [vmem:[#allocation9 + $0x6c8] ss:$16 sps:$4 sm:$0xff]   ;;  %v10414_v55 = vld [vmem:[#allocation9 + $0x8e4] ss:$16 sps:$4 sm:$0xff]  }
 0x791   :  { %5029 = vmatprep.subr.bf16.mxu1 %v10348_v37  ;;  %v10412_v37 = vld [vmem:[#allocation9 + $0x8e0] ss:$16 sps:$4 sm:$0xff]  }
 0x794   :  { %5030 = vmatpush1.bf16.msra.mxu1 %v10346_v7  ;;  %v10417_v7 = vld [vmem:[#allocation9 + $0x904] ss:$16 sps:$4 sm:$0xff]  }
 0x795   :  { %5031 = vmatprep.subr.bf16.mxu1 %v10351_v63  ;;  %v10415_v63 = vld [vmem:[#allocation9 + $0x900] ss:$16 sps:$4 sm:$0xff]  }
 0x798   :  { %5032 = vmatpush1.bf16.msra.mxu1 %v10349_v44  ;;  %v10420_v44 = vld [vmem:[#allocation9 + $0x924] ss:$16 sps:$4 sm:$0xff]  }
 0x799   :  { %5033 = vmatprep.subr.bf16.mxu1 %v10354_v8  ;;  %v10418_v8 = vld [vmem:[#allocation9 + $0x920] ss:$16 sps:$4 sm:$0xff]  }
 0x79c   :  { %5034 = vmatpush1.bf16.msra.mxu1 %v10352_v13  ;;  %v10423_v13 = vld [vmem:[#allocation9 + $0x944] ss:$16 sps:$4 sm:$0xff]  }
 0x79d   :  { %5035 = vmatprep.subr.bf16.mxu1 %v10357_v14  ;;  %v10421_v14 = vld [vmem:[#allocation9 + $0x940] ss:$16 sps:$4 sm:$0xff]  }
 0x7a0   :  { %5036 = vmatpush1.bf16.msra.mxu1 %v10355_v47  ;;  %v10426_v47 = vld [vmem:[#allocation9 + $0x964] ss:$16 sps:$4 sm:$0xff]  }
 0x7a1   :  { %5037 = vmatprep.subr.bf16.mxu1 %v10360_v15  ;;  %v10424_v15 = vld [vmem:[#allocation9 + $0x960] ss:$16 sps:$4 sm:$0xff]  }
 0x7a4   :  { %5038 = vmatpush1.bf16.msra.mxu1 %v10358_v9  ;;  %v10429_v9 = vld [vmem:[#allocation9 + $0x984] ss:$16 sps:$4 sm:$0xff]  }
 0x7a5   :  { %5039 = vmatprep.subr.bf16.mxu1 %v10363_v49  ;;  %v10427_v49 = vld [vmem:[#allocation9 + $0x980] ss:$16 sps:$4 sm:$0xff]  }
 0x7a8   :  { %5040 = vmatpush1.bf16.msra.mxu1 %v10361_v18  ;;  %v10432_v18 = vld [vmem:[#allocation9 + $0x9a4] ss:$16 sps:$4 sm:$0xff]  }
 0x7a9   :  { %5041 = vmatprep.subr.bf16.mxu1 %v10366_v17  ;;  %v10430_v17 = vld [vmem:[#allocation9 + $0x9a0] ss:$16 sps:$4 sm:$0xff]  }
 0x7ac   :  { %5042 = vmatpush1.bf16.msra.mxu1 %v10364_v19  ;;  %v10435_v19 = vld [vmem:[#allocation9 + $0x9c4] ss:$16 sps:$4 sm:$0xff]  }
 0x7ad   :  { %5043 = vmatprep.subr.bf16.mxu1 %v10369_v5  ;;  %v10433_v5 = vld [vmem:[#allocation9 + $0x9c0] ss:$16 sps:$4 sm:$0xff]  }
 0x7b0   :  { %5044 = vmatpush1.bf16.msra.mxu1 %v10367_v33  ;;  %v10438_v33 = vld [vmem:[#allocation9 + $0x9e4] ss:$16 sps:$4 sm:$0xff]  }
 0x7b1   :  { %5045 = vmatprep.subr.bf16.mxu1 %v10372_v51  ;;  %v10436_v51 = vld [vmem:[#allocation9 + $0x9e0] ss:$16 sps:$4 sm:$0xff]  }
 0x7b4   :  { %5046 = vmatpush1.bf16.msra.mxu1 %v10370_v2  ;;  %v10441_v2 = vld [vmem:[#allocation9 + $0x80c] ss:$16 sps:$4 sm:$0xff]  }
 0x7b5   :  { %5047 = vmatprep.subr.bf16.mxu1 %v10375_v6  ;;  %v10439_v6 = vld [vmem:[#allocation9 + $0x808] ss:$16 sps:$4 sm:$0xff]  }
 0x7b8   :  { %5048 = vmatpush1.bf16.msra.mxu1 %v10373_v34  ;;  %v10444_v34 = vld [vmem:[#allocation9 + $0x82c] ss:$16 sps:$4 sm:$0xff]  }
 0x7b9   :  { %5049 = vmatprep.subr.bf16.mxu1 %v10378_v53  ;;  %v10442_v53 = vld [vmem:[#allocation9 + $0x828] ss:$16 sps:$4 sm:$0xff]  }
 0x7bc   :  { %5050 = vmatpush1.bf16.msra.mxu1 %v10376_v30  ;;  %v10447_v30 = vld [vmem:[#allocation9 + $0x84c] ss:$16 sps:$4 sm:$0xff]  }
 0x7bd   :  { %5051 = vmatprep.subr.bf16.mxu1 %v10381_v35  ;;  %v10445_v35 = vld [vmem:[#allocation9 + $0x848] ss:$16 sps:$4 sm:$0xff]  }
 0x7c0   :  { %5052 = vmatpush1.bf16.msra.mxu1 %v10379_v36  ;;  %v10450_v36 = vld [vmem:[#allocation9 + $0x86c] ss:$16 sps:$4 sm:$0xff]  }
 0x7c1   :  { %5053 = vmatprep.subr.bf16.mxu1 %v10384_v58  ;;  %v10448_v58 = vld [vmem:[#allocation9 + $0x868] ss:$16 sps:$4 sm:$0xff]  }
 0x7c4   :  { %5054 = vmatpush1.bf16.msra.mxu1 %v10382_v38  ;;  %v10453_v38 = vld [vmem:[#allocation9 + $0x88c] ss:$16 sps:$4 sm:$0xff]  }
 0x7c5   :  { %5055 = vmatprep.subr.bf16.mxu1 %v10387_v0  ;;  %v10451_v0 = vld [vmem:[#allocation9 + $0x888] ss:$16 sps:$4 sm:$0xff]  }
 0x7c8   :  { %5056 = vmatpush1.bf16.msra.mxu1 %v10385_v29  ;;  %v10456_v29 = vld [vmem:[#allocation9 + $0x8ac] ss:$16 sps:$4 sm:$0xff]  }
 0x7c9   :  { %5057 = vmatprep.subr.bf16.mxu1 %v10390_v57  ;;  %v10454_v57 = vld [vmem:[#allocation9 + $0x8a8] ss:$16 sps:$4 sm:$0xff]  }
 0x7cc   :  { %5058 = vmatpush1.bf16.msra.mxu1 %v10388_v11  ;;  %v10459_v11 = vld [vmem:[#allocation9 + $0x8cc] ss:$16 sps:$4 sm:$0xff]  }
 0x7cd   :  { %5463 = vmatprep.subr.bf16.mxu1 %v10393_v46  ;;  %v10462_v46 = vld [vmem:[#allocation9 + $0x8ec] ss:$16 sps:$4 sm:$0xff]  }
 0x7cf   :  { %5060 = vmatmul.mubr.bf16.vlgmr.msra.gmra.mrb[32].mxu1 %v12177_v10  ;;  %v10406_v10 = vld [vmem:[#allocation9 + $0x8a0] ss:$16 sps:$4 sm:$0xff]  }
 0x7d0   :  { %5464 = vmatpush1.bf16.msra.mxu1 %v10391_v59  ;;  %5495 = vmatprep.mubr.bf16.mxu1 %v12193_v54  ;;  %v10460_v59 = vld [vmem:[#allocation9 + $0x8e8] ss:$16 sps:$4 sm:$0xff]  }
 0x7d1   :  { %5465 = vmatprep.subr.bf16.mxu1 %v10396_v28  ;;  %v10465_v28 = vld [vmem:[#allocation9 + $0x90c] ss:$16 sps:$4 sm:$0xff]  }
 0x7d4   :  { %5466 = vmatpush1.bf16.msra.mxu1 %v10394_v42  ;;  %v10463_v42 = vld [vmem:[#allocation9 + $0x908] ss:$16 sps:$4 sm:$0xff]  }
 0x7d5   :  { %5467 = vmatprep.subr.bf16.mxu1 %v10399_v31  ;;  %v10468_v31 = vld [vmem:[#allocation9 + $0x92c] ss:$16 sps:$4 sm:$0xff]  }
 0x7d8   :  { %5468 = vmatpush1.bf16.msra.mxu1 %v10397_v32  ;;  %v10466_v32 = vld [vmem:[#allocation9 + $0x928] ss:$16 sps:$4 sm:$0xff]  }
 0x7d9   :  { %5469 = vmatprep.subr.bf16.mxu1 %v10402_v23  ;;  %v10471_v23 = vld [vmem:[#allocation9 + $0x94c] ss:$16 sps:$4 sm:$0xff]  }
 0x7dc   :  { %5470 = vmatpush1.bf16.msra.mxu1 %v10400_v27  ;;  %v10469_v27 = vld [vmem:[#allocation9 + $0x948] ss:$16 sps:$4 sm:$0xff]  }
 0x7dd   :  { %5471 = vmatprep.subr.bf16.mxu1 %v10405_v3  ;;  %v10474_v3 = vld [vmem:[#allocation9 + $0x96c] ss:$16 sps:$4 sm:$0xff]  }
 0x7e0   :  { %5472 = vmatpush1.bf16.msra.mxu1 %v10403_v24  ;;  %v10472_v24 = vld [vmem:[#allocation9 + $0x968] ss:$16 sps:$4 sm:$0xff]  }
 0x7e1   :  { %5473 = vmatprep.subr.bf16.mxu1 %v10408_v20  ;;  %v10477_v20 = vld [vmem:[#allocation9 + $0x98c] ss:$16 sps:$4 sm:$0xff]  }
 0x7e4   :  { %5474 = vmatpush1.bf16.msra.mxu1 %v10406_v10  ;;  %v10475_v10 = vld [vmem:[#allocation9 + $0x988] ss:$16 sps:$4 sm:$0xff]  }
 0x7e5   :  { %5475 = vmatprep.subr.bf16.mxu1 %v10411_v25  ;;  %v10480_v25 = vld [vmem:[#allocation9 + $0x9ac] ss:$16 sps:$4 sm:$0xff]  }
 0x7e8   :  { %5476 = vmatpush1.bf16.msra.mxu1 %v10409_v22  ;;  %v10478_v22 = vld [vmem:[#allocation9 + $0x9a8] ss:$16 sps:$4 sm:$0xff]  }
 0x7e9   :  { %5477 = vmatprep.subr.bf16.mxu1 %v10414_v55  ;;  %v10483_v55 = vld [vmem:[#allocation9 + $0x9cc] ss:$16 sps:$4 sm:$0xff]  }
 0x7ec   :  { %5478 = vmatpush1.bf16.msra.mxu1 %v10412_v37  ;;  %v10481_v37 = vld [vmem:[#allocation9 + $0x9c8] ss:$16 sps:$4 sm:$0xff]  }
 0x7ed   :  { %5479 = vmatprep.subr.bf16.mxu1 %v10417_v7  ;;  %v10486_v7 = vld [vmem:[#allocation9 + $0x9ec] ss:$16 sps:$4 sm:$0xff]  }
 0x7f0   :  { %5480 = vmatpush1.bf16.msra.mxu1 %v10415_v63  ;;  %v10484_v63 = vld [vmem:[#allocation9 + $0x9e8] ss:$16 sps:$4 sm:$0xff]  }
 0x7f1   :  { %5481 = vmatprep.subr.bf16.mxu1 %v10420_v44  ;;  %v10489_v44 = vld [vmem:[#allocation9 + $0xa04] ss:$16 sps:$4 sm:$0xff]  }
 0x7f4   :  { %5482 = vmatpush1.bf16.msra.mxu1 %v10418_v8  ;;  %v10487_v8 = vld [vmem:[#allocation9 + $0xa00] ss:$16 sps:$4 sm:$0xff]  }
 0x7f5   :  { %5483 = vmatprep.subr.bf16.mxu1 %v10423_v13  ;;  %v10492_v13 = vld [vmem:[#allocation9 + $0xa24] ss:$16 sps:$4 sm:$0xff]  }
 0x7f8   :  { %5484 = vmatpush1.bf16.msra.mxu1 %v10421_v14  ;;  %v10490_v14 = vld [vmem:[#allocation9 + $0xa20] ss:$16 sps:$4 sm:$0xff]  }
 0x7f9   :  { %5485 = vmatprep.subr.bf16.mxu1 %v10426_v47  ;;  %v10495_v47 = vld [vmem:[#allocation9 + $0xa44] ss:$16 sps:$4 sm:$0xff]  }
 0x7fc   :  { %5486 = vmatpush1.bf16.msra.mxu1 %v10424_v15  ;;  %v10493_v15 = vld [vmem:[#allocation9 + $0xa40] ss:$16 sps:$4 sm:$0xff]  }
 0x7fd   :  { %5487 = vmatprep.subr.bf16.mxu1 %v10429_v9  ;;  %v10498_v9 = vld [vmem:[#allocation9 + $0xa64] ss:$16 sps:$4 sm:$0xff]  }
 0x800   :  { %5488 = vmatpush1.bf16.msra.mxu1 %v10427_v49  ;;  %v10496_v49 = vld [vmem:[#allocation9 + $0xa60] ss:$16 sps:$4 sm:$0xff]  }
 0x801   :  { %5489 = vmatprep.subr.bf16.mxu1 %v10432_v18  ;;  %v10501_v18 = vld [vmem:[#allocation9 + $0xa84] ss:$16 sps:$4 sm:$0xff]  }
 0x804   :  { %5490 = vmatpush1.bf16.msra.mxu1 %v10430_v17  ;;  %v10499_v17 = vld [vmem:[#allocation9 + $0xa80] ss:$16 sps:$4 sm:$0xff]  }
 0x805   :  { %5491 = vmatprep.subr.bf16.mxu1 %v10435_v19  ;;  %v10504_v19 = vld [vmem:[#allocation9 + $0xaa4] ss:$16 sps:$4 sm:$0xff]  }
 0x808   :  { %5492 = vmatpush1.bf16.msra.mxu1 %v10433_v5  ;;  %v10507_v5 = vld [vmem:[#allocation9 + $0xac4] ss:$16 sps:$4 sm:$0xff]  }
 0x809   :  { %5493 = vmatprep.subr.bf16.mxu1 %v10438_v33  ;;  %v10505_v33 = vld [vmem:[#allocation9 + $0xac0] ss:$16 sps:$4 sm:$0xff]  }
 0x80c   :  { %5494 = vmatpush1.bf16.msra.mxu1 %v10436_v51  ;;  %v10510_v51 = vld [vmem:[#allocation9 + $0xae4] ss:$16 sps:$4 sm:$0xff]  }
 0x80d   :  { %5506 = vmatprep.subr.bf16.mxu1 %v10441_v2  ;;  %v10508_v2 = vld [vmem:[#allocation9 + $0xae0] ss:$16 sps:$4 sm:$0xff]  }
 0x80f   :  { %5496 = vmatmul.mubr.bf16.vlgmr.msra.gmra.mrb[36].mxu1 %v12189_v40 }
 0x810   :  { %5507 = vmatpush1.bf16.msra.mxu1 %v10439_v6  ;;  %5538 = vmatprep.mubr.bf16.mxu1 %v12193_v54  ;;  %v10457_v54 = vld [vmem:[#allocation9 + $0x8c8] ss:$16 sps:$4 sm:$0xff]   ;;  %v10513_v6 = vld [vmem:[#allocation9 + $0xb04] ss:$16 sps:$4 sm:$0xff]  }
 0x811   :  { %5508 = vmatprep.subr.bf16.mxu1 %v10444_v34  ;;  %v10511_v34 = vld [vmem:[#allocation9 + $0xb00] ss:$16 sps:$4 sm:$0xff]  }
 0x814   :  { %5509 = vmatpush1.bf16.msra.mxu1 %v10442_v53  ;;  %v10516_v53 = vld [vmem:[#allocation9 + $0xb24] ss:$16 sps:$4 sm:$0xff]  }
 0x815   :  { %5510 = vmatprep.subr.bf16.mxu1 %v10447_v30  ;;  %v10514_v30 = vld [vmem:[#allocation9 + $0xb20] ss:$16 sps:$4 sm:$0xff]  }
 0x818   :  { %5511 = vmatpush1.bf16.msra.mxu1 %v10445_v35  ;;  %v10519_v35 = vld [vmem:[#allocation9 + $0xb44] ss:$16 sps:$4 sm:$0xff]  }
 0x819   :  { %5512 = vmatprep.subr.bf16.mxu1 %v10450_v36  ;;  %v10517_v36 = vld [vmem:[#allocation9 + $0xb40] ss:$16 sps:$4 sm:$0xff]  }
 0x81c   :  { %5513 = vmatpush1.bf16.msra.mxu1 %v10448_v58  ;;  %v10522_v58 = vld [vmem:[#allocation9 + $0xb64] ss:$16 sps:$4 sm:$0xff]  }
 0x81d   :  { %5514 = vmatprep.subr.bf16.mxu1 %v10453_v38  ;;  %v10520_v38 = vld [vmem:[#allocation9 + $0xb60] ss:$16 sps:$4 sm:$0xff]  }
 0x820   :  { %5515 = vmatpush1.bf16.msra.mxu1 %v10451_v0  ;;  %v10525_v0 = vld [vmem:[#allocation9 + $0xb84] ss:$16 sps:$4 sm:$0xff]  }
 0x821   :  { %5516 = vmatprep.subr.bf16.mxu1 %v10456_v29  ;;  %v10523_v29 = vld [vmem:[#allocation9 + $0xb80] ss:$16 sps:$4 sm:$0xff]  }
 0x824   :  { %5517 = vmatpush1.bf16.msra.mxu1 %v10454_v57  ;;  %v10528_v57 = vld [vmem:[#allocation9 + $0xba4] ss:$16 sps:$4 sm:$0xff]  }
 0x825   :  { %5518 = vmatprep.subr.bf16.mxu1 %v10459_v11  ;;  %v10526_v11 = vld [vmem:[#allocation9 + $0xba0] ss:$16 sps:$4 sm:$0xff]  }
 0x828   :  { %5519 = vmatpush1.bf16.msra.mxu1 %v10457_v54  ;;  %v10531_v54 = vld [vmem:[#allocation9 + $0xbc4] ss:$16 sps:$4 sm:$0xff]  }
 0x829   :  { %5520 = vmatprep.subr.bf16.mxu1 %v10462_v46  ;;  %v10529_v46 = vld [vmem:[#allocation9 + $0xbc0] ss:$16 sps:$4 sm:$0xff]  }
 0x82c   :  { %5521 = vmatpush1.bf16.msra.mxu1 %v10460_v59  ;;  %v10534_v59 = vld [vmem:[#allocation9 + $0xbe4] ss:$16 sps:$4 sm:$0xff]  }
 0x82d   :  { %5522 = vmatprep.subr.bf16.mxu1 %v10465_v28  ;;  %v10532_v28 = vld [vmem:[#allocation9 + $0xbe0] ss:$16 sps:$4 sm:$0xff]  }
 0x830   :  { %5523 = vmatpush1.bf16.msra.mxu1 %v10463_v42  ;;  %v10537_v42 = vld [vmem:[#allocation9 + $0xa0c] ss:$16 sps:$4 sm:$0xff]  }
 0x831   :  { %5524 = vmatprep.subr.bf16.mxu1 %v10468_v31  ;;  %v10535_v31 = vld [vmem:[#allocation9 + $0xa08] ss:$16 sps:$4 sm:$0xff]  }
 0x834   :  { %5525 = vmatpush1.bf16.msra.mxu1 %v10466_v32  ;;  %v10540_v32 = vld [vmem:[#allocation9 + $0xa2c] ss:$16 sps:$4 sm:$0xff]  }
 0x835   :  { %5526 = vmatprep.subr.bf16.mxu1 %v10471_v23  ;;  %v10538_v23 = vld [vmem:[#allocation9 + $0xa28] ss:$16 sps:$4 sm:$0xff]  }
 0x838   :  { %5527 = vmatpush1.bf16.msra.mxu1 %v10469_v27  ;;  %v10543_v27 = vld [vmem:[#allocation9 + $0xa4c] ss:$16 sps:$4 sm:$0xff]  }
 0x839   :  { %5528 = vmatprep.subr.bf16.mxu1 %v10474_v3  ;;  %v10541_v3 = vld [vmem:[#allocation9 + $0xa48] ss:$16 sps:$4 sm:$0xff]  }
 0x83c   :  { %5529 = vmatpush1.bf16.msra.mxu1 %v10472_v24  ;;  %v10546_v24 = vld [vmem:[#allocation9 + $0xa6c] ss:$16 sps:$4 sm:$0xff]  }
 0x83d   :  { %5530 = vmatprep.subr.bf16.mxu1 %v10477_v20  ;;  %v10544_v20 = vld [vmem:[#allocation9 + $0xa68] ss:$16 sps:$4 sm:$0xff]  }
 0x840   :  { %5531 = vmatpush1.bf16.msra.mxu1 %v10475_v10  ;;  %v10549_v10 = vld [vmem:[#allocation9 + $0xa8c] ss:$16 sps:$4 sm:$0xff]  }
 0x841   :  { %5532 = vmatprep.subr.bf16.mxu1 %v10480_v25  ;;  %v10547_v25 = vld [vmem:[#allocation9 + $0xa88] ss:$16 sps:$4 sm:$0xff]  }
 0x844   :  { %5533 = vmatpush1.bf16.msra.mxu1 %v10478_v22  ;;  %v10552_v22 = vld [vmem:[#allocation9 + $0xaac] ss:$16 sps:$4 sm:$0xff]  }
 0x845   :  { %5534 = vmatprep.subr.bf16.mxu1 %v10483_v55  ;;  %v10550_v55 = vld [vmem:[#allocation9 + $0xaa8] ss:$16 sps:$4 sm:$0xff]  }
 0x848   :  { %5535 = vmatpush1.bf16.msra.mxu1 %v10481_v37  ;;  %v10555_v37 = vld [vmem:[#allocation9 + $0xacc] ss:$16 sps:$4 sm:$0xff]  }
 0x849   :  { %5536 = vmatprep.subr.bf16.mxu1 %v10486_v7  ;;  %v10558_v7 = vld [vmem:[#allocation9 + $0xaec] ss:$16 sps:$4 sm:$0xff]  }
 0x84c   :  { %5537 = vmatpush1.bf16.msra.mxu1 %v10484_v63  ;;  %v10556_v63 = vld [vmem:[#allocation9 + $0xae8] ss:$16 sps:$4 sm:$0xff]  }
 0x84d   :  { %5942 = vmatprep.subr.bf16.mxu1 %v10489_v44  ;;  %v10561_v44 = vld [vmem:[#allocation9 + $0xb0c] ss:$16 sps:$4 sm:$0xff]  }
 0x84f   :  { %5539 = vmatmul.mubr.bf16.vlgmr.msra.gmra.mrb[32].mxu1 %v12189_v40  ;;  %v10502_v40 = vld [vmem:[#allocation9 + $0xaa0] ss:$16 sps:$4 sm:$0xff]  }
 0x850   :  { %5943 = vmatpush1.bf16.msra.mxu1 %v10487_v8  ;;  %5974 = vmatprep.mubr.bf16.mxu1 %v12205_v16  ;;  %v10559_v8 = vld [vmem:[#allocation9 + $0xb08] ss:$16 sps:$4 sm:$0xff]  }
 0x851   :  { %5944 = vmatprep.subr.bf16.mxu1 %v10492_v13  ;;  %v10564_v13 = vld [vmem:[#allocation9 + $0xb2c] ss:$16 sps:$4 sm:$0xff]  }
 0x854   :  { %5945 = vmatpush1.bf16.msra.mxu1 %v10490_v14  ;;  %v10562_v14 = vld [vmem:[#allocation9 + $0xb28] ss:$16 sps:$4 sm:$0xff]  }
 0x855   :  { %5946 = vmatprep.subr.bf16.mxu1 %v10495_v47  ;;  %v10567_v47 = vld [vmem:[#allocation9 + $0xb4c] ss:$16 sps:$4 sm:$0xff]  }
 0x858   :  { %5947 = vmatpush1.bf16.msra.mxu1 %v10493_v15  ;;  %v10565_v15 = vld [vmem:[#allocation9 + $0xb48] ss:$16 sps:$4 sm:$0xff]  }
 0x859   :  { %5948 = vmatprep.subr.bf16.mxu1 %v10498_v9  ;;  %v10570_v9 = vld [vmem:[#allocation9 + $0xb6c] ss:$16 sps:$4 sm:$0xff]  }
 0x85c   :  { %5949 = vmatpush1.bf16.msra.mxu1 %v10496_v49  ;;  %v10568_v49 = vld [vmem:[#allocation9 + $0xb68] ss:$16 sps:$4 sm:$0xff]  }
 0x85d   :  { %5950 = vmatprep.subr.bf16.mxu1 %v10501_v18  ;;  %v10573_v18 = vld [vmem:[#allocation9 + $0xb8c] ss:$16 sps:$4 sm:$0xff]  }
 0x860   :  { %5951 = vmatpush1.bf16.msra.mxu1 %v10499_v17  ;;  %v10571_v17 = vld [vmem:[#allocation9 + $0xb88] ss:$16 sps:$4 sm:$0xff]  }
 0x861   :  { %5952 = vmatprep.subr.bf16.mxu1 %v10504_v19  ;;  %v10576_v19 = vld [vmem:[#allocation9 + $0xbac] ss:$16 sps:$4 sm:$0xff]  }
 0x864   :  { %5953 = vmatpush1.bf16.msra.mxu1 %v10502_v40  ;;  %v10574_v40 = vld [vmem:[#allocation9 + $0xba8] ss:$16 sps:$4 sm:$0xff]  }
 0x865   :  { %5954 = vmatprep.subr.bf16.mxu1 %v10507_v5  ;;  %v10579_v5 = vld [vmem:[#allocation9 + $0xbcc] ss:$16 sps:$4 sm:$0xff]  }
 0x868   :  { %5955 = vmatpush1.bf16.msra.mxu1 %v10505_v33  ;;  %v10577_v33 = vld [vmem:[#allocation9 + $0xbc8] ss:$16 sps:$4 sm:$0xff]  }
 0x869   :  { %5956 = vmatprep.subr.bf16.mxu1 %v10510_v51  ;;  %v10582_v51 = vld [vmem:[#allocation9 + $0xbec] ss:$16 sps:$4 sm:$0xff]  }
 0x86c   :  { %5957 = vmatpush1.bf16.msra.mxu1 %v10508_v2  ;;  %v10580_v2 = vld [vmem:[#allocation9 + $0xbe8] ss:$16 sps:$4 sm:$0xff]  }
 0x86d   :  { %5958 = vmatprep.subr.bf16.mxu1 %v10513_v6  ;;  %v10585_v6 = vld [vmem:[#allocation9 + $0xc04] ss:$16 sps:$4 sm:$0xff]  }
 0x870   :  { %5959 = vmatpush1.bf16.msra.mxu1 %v10511_v34  ;;  %v10583_v34 = vld [vmem:[#allocation9 + $0xc00] ss:$16 sps:$4 sm:$0xff]  }
 0x871   :  { %5960 = vmatprep.subr.bf16.mxu1 %v10516_v53  ;;  %v10588_v53 = vld [vmem:[#allocation9 + $0xc24] ss:$16 sps:$4 sm:$0xff]  }
 0x874   :  { %5961 = vmatpush1.bf16.msra.mxu1 %v10514_v30  ;;  %v10586_v30 = vld [vmem:[#allocation9 + $0xc20] ss:$16 sps:$4 sm:$0xff]  }
 0x875   :  { %5962 = vmatprep.subr.bf16.mxu1 %v10519_v35  ;;  %v10591_v35 = vld [vmem:[#allocation9 + $0xc44] ss:$16 sps:$4 sm:$0xff]  }
 0x878   :  { %5963 = vmatpush1.bf16.msra.mxu1 %v10517_v36  ;;  %v10589_v36 = vld [vmem:[#allocation9 + $0xc40] ss:$16 sps:$4 sm:$0xff]  }
 0x879   :  { %5964 = vmatprep.subr.bf16.mxu1 %v10522_v58  ;;  %v10594_v58 = vld [vmem:[#allocation9 + $0xc64] ss:$16 sps:$4 sm:$0xff]  }
 0x87c   :  { %5965 = vmatpush1.bf16.msra.mxu1 %v10520_v38  ;;  %v10592_v38 = vld [vmem:[#allocation9 + $0xc60] ss:$16 sps:$4 sm:$0xff]  }
 0x87d   :  { %5966 = vmatprep.subr.bf16.mxu1 %v10525_v0  ;;  %v10597_v0 = vld [vmem:[#allocation9 + $0xc84] ss:$16 sps:$4 sm:$0xff]  }
 0x880   :  { %5967 = vmatpush1.bf16.msra.mxu1 %v10523_v29  ;;  %v10595_v29 = vld [vmem:[#allocation9 + $0xc80] ss:$16 sps:$4 sm:$0xff]  }
 0x881   :  { %5968 = vmatprep.subr.bf16.mxu1 %v10528_v57  ;;  %v10600_v57 = vld [vmem:[#allocation9 + $0xca4] ss:$16 sps:$4 sm:$0xff]  }
 0x884   :  { %5969 = vmatpush1.bf16.msra.mxu1 %v10526_v11  ;;  %v10603_v11 = vld [vmem:[#allocation9 + $0xcc4] ss:$16 sps:$4 sm:$0xff]  }
 0x885   :  { %5970 = vmatprep.subr.bf16.mxu1 %v10531_v54  ;;  %v10601_v54 = vld [vmem:[#allocation9 + $0xcc0] ss:$16 sps:$4 sm:$0xff]  }
 0x888   :  { %5971 = vmatpush1.bf16.msra.mxu1 %v10529_v46  ;;  %v10606_v46 = vld [vmem:[#allocation9 + $0xce4] ss:$16 sps:$4 sm:$0xff]  }
 0x889   :  { %5972 = vmatprep.subr.bf16.mxu1 %v10534_v59  ;;  %v10604_v59 = vld [vmem:[#allocation9 + $0xce0] ss:$16 sps:$4 sm:$0xff]  }
 0x88c   :  { %5973 = vmatpush1.bf16.msra.mxu1 %v10532_v28  ;;  %v10609_v28 = vld [vmem:[#allocation9 + $0xd04] ss:$16 sps:$4 sm:$0xff]  }
 0x88d   :  { %5985 = vmatprep.subr.bf16.mxu1 %v10537_v42  ;;  %v10607_v42 = vld [vmem:[#allocation9 + $0xd00] ss:$16 sps:$4 sm:$0xff]  }
 0x88f   :  { %5975 = vmatmul.mubr.bf16.vlgmr.msra.gmra.mrb[36].mxu1 %v12201_v4 }
 0x890   :  { %5986 = vmatpush1.bf16.msra.mxu1 %v10535_v31  ;;  %6017 = vmatprep.mubr.bf16.mxu1 %v12205_v16  ;;  %v10553_v16 = vld [vmem:[#allocation9 + $0xac8] ss:$16 sps:$4 sm:$0xff]   ;;  %v10612_v31 = vld [vmem:[#allocation9 + $0xd24] ss:$16 sps:$4 sm:$0xff]  }
 0x891   :  { %5987 = vmatprep.subr.bf16.mxu1 %v10540_v32  ;;  %v10610_v32 = vld [vmem:[#allocation9 + $0xd20] ss:$16 sps:$4 sm:$0xff]  }
 0x894   :  { %5988 = vmatpush1.bf16.msra.mxu1 %v10538_v23  ;;  %v10615_v23 = vld [vmem:[#allocation9 + $0xd44] ss:$16 sps:$4 sm:$0xff]  }
 0x895   :  { %5989 = vmatprep.subr.bf16.mxu1 %v10543_v27  ;;  %v10613_v27 = vld [vmem:[#allocation9 + $0xd40] ss:$16 sps:$4 sm:$0xff]  }
 0x898   :  { %5990 = vmatpush1.bf16.msra.mxu1 %v10541_v3  ;;  %v10618_v3 = vld [vmem:[#allocation9 + $0xd64] ss:$16 sps:$4 sm:$0xff]  }
 0x899   :  { %5991 = vmatprep.subr.bf16.mxu1 %v10546_v24  ;;  %v10616_v24 = vld [vmem:[#allocation9 + $0xd60] ss:$16 sps:$4 sm:$0xff]  }
 0x89c   :  { %5992 = vmatpush1.bf16.msra.mxu1 %v10544_v20  ;;  %v10621_v20 = vld [vmem:[#allocation9 + $0xd84] ss:$16 sps:$4 sm:$0xff]  }
 0x89d   :  { %5993 = vmatprep.subr.bf16.mxu1 %v10549_v10  ;;  %v10619_v10 = vld [vmem:[#allocation9 + $0xd80] ss:$16 sps:$4 sm:$0xff]  }
 0x8a0   :  { %5994 = vmatpush1.bf16.msra.mxu1 %v10547_v25  ;;  %v10624_v25 = vld [vmem:[#allocation9 + $0xda4] ss:$16 sps:$4 sm:$0xff]  }
 0x8a1   :  { %5995 = vmatprep.subr.bf16.mxu1 %v10552_v22  ;;  %v10622_v22 = vld [vmem:[#allocation9 + $0xda0] ss:$16 sps:$4 sm:$0xff]  }
 0x8a4   :  { %5996 = vmatpush1.bf16.msra.mxu1 %v10550_v55  ;;  %v10627_v55 = vld [vmem:[#allocation9 + $0xdc4] ss:$16 sps:$4 sm:$0xff]  }
 0x8a5   :  { %5997 = vmatprep.subr.bf16.mxu1 %v10555_v37  ;;  %v10625_v37 = vld [vmem:[#allocation9 + $0xdc0] ss:$16 sps:$4 sm:$0xff]  }
 0x8a8   :  { %5998 = vmatpush1.bf16.msra.mxu1 %v10553_v16  ;;  %v10630_v16 = vld [vmem:[#allocation9 + $0xde4] ss:$16 sps:$4 sm:$0xff]  }
 0x8a9   :  { %5999 = vmatprep.subr.bf16.mxu1 %v10558_v7  ;;  %v10628_v7 = vld [vmem:[#allocation9 + $0xde0] ss:$16 sps:$4 sm:$0xff]  }
 0x8ac   :  { %6000 = vmatpush1.bf16.msra.mxu1 %v10556_v63  ;;  %v10633_v63 = vld [vmem:[#allocation9 + $0xc0c] ss:$16 sps:$4 sm:$0xff]  }
 0x8ad   :  { %6001 = vmatprep.subr.bf16.mxu1 %v10561_v44  ;;  %v10631_v44 = vld [vmem:[#allocation9 + $0xc08] ss:$16 sps:$4 sm:$0xff]  }
 0x8b0   :  { %6002 = vmatpush1.bf16.msra.mxu1 %v10559_v8  ;;  %v10636_v8 = vld [vmem:[#allocation9 + $0xc2c] ss:$16 sps:$4 sm:$0xff]  }
 0x8b1   :  { %6003 = vmatprep.subr.bf16.mxu1 %v10564_v13  ;;  %v10634_v13 = vld [vmem:[#allocation9 + $0xc28] ss:$16 sps:$4 sm:$0xff]  }
 0x8b4   :  { %6004 = vmatpush1.bf16.msra.mxu1 %v10562_v14  ;;  %v10639_v14 = vld [vmem:[#allocation9 + $0xc4c] ss:$16 sps:$4 sm:$0xff]  }
 0x8b5   :  { %6005 = vmatprep.subr.bf16.mxu1 %v10567_v47  ;;  %v10637_v47 = vld [vmem:[#allocation9 + $0xc48] ss:$16 sps:$4 sm:$0xff]  }
 0x8b8   :  { %6006 = vmatpush1.bf16.msra.mxu1 %v10565_v15  ;;  %v10642_v15 = vld [vmem:[#allocation9 + $0xc6c] ss:$16 sps:$4 sm:$0xff]  }
 0x8b9   :  { %6007 = vmatprep.subr.bf16.mxu1 %v10570_v9  ;;  %v10640_v9 = vld [vmem:[#allocation9 + $0xc68] ss:$16 sps:$4 sm:$0xff]  }
 0x8bc   :  { %6008 = vmatpush1.bf16.msra.mxu1 %v10568_v49  ;;  %v10645_v49 = vld [vmem:[#allocation9 + $0xc8c] ss:$16 sps:$4 sm:$0xff]  }
 0x8bd   :  { %6009 = vmatprep.subr.bf16.mxu1 %v10573_v18  ;;  %v10643_v18 = vld [vmem:[#allocation9 + $0xc88] ss:$16 sps:$4 sm:$0xff]  }
 0x8c0   :  { %6010 = vmatpush1.bf16.msra.mxu1 %v10571_v17  ;;  %v10648_v17 = vld [vmem:[#allocation9 + $0xcac] ss:$16 sps:$4 sm:$0xff]  }
 0x8c1   :  { %6011 = vmatprep.subr.bf16.mxu1 %v10576_v19  ;;  %v10646_v19 = vld [vmem:[#allocation9 + $0xca8] ss:$16 sps:$4 sm:$0xff]  }
 0x8c4   :  { %6012 = vmatpush1.bf16.msra.mxu1 %v10574_v40  ;;  %v10651_v40 = vld [vmem:[#allocation9 + $0xccc] ss:$16 sps:$4 sm:$0xff]  }
 0x8c5   :  { %6013 = vmatprep.subr.bf16.mxu1 %v10579_v5  ;;  %v10654_v5 = vld [vmem:[#allocation9 + $0xcec] ss:$16 sps:$4 sm:$0xff]  }
 0x8c8   :  { %6014 = vmatpush1.bf16.msra.mxu1 %v10577_v33  ;;  %v10652_v33 = vld [vmem:[#allocation9 + $0xce8] ss:$16 sps:$4 sm:$0xff]  }
 0x8c9   :  { %6015 = vmatprep.subr.bf16.mxu1 %v10582_v51  ;;  %v10657_v51 = vld [vmem:[#allocation9 + $0xd0c] ss:$16 sps:$4 sm:$0xff]  }
 0x8cc   :  { %6016 = vmatpush1.bf16.msra.mxu1 %v10580_v2  ;;  %v10655_v2 = vld [vmem:[#allocation9 + $0xd08] ss:$16 sps:$4 sm:$0xff]  }
 0x8cd   :  { %6421 = vmatprep.subr.bf16.mxu1 %v10585_v6  ;;  %v10660_v6 = vld [vmem:[#allocation9 + $0xd2c] ss:$16 sps:$4 sm:$0xff]  }
 0x8cf   :  { %6018 = vmatmul.mubr.bf16.vlgmr.msra.gmra.mrb[32].mxu1 %v12201_v4  ;;  %v10598_v4 = vld [vmem:[#allocation9 + $0xca0] ss:$16 sps:$4 sm:$0xff]  }
 0x8d0   :  { %6422 = vmatpush1.bf16.msra.mxu1 %v10583_v34  ;;  %6453 = vmatprep.mubr.bf16.mxu1 %v12217_v39  ;;  %v10658_v34 = vld [vmem:[#allocation9 + $0xd28] ss:$16 sps:$4 sm:$0xff]  }
 0x8d1   :  { %6423 = vmatprep.subr.bf16.mxu1 %v10588_v53  ;;  %v10663_v53 = vld [vmem:[#allocation9 + $0xd4c] ss:$16 sps:$4 sm:$0xff]  }
 0x8d4   :  { %6424 = vmatpush1.bf16.msra.mxu1 %v10586_v30  ;;  %v10661_v30 = vld [vmem:[#allocation9 + $0xd48] ss:$16 sps:$4 sm:$0xff]  }
 0x8d5   :  { %6425 = vmatprep.subr.bf16.mxu1 %v10591_v35  ;;  %v10666_v35 = vld [vmem:[#allocation9 + $0xd6c] ss:$16 sps:$4 sm:$0xff]  }
 0x8d8   :  { %6426 = vmatpush1.bf16.msra.mxu1 %v10589_v36  ;;  %v10664_v36 = vld [vmem:[#allocation9 + $0xd68] ss:$16 sps:$4 sm:$0xff]  }
 0x8d9   :  { %6427 = vmatprep.subr.bf16.mxu1 %v10594_v58  ;;  %v10669_v58 = vld [vmem:[#allocation9 + $0xd8c] ss:$16 sps:$4 sm:$0xff]  }
 0x8dc   :  { %6428 = vmatpush1.bf16.msra.mxu1 %v10592_v38  ;;  %v10667_v38 = vld [vmem:[#allocation9 + $0xd88] ss:$16 sps:$4 sm:$0xff]  }
 0x8dd   :  { %6429 = vmatprep.subr.bf16.mxu1 %v10597_v0  ;;  %v10672_v0 = vld [vmem:[#allocation9 + $0xdac] ss:$16 sps:$4 sm:$0xff]  }
 0x8e0   :  { %6430 = vmatpush1.bf16.msra.mxu1 %v10595_v29  ;;  %v10670_v29 = vld [vmem:[#allocation9 + $0xda8] ss:$16 sps:$4 sm:$0xff]  }
 0x8e1   :  { %6431 = vmatprep.subr.bf16.mxu1 %v10600_v57  ;;  %v10675_v57 = vld [vmem:[#allocation9 + $0xdcc] ss:$16 sps:$4 sm:$0xff]  }
 0x8e4   :  { %6432 = vmatpush1.bf16.msra.mxu1 %v10598_v4  ;;  %v10673_v4 = vld [vmem:[#allocation9 + $0xdc8] ss:$16 sps:$4 sm:$0xff]  }
 0x8e5   :  { %6433 = vmatprep.subr.bf16.mxu1 %v10603_v11  ;;  %v10678_v11 = vld [vmem:[#allocation9 + $0xdec] ss:$16 sps:$4 sm:$0xff]  }
 0x8e8   :  { %6434 = vmatpush1.bf16.msra.mxu1 %v10601_v54  ;;  %v10676_v54 = vld [vmem:[#allocation9 + $0xde8] ss:$16 sps:$4 sm:$0xff]  }
 0x8e9   :  { %6435 = vmatprep.subr.bf16.mxu1 %v10606_v46  ;;  %v10681_v46 = vld [vmem:[#allocation9 + $0xe04] ss:$16 sps:$4 sm:$0xff]  }
 0x8ec   :  { %6436 = vmatpush1.bf16.msra.mxu1 %v10604_v59  ;;  %v10679_v59 = vld [vmem:[#allocation9 + $0xe00] ss:$16 sps:$4 sm:$0xff]  }
 0x8ed   :  { %6437 = vmatprep.subr.bf16.mxu1 %v10609_v28  ;;  %v10684_v28 = vld [vmem:[#allocation9 + $0xe24] ss:$16 sps:$4 sm:$0xff]  }
 0x8f0   :  { %6438 = vmatpush1.bf16.msra.mxu1 %v10607_v42  ;;  %v10682_v42 = vld [vmem:[#allocation9 + $0xe20] ss:$16 sps:$4 sm:$0xff]  }
 0x8f1   :  { %6439 = vmatprep.subr.bf16.mxu1 %v10612_v31  ;;  %v10687_v31 = vld [vmem:[#allocation9 + $0xe44] ss:$16 sps:$4 sm:$0xff]  }
 0x8f4   :  { %6440 = vmatpush1.bf16.msra.mxu1 %v10610_v32  ;;  %v10685_v32 = vld [vmem:[#allocation9 + $0xe40] ss:$16 sps:$4 sm:$0xff]  }
 0x8f5   :  { %6441 = vmatprep.subr.bf16.mxu1 %v10615_v23  ;;  %v10690_v23 = vld [vmem:[#allocation9 + $0xe64] ss:$16 sps:$4 sm:$0xff]  }
 0x8f8   :  { %6442 = vmatpush1.bf16.msra.mxu1 %v10613_v27  ;;  %v10688_v27 = vld [vmem:[#allocation9 + $0xe60] ss:$16 sps:$4 sm:$0xff]  }
 0x8f9   :  { %6443 = vmatprep.subr.bf16.mxu1 %v10618_v3  ;;  %v10693_v3 = vld [vmem:[#allocation9 + $0xe84] ss:$16 sps:$4 sm:$0xff]  }
 0x8fc   :  { %6444 = vmatpush1.bf16.msra.mxu1 %v10616_v24  ;;  %v10691_v24 = vld [vmem:[#allocation9 + $0xe80] ss:$16 sps:$4 sm:$0xff]  }
 0x8fd   :  { %6445 = vmatprep.subr.bf16.mxu1 %v10621_v20  ;;  %v10696_v20 = vld [vmem:[#allocation9 + $0xea4] ss:$16 sps:$4 sm:$0xff]  }
 0x900   :  { %6446 = vmatpush1.bf16.msra.mxu1 %v10619_v10  ;;  %v10699_v10 = vld [vmem:[#allocation9 + $0xec4] ss:$16 sps:$4 sm:$0xff]  }
 0x901   :  { %6447 = vmatprep.subr.bf16.mxu1 %v10624_v25  ;;  %v10697_v25 = vld [vmem:[#allocation9 + $0xec0] ss:$16 sps:$4 sm:$0xff]  }
 0x904   :  { %6448 = vmatpush1.bf16.msra.mxu1 %v10622_v22  ;;  %v10702_v22 = vld [vmem:[#allocation9 + $0xee4] ss:$16 sps:$4 sm:$0xff]  }
 0x905   :  { %6449 = vmatprep.subr.bf16.mxu1 %v10627_v55  ;;  %v10700_v55 = vld [vmem:[#allocation9 + $0xee0] ss:$16 sps:$4 sm:$0xff]  }
 0x908   :  { %6450 = vmatpush1.bf16.msra.mxu1 %v10625_v37  ;;  %v10705_v37 = vld [vmem:[#allocation9 + $0xf04] ss:$16 sps:$4 sm:$0xff]  }
 0x909   :  { %6451 = vmatprep.subr.bf16.mxu1 %v10630_v16  ;;  %v10703_v16 = vld [vmem:[#allocation9 + $0xf00] ss:$16 sps:$4 sm:$0xff]  }
 0x90c   :  { %6452 = vmatpush1.bf16.msra.mxu1 %v10628_v7  ;;  %v10708_v7 = vld [vmem:[#allocation9 + $0xf24] ss:$16 sps:$4 sm:$0xff]  }
 0x90d   :  { %6464 = vmatprep.subr.bf16.mxu1 %v10633_v63  ;;  %v10706_v63 = vld [vmem:[#allocation9 + $0xf20] ss:$16 sps:$4 sm:$0xff]  }
 0x90f   :  { %6454 = vmatmul.mubr.bf16.vlgmr.msra.gmra.mrb[36].mxu1 %v12213_v26 }
 0x910   :  { %6465 = vmatpush1.bf16.msra.mxu1 %v10631_v44  ;;  %6496 = vmatprep.mubr.bf16.mxu1 %v12217_v39  ;;  %v10649_v39 = vld [vmem:[#allocation9 + $0xcc8] ss:$16 sps:$4 sm:$0xff]   ;;  %v10711_v44 = vld [vmem:[#allocation9 + $0xf44] ss:$16 sps:$4 sm:$0xff]  }
 0x911   :  { %6466 = vmatprep.subr.bf16.mxu1 %v10636_v8  ;;  %v10709_v8 = vld [vmem:[#allocation9 + $0xf40] ss:$16 sps:$4 sm:$0xff]  }
 0x914   :  { %6467 = vmatpush1.bf16.msra.mxu1 %v10634_v13  ;;  %v10714_v13 = vld [vmem:[#allocation9 + $0xf64] ss:$16 sps:$4 sm:$0xff]  }
 0x915   :  { %6468 = vmatprep.subr.bf16.mxu1 %v10639_v14  ;;  %v10712_v14 = vld [vmem:[#allocation9 + $0xf60] ss:$16 sps:$4 sm:$0xff]  }
 0x918   :  { %6469 = vmatpush1.bf16.msra.mxu1 %v10637_v47  ;;  %v10717_v47 = vld [vmem:[#allocation9 + $0xf84] ss:$16 sps:$4 sm:$0xff]  }
 0x919   :  { %6470 = vmatprep.subr.bf16.mxu1 %v10642_v15  ;;  %v10715_v15 = vld [vmem:[#allocation9 + $0xf80] ss:$16 sps:$4 sm:$0xff]  }
 0x91c   :  { %6471 = vmatpush1.bf16.msra.mxu1 %v10640_v9  ;;  %v10720_v9 = vld [vmem:[#allocation9 + $0xfa4] ss:$16 sps:$4 sm:$0xff]  }
 0x91d   :  { %6472 = vmatprep.subr.bf16.mxu1 %v10645_v49  ;;  %v10718_v49 = vld [vmem:[#allocation9 + $0xfa0] ss:$16 sps:$4 sm:$0xff]  }
 0x920   :  { %6473 = vmatpush1.bf16.msra.mxu1 %v10643_v18  ;;  %v10723_v18 = vld [vmem:[#allocation9 + $0xfc4] ss:$16 sps:$4 sm:$0xff]  }
 0x921   :  { %6474 = vmatprep.subr.bf16.mxu1 %v10648_v17  ;;  %v10721_v17 = vld [vmem:[#allocation9 + $0xfc0] ss:$16 sps:$4 sm:$0xff]  }
 0x924   :  { %6475 = vmatpush1.bf16.msra.mxu1 %v10646_v19  ;;  %v10726_v19 = vld [vmem:[#allocation9 + $0xfe4] ss:$16 sps:$4 sm:$0xff]  }
 0x925   :  { %6476 = vmatprep.subr.bf16.mxu1 %v10651_v40  ;;  %v10724_v40 = vld [vmem:[#allocation9 + $0xfe0] ss:$16 sps:$4 sm:$0xff]  }
 0x928   :  { %6477 = vmatpush1.bf16.msra.mxu1 %v10649_v39  ;;  %v10729_v39 = vld [vmem:[#allocation9 + $0xe0c] ss:$16 sps:$4 sm:$0xff]  }
 0x929   :  { %6478 = vmatprep.subr.bf16.mxu1 %v10654_v5  ;;  %v10727_v5 = vld [vmem:[#allocation9 + $0xe08] ss:$16 sps:$4 sm:$0xff]  }
 0x92c   :  { %6479 = vmatpush1.bf16.msra.mxu1 %v10652_v33  ;;  %v10732_v33 = vld [vmem:[#allocation9 + $0xe2c] ss:$16 sps:$4 sm:$0xff]  }
 0x92d   :  { %6480 = vmatprep.subr.bf16.mxu1 %v10657_v51  ;;  %v10730_v51 = vld [vmem:[#allocation9 + $0xe28] ss:$16 sps:$4 sm:$0xff]  }
 0x930   :  { %6481 = vmatpush1.bf16.msra.mxu1 %v10655_v2  ;;  %v10735_v2 = vld [vmem:[#allocation9 + $0xe4c] ss:$16 sps:$4 sm:$0xff]  }
 0x931   :  { %6482 = vmatprep.subr.bf16.mxu1 %v10660_v6  ;;  %v10733_v6 = vld [vmem:[#allocation9 + $0xe48] ss:$16 sps:$4 sm:$0xff]  }
 0x934   :  { %6483 = vmatpush1.bf16.msra.mxu1 %v10658_v34  ;;  %v10738_v34 = vld [vmem:[#allocation9 + $0xe6c] ss:$16 sps:$4 sm:$0xff]  }
 0x935   :  { %6484 = vmatprep.subr.bf16.mxu1 %v10663_v53  ;;  %v10736_v53 = vld [vmem:[#allocation9 + $0xe68] ss:$16 sps:$4 sm:$0xff]  }
 0x938   :  { %6485 = vmatpush1.bf16.msra.mxu1 %v10661_v30  ;;  %v10741_v30 = vld [vmem:[#allocation9 + $0xe8c] ss:$16 sps:$4 sm:$0xff]  }
 0x939   :  { %6486 = vmatprep.subr.bf16.mxu1 %v10666_v35  ;;  %v10739_v35 = vld [vmem:[#allocation9 + $0xe88] ss:$16 sps:$4 sm:$0xff]  }
 0x93c   :  { %6487 = vmatpush1.bf16.msra.mxu1 %v10664_v36  ;;  %v10744_v36 = vld [vmem:[#allocation9 + $0xeac] ss:$16 sps:$4 sm:$0xff]  }
 0x93d   :  { %6488 = vmatprep.subr.bf16.mxu1 %v10669_v58  ;;  %v10742_v58 = vld [vmem:[#allocation9 + $0xea8] ss:$16 sps:$4 sm:$0xff]  }
 0x940   :  { %6489 = vmatpush1.bf16.msra.mxu1 %v10667_v38  ;;  %v10747_v38 = vld [vmem:[#allocation9 + $0xecc] ss:$16 sps:$4 sm:$0xff]  }
 0x941   :  { %6490 = vmatprep.subr.bf16.mxu1 %v10672_v0  ;;  %v10750_v0 = vld [vmem:[#allocation9 + $0xeec] ss:$16 sps:$4 sm:$0xff]  }
 0x944   :  { %6491 = vmatpush1.bf16.msra.mxu1 %v10670_v29  ;;  %v10748_v29 = vld [vmem:[#allocation9 + $0xee8] ss:$16 sps:$4 sm:$0xff]  }
 0x945   :  { %6492 = vmatprep.subr.bf16.mxu1 %v10675_v57  ;;  %v10753_v57 = vld [vmem:[#allocation9 + $0xf0c] ss:$16 sps:$4 sm:$0xff]  }
 0x948   :  { %6493 = vmatpush1.bf16.msra.mxu1 %v10673_v4  ;;  %v10751_v4 = vld [vmem:[#allocation9 + $0xf08] ss:$16 sps:$4 sm:$0xff]  }
 0x949   :  { %6494 = vmatprep.subr.bf16.mxu1 %v10678_v11  ;;  %v10756_v11 = vld [vmem:[#allocation9 + $0xf2c] ss:$16 sps:$4 sm:$0xff]  }
 0x94c   :  { %6495 = vmatpush1.bf16.msra.mxu1 %v10676_v54  ;;  %v10754_v54 = vld [vmem:[#allocation9 + $0xf28] ss:$16 sps:$4 sm:$0xff]  }
 0x94d   :  { %6900 = vmatprep.subr.bf16.mxu1 %v10681_v46  ;;  %v10759_v46 = vld [vmem:[#allocation9 + $0xf4c] ss:$16 sps:$4 sm:$0xff]  }
 0x94f   :  { %6497 = vmatmul.mubr.bf16.vlgmr.msra.gmra.mrb[32].mxu1 %v12213_v26  ;;  %v10694_v26 = vld [vmem:[#allocation9 + $0xea0] ss:$16 sps:$4 sm:$0xff]  }
 0x950   :  { %6901 = vmatpush1.bf16.msra.mxu1 %v10679_v59  ;;  %6932 = vmatprep.mubr.bf16.mxu1 %v12229_v41  ;;  %v10757_v59 = vld [vmem:[#allocation9 + $0xf48] ss:$16 sps:$4 sm:$0xff]  }
 0x951   :  { %6902 = vmatprep.subr.bf16.mxu1 %v10684_v28  ;;  %v10762_v28 = vld [vmem:[#allocation9 + $0xf6c] ss:$16 sps:$4 sm:$0xff]  }
 0x954   :  { %6903 = vmatpush1.bf16.msra.mxu1 %v10682_v42  ;;  %v10760_v42 = vld [vmem:[#allocation9 + $0xf68] ss:$16 sps:$4 sm:$0xff]  }
 0x955   :  { %6904 = vmatprep.subr.bf16.mxu1 %v10687_v31  ;;  %v10765_v31 = vld [vmem:[#allocation9 + $0xf8c] ss:$16 sps:$4 sm:$0xff]  }
 0x958   :  { %6905 = vmatpush1.bf16.msra.mxu1 %v10685_v32  ;;  %v10763_v32 = vld [vmem:[#allocation9 + $0xf88] ss:$16 sps:$4 sm:$0xff]  }
 0x959   :  { %6906 = vmatprep.subr.bf16.mxu1 %v10690_v23  ;;  %v10768_v23 = vld [vmem:[#allocation9 + $0xfac] ss:$16 sps:$4 sm:$0xff]  }
 0x95c   :  { %6907 = vmatpush1.bf16.msra.mxu1 %v10688_v27  ;;  %v10766_v27 = vld [vmem:[#allocation9 + $0xfa8] ss:$16 sps:$4 sm:$0xff]  }
 0x95d   :  { %6908 = vmatprep.subr.bf16.mxu1 %v10693_v3  ;;  %v10771_v3 = vld [vmem:[#allocation9 + $0xfcc] ss:$16 sps:$4 sm:$0xff]  }
 0x960   :  { %6909 = vmatpush1.bf16.msra.mxu1 %v10691_v24  ;;  %v10769_v24 = vld [vmem:[#allocation9 + $0xfc8] ss:$16 sps:$4 sm:$0xff]  }
 0x961   :  { %6910 = vmatprep.subr.bf16.mxu1 %v10696_v20  ;;  %v10774_v20 = vld [vmem:[#allocation9 + $0xfec] ss:$16 sps:$4 sm:$0xff]  }
 0x964   :  { %6911 = vmatpush1.bf16.msra.mxu1 %v10694_v26  ;;  %v10772_v26 = vld [vmem:[#allocation9 + $0xfe8] ss:$16 sps:$4 sm:$0xff]  }
 0x965   :  { %6912 = vmatprep.subr.bf16.mxu1 %v10699_v10  ;;  %v10777_v10 = vld [vmem:[#allocation9 + $0x1004] ss:$16 sps:$4 sm:$0xff]  }
 0x968   :  { %6913 = vmatpush1.bf16.msra.mxu1 %v10697_v25  ;;  %v10775_v25 = vld [vmem:[#allocation9 + $0x1000] ss:$16 sps:$4 sm:$0xff]  }
 0x969   :  { %6914 = vmatprep.subr.bf16.mxu1 %v10702_v22  ;;  %v10780_v22 = vld [vmem:[#allocation9 + $0x1024] ss:$16 sps:$4 sm:$0xff]  }
 0x96c   :  { %6915 = vmatpush1.bf16.msra.mxu1 %v10700_v55  ;;  %v10778_v55 = vld [vmem:[#allocation9 + $0x1020] ss:$16 sps:$4 sm:$0xff]  }
 0x96d   :  { %6916 = vmatprep.subr.bf16.mxu1 %v10705_v37  ;;  %v10783_v37 = vld [vmem:[#allocation9 + $0x1044] ss:$16 sps:$4 sm:$0xff]  }
 0x970   :  { %6917 = vmatpush1.bf16.msra.mxu1 %v10703_v16  ;;  %v10781_v16 = vld [vmem:[#allocation9 + $0x1040] ss:$16 sps:$4 sm:$0xff]  }
 0x971   :  { %6918 = vmatprep.subr.bf16.mxu1 %v10708_v7  ;;  %v10786_v7 = vld [vmem:[#allocation9 + $0x1064] ss:$16 sps:$4 sm:$0xff]  }
 0x974   :  { %6919 = vmatpush1.bf16.msra.mxu1 %v10706_v63  ;;  %v10784_v63 = vld [vmem:[#allocation9 + $0x1060] ss:$16 sps:$4 sm:$0xff]  }
 0x975   :  { %6920 = vmatprep.subr.bf16.mxu1 %v10711_v44  ;;  %v10789_v44 = vld [vmem:[#allocation9 + $0x1084] ss:$16 sps:$4 sm:$0xff]  }
 0x978   :  { %6921 = vmatpush1.bf16.msra.mxu1 %v10709_v8  ;;  %v10787_v8 = vld [vmem:[#allocation9 + $0x1080] ss:$16 sps:$4 sm:$0xff]  }
 0x979   :  { %6922 = vmatprep.subr.bf16.mxu1 %v10714_v13  ;;  %v10792_v13 = vld [vmem:[#allocation9 + $0x10a4] ss:$16 sps:$4 sm:$0xff]  }
 0x97c   :  { %6923 = vmatpush1.bf16.msra.mxu1 %v10712_v14  ;;  %v10795_v14 = vld [vmem:[#allocation9 + $0x10c4] ss:$16 sps:$4 sm:$0xff]  }
 0x97d   :  { %6924 = vmatprep.subr.bf16.mxu1 %v10717_v47  ;;  %v10793_v47 = vld [vmem:[#allocation9 + $0x10c0] ss:$16 sps:$4 sm:$0xff]  }
 0x980   :  { %6925 = vmatpush1.bf16.msra.mxu1 %v10715_v15  ;;  %v10798_v15 = vld [vmem:[#allocation9 + $0x10e4] ss:$16 sps:$4 sm:$0xff]  }
 0x981   :  { %6926 = vmatprep.subr.bf16.mxu1 %v10720_v9  ;;  %v10796_v9 = vld [vmem:[#allocation9 + $0x10e0] ss:$16 sps:$4 sm:$0xff]  }
 0x984   :  { %6927 = vmatpush1.bf16.msra.mxu1 %v10718_v49  ;;  %v10801_v49 = vld [vmem:[#allocation9 + $0x1104] ss:$16 sps:$4 sm:$0xff]  }
 0x985   :  { %6928 = vmatprep.subr.bf16.mxu1 %v10723_v18  ;;  %v10799_v18 = vld [vmem:[#allocation9 + $0x1100] ss:$16 sps:$4 sm:$0xff]  }
 0x988   :  { %6929 = vmatpush1.bf16.msra.mxu1 %v10721_v17  ;;  %v10804_v17 = vld [vmem:[#allocation9 + $0x1124] ss:$16 sps:$4 sm:$0xff]  }
 0x989   :  { %6930 = vmatprep.subr.bf16.mxu1 %v10726_v19  ;;  %v10802_v19 = vld [vmem:[#allocation9 + $0x1120] ss:$16 sps:$4 sm:$0xff]  }
 0x98c   :  { %6931 = vmatpush1.bf16.msra.mxu1 %v10724_v40  ;;  %v10807_v40 = vld [vmem:[#allocation9 + $0x1144] ss:$16 sps:$4 sm:$0xff]  }
 0x98d   :  { %6943 = vmatprep.subr.bf16.mxu1 %v10729_v39  ;;  %v10805_v39 = vld [vmem:[#allocation9 + $0x1140] ss:$16 sps:$4 sm:$0xff]  }
 0x98f   :  { %6933 = vmatmul.mubr.bf16.vlgmr.msra.gmra.mrb[36].mxu1 %v12225_v21 }
 0x990   :  { %6944 = vmatpush1.bf16.msra.mxu1 %v10727_v5  ;;  %6975 = vmatprep.mubr.bf16.mxu1 %v12229_v41  ;;  %v10745_v41 = vld [vmem:[#allocation9 + $0xec8] ss:$16 sps:$4 sm:$0xff]   ;;  %v10810_v5 = vld [vmem:[#allocation9 + $0x1164] ss:$16 sps:$4 sm:$0xff]  }
 0x991   :  { %6945 = vmatprep.subr.bf16.mxu1 %v10732_v33  ;;  %v10808_v33 = vld [vmem:[#allocation9 + $0x1160] ss:$16 sps:$4 sm:$0xff]  }
 0x994   :  { %6946 = vmatpush1.bf16.msra.mxu1 %v10730_v51  ;;  %v10813_v51 = vld [vmem:[#allocation9 + $0x1184] ss:$16 sps:$4 sm:$0xff]  }
 0x995   :  { %6947 = vmatprep.subr.bf16.mxu1 %v10735_v2  ;;  %v10811_v2 = vld [vmem:[#allocation9 + $0x1180] ss:$16 sps:$4 sm:$0xff]  }
 0x998   :  { %6948 = vmatpush1.bf16.msra.mxu1 %v10733_v6  ;;  %v10816_v6 = vld [vmem:[#allocation9 + $0x11a4] ss:$16 sps:$4 sm:$0xff]  }
 0x999   :  { %6949 = vmatprep.subr.bf16.mxu1 %v10738_v34  ;;  %v10814_v34 = vld [vmem:[#allocation9 + $0x11a0] ss:$16 sps:$4 sm:$0xff]  }
 0x99c   :  { %6950 = vmatpush1.bf16.msra.mxu1 %v10736_v53  ;;  %v10819_v53 = vld [vmem:[#allocation9 + $0x11c4] ss:$16 sps:$4 sm:$0xff]  }
 0x99d   :  { %6951 = vmatprep.subr.bf16.mxu1 %v10741_v30  ;;  %v10817_v30 = vld [vmem:[#allocation9 + $0x11c0] ss:$16 sps:$4 sm:$0xff]  }
 0x9a0   :  { %6952 = vmatpush1.bf16.msra.mxu1 %v10739_v35  ;;  %v10822_v35 = vld [vmem:[#allocation9 + $0x11e4] ss:$16 sps:$4 sm:$0xff]  }
 0x9a1   :  { %6953 = vmatprep.subr.bf16.mxu1 %v10744_v36  ;;  %v10820_v36 = vld [vmem:[#allocation9 + $0x11e0] ss:$16 sps:$4 sm:$0xff]  }
 0x9a4   :  { %6954 = vmatpush1.bf16.msra.mxu1 %v10742_v58  ;;  %v10825_v58 = vld [vmem:[#allocation9 + $0x100c] ss:$16 sps:$4 sm:$0xff]  }
 0x9a5   :  { %6955 = vmatprep.subr.bf16.mxu1 %v10747_v38  ;;  %v10823_v38 = vld [vmem:[#allocation9 + $0x1008] ss:$16 sps:$4 sm:$0xff]  }
 0x9a8   :  { %6956 = vmatpush1.bf16.msra.mxu1 %v10745_v41  ;;  %v10828_v41 = vld [vmem:[#allocation9 + $0x102c] ss:$16 sps:$4 sm:$0xff]  }
 0x9a9   :  { %6957 = vmatprep.subr.bf16.mxu1 %v10750_v0  ;;  %v10826_v0 = vld [vmem:[#allocation9 + $0x1028] ss:$16 sps:$4 sm:$0xff]  }
 0x9ac   :  { %6958 = vmatpush1.bf16.msra.mxu1 %v10748_v29  ;;  %v10831_v29 = vld [vmem:[#allocation9 + $0x104c] ss:$16 sps:$4 sm:$0xff]  }
 0x9ad   :  { %6959 = vmatprep.subr.bf16.mxu1 %v10753_v57  ;;  %v10829_v57 = vld [vmem:[#allocation9 + $0x1048] ss:$16 sps:$4 sm:$0xff]  }
 0x9b0   :  { %6960 = vmatpush1.bf16.msra.mxu1 %v10751_v4  ;;  %v10834_v4 = vld [vmem:[#allocation9 + $0x106c] ss:$16 sps:$4 sm:$0xff]  }
 0x9b1   :  { %6961 = vmatprep.subr.bf16.mxu1 %v10756_v11  ;;  %v10832_v11 = vld [vmem:[#allocation9 + $0x1068] ss:$16 sps:$4 sm:$0xff]  }
 0x9b4   :  { %6962 = vmatpush1.bf16.msra.mxu1 %v10754_v54  ;;  %v10837_v54 = vld [vmem:[#allocation9 + $0x108c] ss:$16 sps:$4 sm:$0xff]  }
 0x9b5   :  { %6963 = vmatprep.subr.bf16.mxu1 %v10759_v46  ;;  %v10835_v46 = vld [vmem:[#allocation9 + $0x1088] ss:$16 sps:$4 sm:$0xff]  }
 0x9b8   :  { %6964 = vmatpush1.bf16.msra.mxu1 %v10757_v59  ;;  %v10840_v59 = vld [vmem:[#allocation9 + $0x10ac] ss:$16 sps:$4 sm:$0xff]  }
 0x9b9   :  { %6965 = vmatprep.subr.bf16.mxu1 %v10762_v28  ;;  %v10838_v28 = vld [vmem:[#allocation9 + $0x10a8] ss:$16 sps:$4 sm:$0xff]  }
 0x9bc   :  { %6966 = vmatpush1.bf16.msra.mxu1 %v10760_v42  ;;  %v10843_v42 = vld [vmem:[#allocation9 + $0x10cc] ss:$16 sps:$4 sm:$0xff]  }
 0x9bd   :  { %6967 = vmatprep.subr.bf16.mxu1 %v10765_v31  ;;  %v10846_v31 = vld [vmem:[#allocation9 + $0x10ec] ss:$16 sps:$4 sm:$0xff]  }
 0x9c0   :  { %6968 = vmatpush1.bf16.msra.mxu1 %v10763_v32  ;;  %v10844_v32 = vld [vmem:[#allocation9 + $0x10e8] ss:$16 sps:$4 sm:$0xff]  }
 0x9c1   :  { %6969 = vmatprep.subr.bf16.mxu1 %v10768_v23  ;;  %v10849_v23 = vld [vmem:[#allocation9 + $0x110c] ss:$16 sps:$4 sm:$0xff]  }
 0x9c4   :  { %6970 = vmatpush1.bf16.msra.mxu1 %v10766_v27  ;;  %v10847_v27 = vld [vmem:[#allocation9 + $0x1108] ss:$16 sps:$4 sm:$0xff]  }
 0x9c5   :  { %6971 = vmatprep.subr.bf16.mxu1 %v10771_v3  ;;  %v10852_v3 = vld [vmem:[#allocation9 + $0x112c] ss:$16 sps:$4 sm:$0xff]  }
 0x9c8   :  { %6972 = vmatpush1.bf16.msra.mxu1 %v10769_v24  ;;  %v10850_v24 = vld [vmem:[#allocation9 + $0x1128] ss:$16 sps:$4 sm:$0xff]  }
 0x9c9   :  { %6973 = vmatprep.subr.bf16.mxu1 %v10774_v20  ;;  %v10855_v20 = vld [vmem:[#allocation9 + $0x114c] ss:$16 sps:$4 sm:$0xff]  }
 0x9cc   :  { %6974 = vmatpush1.bf16.msra.mxu1 %v10772_v26  ;;  %v10853_v26 = vld [vmem:[#allocation9 + $0x1148] ss:$16 sps:$4 sm:$0xff]  }
 0x9cd   :  { %7379 = vmatprep.subr.bf16.mxu1 %v10777_v10  ;;  %v10858_v10 = vld [vmem:[#allocation9 + $0x116c] ss:$16 sps:$4 sm:$0xff]  }
 0x9cf   :  { %6976 = vmatmul.mubr.bf16.vlgmr.msra.gmra.mrb[32].mxu1 %v12225_v21  ;;  %v10790_v21 = vld [vmem:[#allocation9 + $0x10a0] ss:$16 sps:$4 sm:$0xff]  }
 0x9d0   :  { %7380 = vmatpush1.bf16.msra.mxu1 %v10775_v25  ;;  %7411 = vmatprep.mubr.bf16.mxu1 %v12241_v43  ;;  %v10856_v25 = vld [vmem:[#allocation9 + $0x1168] ss:$16 sps:$4 sm:$0xff]  }
 0x9d1   :  { %7381 = vmatprep.subr.bf16.mxu1 %v10780_v22  ;;  %v10861_v22 = vld [vmem:[#allocation9 + $0x118c] ss:$16 sps:$4 sm:$0xff]  }
 0x9d4   :  { %7382 = vmatpush1.bf16.msra.mxu1 %v10778_v55  ;;  %v10859_v55 = vld [vmem:[#allocation9 + $0x1188] ss:$16 sps:$4 sm:$0xff]  }
 0x9d5   :  { %7383 = vmatprep.subr.bf16.mxu1 %v10783_v37  ;;  %v10864_v37 = vld [vmem:[#allocation9 + $0x11ac] ss:$16 sps:$4 sm:$0xff]  }
 0x9d8   :  { %7384 = vmatpush1.bf16.msra.mxu1 %v10781_v16  ;;  %v10862_v16 = vld [vmem:[#allocation9 + $0x11a8] ss:$16 sps:$4 sm:$0xff]  }
 0x9d9   :  { %7385 = vmatprep.subr.bf16.mxu1 %v10786_v7  ;;  %v10867_v7 = vld [vmem:[#allocation9 + $0x11cc] ss:$16 sps:$4 sm:$0xff]  }
 0x9dc   :  { %7386 = vmatpush1.bf16.msra.mxu1 %v10784_v63  ;;  %v10865_v63 = vld [vmem:[#allocation9 + $0x11c8] ss:$16 sps:$4 sm:$0xff]  }
 0x9dd   :  { %7387 = vmatprep.subr.bf16.mxu1 %v10789_v44  ;;  %v10870_v44 = vld [vmem:[#allocation9 + $0x11ec] ss:$16 sps:$4 sm:$0xff]  }
 0x9e0   :  { %7388 = vmatpush1.bf16.msra.mxu1 %v10787_v8  ;;  %v10868_v8 = vld [vmem:[#allocation9 + $0x11e8] ss:$16 sps:$4 sm:$0xff]  }
 0x9e1   :  { %7389 = vmatprep.subr.bf16.mxu1 %v10792_v13  ;;  %v10873_v13 = vld [vmem:[#allocation9 + $0x1204] ss:$16 sps:$4 sm:$0xff]  }
 0x9e4   :  { %7390 = vmatpush1.bf16.msra.mxu1 %v10790_v21  ;;  %v10871_v21 = vld [vmem:[#allocation9 + $0x1200] ss:$16 sps:$4 sm:$0xff]  }
 0x9e5   :  { %7391 = vmatprep.subr.bf16.mxu1 %v10795_v14  ;;  %v10876_v14 = vld [vmem:[#allocation9 + $0x1224] ss:$16 sps:$4 sm:$0xff]  }
 0x9e8   :  { %7392 = vmatpush1.bf16.msra.mxu1 %v10793_v47  ;;  %v10967_v47 = vld [vmem:[%s12434_s7 + $0x40] sm:$0xff]  }
 0x9e9   :  { %7393 = vmatprep.subr.bf16.mxu1 %v10798_v15  ;;  %v10968_v15 = vld [vmem:[%s12434_s7] sm:$0xff]   ;;  %9269 = vmatprep.subr.bf16.mxu0 %v10967_v47  ;;  %v10943_v47 = vld [vmem:[#allocation9 + $0x1308] ss:$16 sps:$4 sm:$0xff]  }
 0x9ea   :  { %9270 = vmatpush3.bf16.msra.mxu0 %v10968_v15  ;;  %v10948_v15 = vld [vmem:[#allocation9 + $0x132c] ss:$16 sps:$4 sm:$0xff]  }
 0x9ec   :  { %7394 = vmatpush1.bf16.msra.mxu1 %v10796_v9  ;;  %v10969_v9 = vld [vmem:[%s12434_s7 + $0x48] sm:$0xff]  }
 0x9ed   :  { %7395 = vmatprep.subr.bf16.mxu1 %v10801_v49  ;;  %v10874_v49 = vld [vmem:[#allocation9 + $0x1220] ss:$16 sps:$4 sm:$0xff]   ;;  %9271 = vmatprep.subr.bf16.mxu0 %v10969_v9  ;;  %v10946_v9 = vld [vmem:[#allocation9 + $0x1328] ss:$16 sps:$4 sm:$0xff]  }
 0x9f0   :  { %7396 = vmatpush1.bf16.msra.mxu1 %v10799_v18  ;;  %v10879_v18 = vld [vmem:[#allocation9 + $0x1244] ss:$16 sps:$4 sm:$0xff]  }
 0x9f1   :  { %7397 = vmatprep.subr.bf16.mxu1 %v10804_v17  ;;  %v10971_v17 = vld [vmem:[%s12434_s7 + $0x50] sm:$0xff]  }
 0x9f4   :  { %7398 = vmatpush1.bf16.msra.mxu1 %v10802_v19  ;;  %v10877_v19 = vld [vmem:[#allocation9 + $0x1240] ss:$16 sps:$4 sm:$0xff]  }
 0x9f5   :  { %7399 = vmatprep.subr.bf16.mxu1 %v10807_v40  ;;  %v10882_v40 = vld [vmem:[#allocation9 + $0x1264] ss:$16 sps:$4 sm:$0xff]  }
 0x9f8   :  { %7400 = vmatpush1.bf16.msra.mxu1 %v10805_v39  ;;  %v10972_v39 = vld [vmem:[%s12434_s7 + $0x10] sm:$0xff]  }
 0x9f9   :  { %7401 = vmatprep.subr.bf16.mxu1 %v10810_v5  ;;  %v10973_v5 = vld [vmem:[%s12434_s7 + $0x58] sm:$0xff]  }
 0x9fc   :  { %7402 = vmatpush1.bf16.msra.mxu1 %v10808_v33  ;;  %v10880_v33 = vld [vmem:[#allocation9 + $0x1260] ss:$16 sps:$4 sm:$0xff]  }
 0x9fd   :  { %7403 = vmatprep.subr.bf16.mxu1 %v10813_v51  ;;  %v10885_v51 = vld [vmem:[#allocation9 + $0x1284] ss:$16 sps:$4 sm:$0xff]  }
 0xa00   :  { %7404 = vmatpush1.bf16.msra.mxu1 %v10811_v2  ;;  %v10974_v2 = vld [vmem:[%s12434_s7 + $0x18] sm:$0xff]  }
 0xa01   :  { %7405 = vmatprep.subr.bf16.mxu1 %v10816_v6  ;;  %v10975_v6 = vld [vmem:[%s12434_s7 + $0x60] sm:$0xff]  }
 0xa04   :  { %7406 = vmatpush1.bf16.msra.mxu1 %v10814_v34  ;;  %v10883_v34 = vld [vmem:[#allocation9 + $0x1280] ss:$16 sps:$4 sm:$0xff]  }
 0xa05   :  { %7407 = vmatprep.subr.bf16.mxu1 %v10819_v53  ;;  %v10888_v53 = vld [vmem:[#allocation9 + $0x12a4] ss:$16 sps:$4 sm:$0xff]  }
 0xa08   :  { %7408 = vmatpush1.bf16.msra.mxu1 %v10817_v30  ;;  %v10976_v30 = vld [vmem:[%s12434_s7 + $0x20] sm:$0xff]  }
 0xa09   :  { %7409 = vmatprep.subr.bf16.mxu1 %v10822_v35  ;;  %v10886_v35 = vld [vmem:[#allocation9 + $0x12a0] ss:$16 sps:$4 sm:$0xff]  }
 0xa0c   :  { %7410 = vmatpush1.bf16.msra.mxu1 %v10820_v36  ;;  %v10891_v36 = vld [vmem:[#allocation9 + $0x12c4] ss:$16 sps:$4 sm:$0xff]  }
 0xa0d   :  { %7422 = vmatprep.subr.bf16.mxu1 %v10825_v58  ;;  %v10889_v58 = vld [vmem:[#allocation9 + $0x12c0] ss:$16 sps:$4 sm:$0xff]  }
 0xa0f   :  { %7412 = vmatmul.mubr.bf16.vlgmr.msra.gmra.mrb[36].mxu1 %v12237_v12 }
 0xa10   :  { %7423 = vmatpush1.bf16.msra.mxu1 %v10823_v38  ;;  %7454 = vmatprep.mubr.bf16.mxu1 %v12241_v43  ;;  %v10841_v43 = vld [vmem:[#allocation9 + $0x10c8] ss:$16 sps:$4 sm:$0xff]   ;;  %v10894_v38 = vld [vmem:[#allocation9 + $0x12e4] ss:$16 sps:$4 sm:$0xff]  }
 0xa11   :  { %7424 = vmatprep.subr.bf16.mxu1 %v10828_v41  ;;  %v10892_v41 = vld [vmem:[#allocation9 + $0x12e0] ss:$16 sps:$4 sm:$0xff]  }
 0xa14   :  { %7425 = vmatpush1.bf16.msra.mxu1 %v10826_v0  ;;  %v10897_v0 = vld [vmem:[#allocation9 + $0x1304] ss:$16 sps:$4 sm:$0xff]  }
 0xa15   :  { %7426 = vmatprep.subr.bf16.mxu1 %v10831_v29  ;;  %v10895_v29 = vld [vmem:[#allocation9 + $0x1300] ss:$16 sps:$4 sm:$0xff]  }
 0xa18   :  { %7427 = vmatpush1.bf16.msra.mxu1 %v10829_v57  ;;  %v10900_v57 = vld [vmem:[#allocation9 + $0x1324] ss:$16 sps:$4 sm:$0xff]  }
 0xa19   :  { %7428 = vmatprep.subr.bf16.mxu1 %v10834_v4  ;;  %v10898_v4 = vld [vmem:[#allocation9 + $0x1320] ss:$16 sps:$4 sm:$0xff]  }
 0xa1c   :  { %7429 = vmatpush1.bf16.msra.mxu1 %v10832_v11  ;;  %v10903_v11 = vld [vmem:[#allocation9 + $0x1344] ss:$16 sps:$4 sm:$0xff]  }
 0xa1d   :  { %7430 = vmatprep.subr.bf16.mxu1 %v10837_v54  ;;  %v10901_v54 = vld [vmem:[#allocation9 + $0x1340] ss:$16 sps:$4 sm:$0xff]  }
 0xa20   :  { %7431 = vmatpush1.bf16.msra.mxu1 %v10835_v46  ;;  %v10906_v46 = vld [vmem:[#allocation9 + $0x1364] ss:$16 sps:$4 sm:$0xff]  }
 0xa21   :  { %7432 = vmatprep.subr.bf16.mxu1 %v10840_v59  ;;  %v10904_v59 = vld [vmem:[#allocation9 + $0x1360] ss:$16 sps:$4 sm:$0xff]  }
 0xa24   :  { %7433 = vmatpush1.bf16.msra.mxu1 %v10838_v28  ;;  %v10909_v28 = vld [vmem:[#allocation9 + $0x1384] ss:$16 sps:$4 sm:$0xff]  }
 0xa25   :  { %7434 = vmatprep.subr.bf16.mxu1 %v10843_v42  ;;  %v10907_v42 = vld [vmem:[#allocation9 + $0x1380] ss:$16 sps:$4 sm:$0xff]  }
 0xa28   :  { %7435 = vmatpush1.bf16.msra.mxu1 %v10841_v43  ;;  %v10912_v43 = vld [vmem:[#allocation9 + $0x13a4] ss:$16 sps:$4 sm:$0xff]  }
 0xa29   :  { %7436 = vmatprep.subr.bf16.mxu1 %v10846_v31  ;;  %v10910_v31 = vld [vmem:[#allocation9 + $0x13a0] ss:$16 sps:$4 sm:$0xff]  }
 0xa2c   :  { %7437 = vmatpush1.bf16.msra.mxu1 %v10844_v32  ;;  %v10915_v32 = vld [vmem:[#allocation9 + $0x13c4] ss:$16 sps:$4 sm:$0xff]  }
 0xa2d   :  { %7438 = vmatprep.subr.bf16.mxu1 %v10849_v23  ;;  %v10913_v23 = vld [vmem:[#allocation9 + $0x13c0] ss:$16 sps:$4 sm:$0xff]  }
 0xa30   :  { %7439 = vmatpush1.bf16.msra.mxu1 %v10847_v27  ;;  %v10918_v27 = vld [vmem:[#allocation9 + $0x13e4] ss:$16 sps:$4 sm:$0xff]  }
 0xa31   :  { %7440 = vmatprep.subr.bf16.mxu1 %v10852_v3  ;;  %v10916_v3 = vld [vmem:[#allocation9 + $0x13e0] ss:$16 sps:$4 sm:$0xff]  }
 0xa34   :  { %7441 = vmatpush1.bf16.msra.mxu1 %v10850_v24  ;;  %v10921_v24 = vld [vmem:[#allocation9 + $0x120c] ss:$16 sps:$4 sm:$0xff]  }
 0xa35   :  { %7442 = vmatprep.subr.bf16.mxu1 %v10855_v20  ;;  %v10919_v20 = vld [vmem:[#allocation9 + $0x1208] ss:$16 sps:$4 sm:$0xff]  }
 0xa38   :  { %7443 = vmatpush1.bf16.msra.mxu1 %v10853_v26  ;;  %v10924_v26 = vld [vmem:[#allocation9 + $0x122c] ss:$16 sps:$4 sm:$0xff]  }
 0xa39   :  { %7444 = vmatprep.subr.bf16.mxu1 %v10858_v10  ;;  %v10922_v10 = vld [vmem:[#allocation9 + $0x1228] ss:$16 sps:$4 sm:$0xff]  }
 0xa3c   :  { %7445 = vmatpush1.bf16.msra.mxu1 %v10856_v25  ;;  %v10927_v25 = vld [vmem:[#allocation9 + $0x124c] ss:$16 sps:$4 sm:$0xff]  }
 0xa3d   :  { %7446 = vmatprep.subr.bf16.mxu1 %v10861_v22  ;;  %v10925_v22 = vld [vmem:[#allocation9 + $0x1248] ss:$16 sps:$4 sm:$0xff]  }
 0xa40   :  { %7447 = vmatpush1.bf16.msra.mxu1 %v10859_v55  ;;  %v10930_v55 = vld [vmem:[#allocation9 + $0x126c] ss:$16 sps:$4 sm:$0xff]  }
 0xa41   :  { %7448 = vmatprep.subr.bf16.mxu1 %v10864_v37  ;;  %v10928_v37 = vld [vmem:[#allocation9 + $0x1268] ss:$16 sps:$4 sm:$0xff]  }
 0xa44   :  { %7449 = vmatpush1.bf16.msra.mxu1 %v10862_v16  ;;  %v10933_v16 = vld [vmem:[#allocation9 + $0x128c] ss:$16 sps:$4 sm:$0xff]  }
 0xa45   :  { %7450 = vmatprep.subr.bf16.mxu1 %v10867_v7  ;;  %v10931_v7 = vld [vmem:[#allocation9 + $0x1288] ss:$16 sps:$4 sm:$0xff]  }
 0xa48   :  { %7451 = vmatpush1.bf16.msra.mxu1 %v10865_v63  ;;  %v10936_v63 = vld [vmem:[#allocation9 + $0x12ac] ss:$16 sps:$4 sm:$0xff]  }
 0xa49   :  { %7452 = vmatprep.subr.bf16.mxu1 %v10870_v44  ;;  %v10934_v44 = vld [vmem:[#allocation9 + $0x12a8] ss:$16 sps:$4 sm:$0xff]  }
 0xa4c   :  { %7453 = vmatpush1.bf16.msra.mxu1 %v10868_v8  ;;  %v10939_v8 = vld [vmem:[#allocation9 + $0x12cc] ss:$16 sps:$4 sm:$0xff]  }
 0xa4d   :  { %7858 = vmatprep.subr.bf16.mxu1 %v10873_v13  ;;  %v10942_v13 = vld [vmem:[#allocation9 + $0x12ec] ss:$16 sps:$4 sm:$0xff]  }
 0xa4f   :  { %7455 = vmatmul.mubr.bf16.vlgmr.msra.gmra.mrb[32].mxu1 %v12237_v12  ;;  %v10970_v12 = vld [vmem:[%s12434_s7 + $0x8] sm:$0xff]  }
 0xa50   :  { %7859 = vmatpush1.bf16.msra.mxu1 %v10871_v21  ;;  %7890 = vmatprep.mubr.bf16.mxu1 %v12253_v52  ;;  %v10940_v21 = vld [vmem:[#allocation9 + $0x12e8] ss:$16 sps:$4 sm:$0xff]  }
 0xa51   :  { %7860 = vmatprep.subr.bf16.mxu1 %v10876_v14  ;;  %9272 = vmatpush3.bf16.msra.mxu0 %v10970_v12  ;;  %v10945_v14 = vld [vmem:[#allocation9 + $0x130c] ss:$16 sps:$4 sm:$0xff]  }
 0xa52   :  { %9273 = vmatprep.subr.bf16.mxu0 %v10971_v17  ;;  %v10954_v12 = vld [vmem:[#allocation9 + $0x136c] ss:$16 sps:$4 sm:$0xff]   ;;  %v10952_v17 = vld [vmem:[#allocation9 + $0x1368] ss:$16 sps:$4 sm:$0xff]  }
 0xa54   :  { %7861 = vmatpush1.bf16.msra.mxu1 %v10874_v49  ;;  %v10951_v49 = vld [vmem:[#allocation9 + $0x134c] ss:$16 sps:$4 sm:$0xff]  }
 0xa55   :  { %7862 = vmatprep.subr.bf16.mxu1 %v10879_v18  ;;  %9274 = vmatpush3.bf16.msra.mxu0 %v10972_v39  ;;  %v10949_v18 = vld [vmem:[#allocation9 + $0x1348] ss:$16 sps:$4 sm:$0xff]   ;;  %v10960_v39 = vld [vmem:[#allocation9 + $0x13ac] ss:$16 sps:$4 sm:$0xff]  }
 0xa56   :  { %9275 = vmatprep.subr.bf16.mxu0 %v10973_v5  ;;  %v10958_v5 = vld [vmem:[#allocation9 + $0x13a8] ss:$16 sps:$4 sm:$0xff]  }
 0xa58   :  { %7863 = vmatpush1.bf16.msra.mxu1 %v10877_v19  ;;  %v10957_v19 = vld [vmem:[#allocation9 + $0x138c] ss:$16 sps:$4 sm:$0xff]  }
 0xa59   :  { %7864 = vmatprep.subr.bf16.mxu1 %v10882_v40  ;;  %9276 = vmatpush3.bf16.msra.mxu0 %v10974_v2  ;;  %v10955_v40 = vld [vmem:[#allocation9 + $0x1388] ss:$16 sps:$4 sm:$0xff]   ;;  %v10966_v2 = vld [vmem:[#allocation9 + $0x13ec] ss:$16 sps:$4 sm:$0xff]  }
 0xa5a   :  { %9277 = vmatprep.subr.bf16.mxu0 %v10975_v6  ;;  %v10964_v6 = vld [vmem:[#allocation9 + $0x13e8] ss:$16 sps:$4 sm:$0xff]  }
 0xa5c   :  { %7865 = vmatpush1.bf16.msra.mxu1 %v10880_v33  ;;  %v10963_v33 = vld [vmem:[#allocation9 + $0x13cc] ss:$16 sps:$4 sm:$0xff]  }
 0xa5d   :  { %7866 = vmatprep.subr.bf16.mxu1 %v10885_v51  ;;  %9278 = vmatpush3.bf16.msra.mxu0 %v10976_v30  ;;  %v10961_v51 = vld [vmem:[#allocation9 + $0x13c8] ss:$16 sps:$4 sm:$0xff]   ;;  %v10979_v30 = vld [vmem:[%s12434_s7 + $0x70] sm:$0xff]  }
 0xa60   :  { %7867 = vmatpush1.bf16.msra.mxu1 %v10883_v34  ;;  %v10977_v34 = vld [vmem:[%s12434_s7 + $0x68] sm:$0xff]  }
 0xa61   :  { %7868 = vmatprep.subr.bf16.mxu1 %v10888_v53  ;;  %v10978_v53 = vld [vmem:[%s12434_s7 + $0x28] sm:$0xff]   ;;  %9279 = vmatprep.subr.bf16.mxu0 %v10977_v34 }
 0xa62   :  { %9280 = vmatpush3.bf16.msra.mxu0 %v10978_v53 }
 0xa63   :  { %9281 = vmatprep.subr.bf16.mxu0 %v10979_v30 }
 0xa64   :  { %7869 = vmatpush1.bf16.msra.mxu1 %v10886_v35  ;;  %v10980_v35 = vld [vmem:[%s12434_s7 + $0x30] sm:$0xff]  }
 0xa65   :  { %7870 = vmatprep.subr.bf16.mxu1 %v10891_v36  ;;  %v10982_v36 = vld [vmem:[%s12434_s7 + $0x38] sm:$0xff]  }
 0xa66   :  { %9282 = vmatpush3.bf16.msra.mxu0 %v10980_v35  ;;  %v9236_v35 = vld [vmem:[#allocation12] ss:$0 sm:$0xff] }
 0xa68   :  { %7871 = vmatpush1.bf16.msra.mxu1 %v10889_v58  ;;  %v10983_v58 = vld [vmem:[%s12434_s7 + $0xc0] sm:$0xff]  }
 0xa69   :  { %7872 = vmatprep.subr.bf16.mxu1 %v10894_v38  ;;  %v7952_v38 = vld [vmem:[#allocation10] sm:$0xf] }
 0xa6c   :  { %7873 = vmatpush1.bf16.msra.mxu1 %v10892_v41  ;;  %v7957_v41 = vrot.slane %v7952_v38, %v3071_v62 }
 0xa6d   :  { %7874 = vmatprep.subr.bf16.mxu1 %v10897_v0 }
 0xa70   :  { %7875 = vmatpush1.bf16.msra.mxu1 %v10895_v29  ;;  %v7961_v29 = vrot.slane %v7952_v38, %v3075_v1 }
 0xa71   :  { %7876 = vmatprep.subr.bf16.mxu1 %v10900_v57 }
 0xa74   :  { %7877 = vmatpush1.bf16.msra.mxu1 %v10898_v4 }
 0xa75   :  { %7878 = vmatprep.subr.bf16.mxu1 %v10903_v11 }
 0xa78   :  { %7879 = vmatpush1.bf16.msra.mxu1 %v10901_v54 }
 0xa79   :  { %7880 = vmatprep.subr.bf16.mxu1 %v10906_v46 }
 0xa7c   :  { %7881 = vmatpush1.bf16.msra.mxu1 %v10904_v59 }
 0xa7d   :  { %7882 = vmatprep.subr.bf16.mxu1 %v10909_v28 }
 0xa80   :  { %7883 = vmatpush1.bf16.msra.mxu1 %v10907_v42 }
 0xa81   :  { %7884 = vmatprep.subr.bf16.mxu1 %v10912_v43 }
 0xa84   :  { %7885 = vmatpush1.bf16.msra.mxu1 %v10910_v31 }
 0xa85   :  { %7886 = vmatprep.subr.bf16.mxu1 %v10915_v32 }
 0xa88   :  { %7887 = vmatpush1.bf16.msra.mxu1 %v10913_v23 }
 0xa89   :  { %7888 = vmatprep.subr.bf16.mxu1 %v10918_v27 }
 0xa8c   :  { %7889 = vmatpush1.bf16.msra.mxu1 %v10916_v3 }
 0xa8d   :  { %7901 = vmatprep.subr.bf16.mxu1 %v10921_v24 }
 0xa8f   :  { %7891 = vmatmul.mubr.bf16.vlgmr.msra.gmra.mrb[36].mxu1 %v12249_v45 }
 0xa90   :  { %7902 = vmatpush1.bf16.msra.mxu1 %v10919_v20  ;;  %7933 = vmatprep.mubr.bf16.mxu1 %v12253_v52  ;;  %v10937_v52 = vld [vmem:[#allocation9 + $0x12c8] ss:$16 sps:$4 sm:$0xff]   ;;  %v10988_v20 = vld [vmem:[%s12434_s7 + $0x90] sm:$0xff]  }
 0xa91   :  { %7903 = vmatprep.subr.bf16.mxu1 %v10924_v26  ;;  %v10989_v26 = vld [vmem:[%s12434_s7 + $0xd8] sm:$0xff]  }
 0xa94   :  { %7904 = vmatpush1.bf16.msra.mxu1 %v10922_v10  ;;  %v10990_v10 = vld [vmem:[%s12434_s7 + $0x98] sm:$0xff]  }
 0xa95   :  { %7905 = vmatprep.subr.bf16.mxu1 %v10927_v25  ;;  %v10991_v25 = vld [vmem:[%s12434_s7 + $0xe0] sm:$0xff]  }
 0xa98   :  { %7906 = vmatpush1.bf16.msra.mxu1 %v10925_v22  ;;  %v10992_v22 = vld [vmem:[%s12434_s7 + $0xa0] sm:$0xff]  }
 0xa99   :  { %7907 = vmatprep.subr.bf16.mxu1 %v10930_v55  ;;  %v10993_v55 = vld [vmem:[%s12434_s7 + $0xe8] sm:$0xff]  }
 0xa9c   :  { %7908 = vmatpush1.bf16.msra.mxu1 %v10928_v37  ;;  %v10994_v37 = vld [vmem:[%s12434_s7 + $0xa8] sm:$0xff]  }
 0xa9d   :  { %7909 = vmatprep.subr.bf16.mxu1 %v10933_v16  ;;  %v10995_v16 = vld [vmem:[%s12434_s7 + $0xf0] sm:$0xff]  }
 0xaa0   :  { %7910 = vmatpush1.bf16.msra.mxu1 %v10931_v7  ;;  %v10996_v7 = vld [vmem:[%s12434_s7 + $0xb0] sm:$0xff]  }
 0xaa1   :  { %7911 = vmatprep.subr.bf16.mxu1 %v10936_v63  ;;  %v10997_v63 = vld [vmem:[%s12434_s7 + $0xf8] sm:$0xff]  }
 0xaa4   :  { %7912 = vmatpush1.bf16.msra.mxu1 %v10934_v44  ;;  %v10998_v44 = vld [vmem:[%s12434_s7 + $0xb8] sm:$0xff]  }
 0xaa5   :  { %7913 = vmatprep.subr.bf16.mxu1 %v10939_v8  ;;  %v7964_v8 = vsub.s32 2, %v12137_v56 }
 0xaa8   :  { %7914 = vmatpush1.bf16.msra.mxu1 %v10937_v52  ;;  %v7968_v52 = vsub.s32 3, %v12137_v56 }
 0xaa9   :  { %7915 = vmatprep.subr.bf16.mxu1 %v10942_v13  ;;  %v7965_v13 = vrot.slane %v7952_v38, %v7964_v8 }
 0xaac   :  { %7916 = vmatpush1.bf16.msra.mxu1 %v10940_v21  ;;  %v7969_v21 = vrot.slane %v7952_v38, %v7968_v52 }
 0xaad   :  { %7917 = vmatprep.subr.bf16.mxu1 %v10945_v14 }
 0xab0   :  { %7918 = vmatpush1.bf16.msra.mxu1 %v10943_v47 }
 0xab1   :  { %7919 = vmatprep.subr.bf16.mxu1 %v10948_v15 }
 0xab4   :  { %7920 = vmatpush1.bf16.msra.mxu1 %v10946_v9 }
 0xab5   :  { %7921 = vmatprep.subr.bf16.mxu1 %v10951_v49 }
 0xab8   :  { %7922 = vmatpush1.bf16.msra.mxu1 %v10949_v18 }
 0xab9   :  { %7923 = vmatprep.subr.bf16.mxu1 %v10954_v12 }
 0xabc   :  { %7924 = vmatpush1.bf16.msra.mxu1 %v10952_v17 }
 0xabd   :  { %7925 = vmatprep.subr.bf16.mxu1 %v10957_v19 }
 0xac0   :  { %7926 = vmatpush1.bf16.msra.mxu1 %v10955_v40 }
 0xac1   :  { %7927 = vmatprep.subr.bf16.mxu1 %v10960_v39 }
 0xac4   :  { %7928 = vmatpush1.bf16.msra.mxu1 %v10958_v5 }
 0xac5   :  { %7929 = vmatprep.subr.bf16.mxu1 %v10963_v33 }
 0xac8   :  { %7930 = vmatpush1.bf16.msra.mxu1 %v10961_v51 }
 0xac9   :  { %7931 = vmatprep.subr.bf16.mxu1 %v10966_v2 }
 0xacc   :  { %7932 = vmatpush1.bf16.msra.mxu1 %v10964_v6 }
 0xacf   :  { %7934 = vmatmul.mubr.bf16.vlgmr.msra.gmra.mrb[32].mxu1 %v12249_v45  ;;  %v10981_v45 = vld [vmem:[%s12434_s7 + $0x78] sm:$0xff]  }
 0xad0   :  { %9283 = vmatprep.subr.bf16.mxu0 %v10981_v45 }
 0xad1   :  { %9284 = vmatpush3.bf16.msra.mxu0 %v10982_v36 }
 0xad2   :  { %9291 = vmatprep.subr.bf16.mxu0 %v10983_v58 }
 0xb62   :  { %v7892_v0 = vpop.f32.mrb[36].mxu1 }
 0xb63   :  { %v9361_v57 = vadd.f32 %v7892_v0, %v12272_v48  ;;  %v7894_v4 = vpop.f32.mrb[37].mxu1  ;;  %v10984_v48 = vld [vmem:[%s12434_s7 + $0x80] sm:$0xff]  }
 0xb64   :  { %v9362_v11 = vadd.f32 %v7894_v4, %v12274_v50  ;;  %v7896_v54 = vpop.f32.mrb[38].mxu1  ;;  %v10985_v50 = vld [vmem:[%s12434_s7 + $0xc8] sm:$0xff]  }
 0xb65   :  { %v7974_v46 = vadd.f32 %v9361_v57, %v7957_v41  ;;  %v9363_v59 = vadd.f32 %v7896_v54, %v12276_v60  ;;  %v7898_v28 = vpop.f32.mrb[39].mxu1  ;;  %v10986_v60 = vld [vmem:[%s12434_s7 + $0x88] sm:$0xff]  }
 0xb66   :  { %v7975_v42 = vadd.f32 %v9362_v11, %v7961_v29  ;;  %v9364_v43 = vadd.f32 %v7898_v28, %v12278_v61  ;;  %v10987_v61 = vld [vmem:[%s12434_s7 + $0xd0] sm:$0xff]  }
 0xb67   :  { %v7978_v31 = vadd.f32 %v9363_v59, %v7957_v41  ;;  %v7982_v62 = vmax.f32 %v7974_v46, 0.0 }
 0xb68   :  { %v7979_v32 = vadd.f32 %v9364_v43, %v7961_v29  ;;  %v7983_v27 = vmax.f32 %v7975_v42, 0.0 }
 0xb69   :  { %v7986_v23 = vmax.f32 %v7978_v31, 0.0 }
 0xb6a   :  { %v7987_v3 = vmax.f32 %v7979_v32, 0.0 }
 0xb6b   :  { %v7990_v1 = vpack.c.bf16 %v7986_v23, %v7982_v62 }
 0xb6c   :  { %v7991_v24 = vpack.c.bf16 %v7987_v3, %v7983_v27 }
 0xb6e   :  { %8289 = vmatprep.mubr.bf16.mxu0 %v7991_v24 }
 0xb6f   :  { %8290 = vmatmul.mubr.bf16.vlgmr.msra.gmra.mrb[140].mxu0 %v7990_v1 }
 0xb70   :  { %9292 = vmatpush3.bf16.msra.mxu0 %v10984_v48 }
 0xb71   :  { %9293 = vmatprep.subr.bf16.mxu0 %v10985_v50 }
 0xb74   :  { %9294 = vmatpush3.bf16.msra.mxu0 %v10986_v60 }
 0xb75   :  { %9295 = vmatprep.subr.bf16.mxu0 %v10987_v61 }
 0xb78   :  { %9296 = vmatpush3.bf16.msra.mxu0 %v10988_v20 }
 0xb79   :  { %9297 = vmatprep.subr.bf16.mxu0 %v10989_v26 }
 0xb7c   :  { %9298 = vmatpush3.bf16.msra.mxu0 %v10990_v10 }
 0xb7d   :  { %9299 = vmatprep.subr.bf16.mxu0 %v10991_v25 }
 0xb80   :  { %9300 = vmatpush3.bf16.msra.mxu0 %v10992_v22 }
 0xb81   :  { %9301 = vmatprep.subr.bf16.mxu0 %v10993_v55 }
 0xb84   :  { %9302 = vmatpush3.bf16.msra.mxu0 %v10994_v37 }
 0xb85   :  { %9303 = vmatprep.subr.bf16.mxu0 %v10995_v16 }
 0xb88   :  { %9304 = vmatpush3.bf16.msra.mxu0 %v10996_v7 }
 0xb89   :  { %9305 = vmatprep.subr.bf16.mxu0 %v10997_v63 }
 0xb8c   :  { %9306 = vmatpush3.bf16.msra.mxu0 %v10998_v44 }
 0xba2   :  { %v7935_v14 = vpop.f32.mrb[32].mxu1 }
 0xba3   :  { %v7976_v47 = vadd.f32 %v7965_v13, %v7935_v14  ;;  %v7937_v15 = vpop.f32.mrb[33].mxu1 }
 0xba4   :  { %v7977_v9 = vadd.f32 %v7969_v21, %v7937_v15  ;;  %v7939_v49 = vpop.f32.mrb[34].mxu1 }
 0xba5   :  { %v7980_v18 = vadd.f32 %v7965_v13, %v7939_v49  ;;  %v7941_v12 = vpop.f32.mrb[35].mxu1  ;;  %v7984_v19 = vmax.f32 %v7976_v47, 0.0 }
 0xba6   :  { %v7981_v17 = vadd.f32 %v7969_v21, %v7941_v12  ;;  %v7985_v39 = vmax.f32 %v7977_v9, 0.0 }
 0xba7   :  { %v7988_v40 = vmax.f32 %v7980_v18, 0.0 }
 0xba8   :  { %v7989_v5 = vmax.f32 %v7981_v17, 0.0 }
 0xba9   :  { %v7992_v33 = vpack.c.bf16 %v7988_v40, %v7984_v19 }
 0xbaa   :  { %v7993_v51 = vpack.c.bf16 %v7989_v5, %v7985_v39 }
 0xbac   :  { %8330 = vmatprep.mubr.bf16.mxu0 %v7993_v51 }
 0xbad   :  { %8331 = vmatmul.mubr.bf16.vlgmr.msra.gmra.mrb[144].mxu0 %v7992_v33 }
 0xc42   :  { %v9285_v2 = vpop.f32.mrb[140].mxu0 }
 0xc43   :  { %v9286_v56 = vpop.f32.mrb[141].mxu0 }
 0xc44   :  { %v9287_v6 = vadd.f32 %v9286_v56, %v9285_v2  ;;  %v9288_v34 = vpop.f32.mrb[142].mxu0 }
 0xc45   :  { %v9289_v53 = vpop.f32.mrb[143].mxu0 }
 0xc46   :  { %v9290_v30 = vadd.f32 %v9289_v53, %v9288_v34  ;;  %v8292_v58 = vadd.f32 %v9287_v6, %v9236_v35 }
 0xc48   :  { %v8295_v29 = vadd.f32 %v9290_v30, %v9236_v35 }
 0xc80   :  { %v9307_v45 = vpop.f32.mrb[144].mxu0 }
 0xc81   :  { %v9308_v36 = vpop.f32.mrb[145].mxu0 }
 0xc82   :  { %v9309_v38 = vadd.f32 %v9308_v36, %v9307_v45  ;;  %v9310_v41 = vpop.f32.mrb[146].mxu0 }
 0xc83   :  { %v9311_v0 = vpop.f32.mrb[147].mxu0 }
 0xc84   :  { %v9312_v57 = vadd.f32 %v9311_v0, %v9310_v41  ;;  %v8333_v4 = vadd.f32 %v9309_v38, %v8292_v58 }
 0xc86   :  { %v8340_v11 = vsel %vm8339_vm2, %v8333_v4, -inf  ;;  %v8336_v54 = vadd.f32 %v9312_v57, %v8295_v29 }
 0xc87   :  { %8341 = vmax.xlane.f32.xlu0 %v8340_v11 }
 0xc88   :  { %v8343_v46 = vsel %vm8339_vm2, %v8336_v54, -inf }
 0xc8b   :  { %8344 = vmax.xlane.f32.xlu0 %v8343_v46 }
 0xd14   :  { %v8342_v59 = vpop.xlane.xlu0 %8341 }
 0xd15   :  { %v8346_v28 = vsub.f32 %v8333_v4, %v8342_v59 }
 0xd17   :  { %v8348_v42 = vmul.f32 1.442695, %v8346_v28 }
 0xd18   :  { %v8345_v43 = vpop.xlane.xlu0 %8344 }
 0xd19   :  { %10999 = vpow2.f32 %v8348_v42  ;;  %v8347_v31 = vsub.f32 %v8336_v54, %v8345_v43 }
 0xd1b   :  { %v8350_v32 = vmul.f32 1.442695, %v8347_v31 }
 0xd1d   :  { %11001 = vpow2.f32 %v8350_v32 }
 0xd23   :  { %v11000_v62 = vpop.eup %10999 }
 0xd24   :  { %v8352_v23 = vsel %vm8339_vm2, %v11000_v62, 0.0 }
 0xd25   :  { %8353 = vadd.xlane.f32.xlu1 %v8352_v23 }
 0xd27   :  { %v11002_v27 = vpop.eup %11001 }
 0xd28   :  { %v8355_v3 = vsel %vm8339_vm2, %v11002_v27, 0.0 }
 0xd29   :  { %8356 = vadd.xlane.f32.xlu1 %v8355_v3 }
 0xdb2   :  { %v8354_v1 = vpop.xlane.xlu1 %8353 }
 0xdb3   :  { %11003 = vlog2.f32 %v8354_v1 }
 0xdb6   :  { %v8357_v24 = vpop.xlane.xlu1 %8356 }
 0xdb7   :  { %11005 = vlog2.f32 %v8357_v24 }
 0xdbd   :  { %v11004_v48 = vpop.eup %11003 }
 0xdbe   :  { %v8359_v50 = vmul.f32 0.6931472, %v11004_v48 }
 0xdc0   :  { %v8362_v60 = vsub.f32 %v8346_v28, %v8359_v50 }
 0xdc1   :  { %v11006_v61 = vpop.eup %11005 }
 0xdc2   :  { %8364 = vst.msk [vmem:[%s12436_s9] sm:$0xff] %vm8339_vm2, %v8362_v60  ;;  %v8361_v20 = vmul.f32 0.6931472, %v11006_v61 }
 0xdc4   :  { %v8363_v26 = vsub.f32 %v8347_v31, %v8361_v20 }
 0xdc6   :  { %8365 = vst.msk [vmem:[%s12436_s9 + $0x8] sm:$0xff] %vm8339_vm2, %v8363_v26 }
 0xdc7   :  { %8370 = vsyncpa [#allocation3], 1 }
 0xdc8   :  { %8371 = vsyncpa [#allocation5], 1 }
 0xdc9   :  { %8372 = vsyncpa [#allocation8], 1 }
 0xdca   :  { %8373 = vsyncpa [#allocation11], 1 }

</bundles_post_ra>
